<compile_context>
chip_gen: v5e
topology: v5e:2x2
jax: 0.10.0
libtpu: 0.0.40
codegen_flags: <defaults>
</compile_context>

<pallas_src>
import functools
import numpy as np
import jax
import jax.numpy as jnp
from jax import lax
from jax.experimental import pallas as pl
from jax.experimental.pallas import tpu as pltpu


def _round_up(x, m):
    return ((x + m - 1) // m) * m


def _size_bytes(shape, dtype):
    return int(np.prod(shape)) * jnp.dtype(dtype).itemsize


def _sigmoid(x):
    # tanh-form sigmoid: one EUP transcendental per gate (vs exp + recip).
    return 0.5 * jnp.tanh(0.5 * x) + 0.5


# ------------------------ Fused multi-layer LSTM + FC kernel ------------------
def _fused_kernel(*refs, T, Bp, Mp, L, n_act, compute_dtype, unroll):
    """All L LSTM layers + FC head in one kernel invocation (no grid).

    Ref layout (inputs, outputs, scratch):
      refs[0]                : x        (T*Bp, Dp)       compute_dtype
      refs[1 : 1+3L]         : per layer (w_ih_t (Din_p,4Mp), w_hh_t (Mp,4Mp),
                                          b (1,4Mp) f32)
      refs[1+3L]             : w_fc_t   (Mp, Kp)         compute_dtype
      refs[2+3L]             : b_fc     (1, Kp)          f32
      refs[3+3L]             : o        (Bp, Kp)         f32   (output)
      refs[4+3L]             : gx       (T*Bp, 4Mp)      f32   (scratch)
      refs[5+3L:]            : act ping-pong buffers (T*Bp, Mp) compute_dtype
    """
    x_ref = refs[0]
    layer_refs = refs[1:1 + 3 * L]
    w_fc_ref = refs[1 + 3 * L]
    b_fc_ref = refs[2 + 3 * L]
    o_ref = refs[3 + 3 * L]
    gx_ref = refs[4 + 3 * L]
    act_refs = refs[5 + 3 * L:]

    cur_in_ref = x_ref
    h_last = None

    for layer in range(L):
        w_ih_ref = layer_refs[3 * layer + 0]
        w_hh_ref = layer_refs[3 * layer + 1]
        b_ref = layer_refs[3 * layer + 2]
        is_last = layer == L - 1
        out_ref = None if is_last else act_refs[layer % n_act]

        # Hoisted input projection (no sequential dependence): one big MXU
        # matmul for the whole sequence, materialised into VMEM scratch so the
        # unrolled/looped recurrence reads bounded 8-row slices of it.
        gx_ref[...] = jnp.dot(cur_in_ref[...], w_ih_ref[...],
                              preferred_element_type=jnp.float32)

        w_hh = w_hh_ref[...]            # loaded once; reused RHS for all T steps
        b = b_ref[...]                  # bias folded into the per-step (Bp,4Mp) add

        def step(t, carry, out_ref=out_ref, w_hh=w_hh, b=b):
            h, c = carry
            row = pl.multiple_of(t * Bp, Bp)
            gates = (
                gx_ref[pl.ds(row, Bp), :]
                + jnp.dot(h.astype(compute_dtype), w_hh,
                          preferred_element_type=jnp.float32)
                + b
            )                                             # (Bp, 4Mp) f32
            # Gate slices are lane-aligned: each block is exactly Mp=128k lanes.
            i_g = _sigmoid(gates[:, 0 * Mp:1 * Mp])
            f_g = _sigmoid(gates[:, 1 * Mp:2 * Mp])
            g_g = jnp.tanh(gates[:, 2 * Mp:3 * Mp])
            o_g = _sigmoid(gates[:, 3 * Mp:4 * Mp])
            c = f_g * c + i_g * g_g
            h = o_g * jnp.tanh(c)
            if out_ref is not None:
                out_ref[pl.ds(row, Bp), :] = h.astype(out_ref.dtype)
            return h, c

        h0 = jnp.zeros((Bp, Mp), jnp.float32)
        c0 = jnp.zeros((Bp, Mp), jnp.float32)
        h_last, _ = lax.fori_loop(0, T, step, (h0, c0), unroll=unroll)

        if not is_last:
            cur_in_ref = out_ref

    # Fused FC head on the final hidden state only: lane/sublane-dense store.
    o_ref[...] = (
        jnp.dot(h_last.astype(compute_dtype), w_fc_ref[...],
                preferred_element_type=jnp.float32)
        + b_fc_ref[...]
    )


# ------------------------------- Forward wrapper -------------------------------
@jax.jit
def _rnn_forward_padded(layers, fc_w, fc_b, X):
    """layers: tuple of (w_ih_t, w_hh_t, b) padded arrays. X: (B, T, D).
    Returns padded logits (Bp, Kp) in f32."""
    B, T, D = X.shape
    L = len(layers)
    Dp = layers[0][0].shape[0]
    Mp = layers[0][1].shape[0]
    Kp = fc_w.shape[1]
    compute_dtype = layers[0][0].dtype
    Bp = _round_up(B, 8)

    # Time-major, padded, flattened: row = t*Bp + b.
    x = jnp.transpose(X, (1, 0, 2)).astype(jnp.float32)           # (T, B, D)
    x = jnp.pad(x, ((0, 0), (0, Bp - B), (0, Dp - D)))
    x2d = x.reshape(T * Bp, Dp).astype(compute_dtype)

    n_act = min(2, max(L - 1, 0))
    flat_inputs = [x2d]
    for (w_ih_t, w_hh_t, b) in layers:
        flat_inputs += [w_ih_t, w_hh_t, b]
    flat_inputs += [fc_w, fc_b]
    n_in = len(flat_inputs)

    scratch_shapes = [pltpu.VMEM((T * Bp, 4 * Mp), jnp.float32)]
    scratch_shapes += [pltpu.VMEM((T * Bp, Mp), compute_dtype)
                       for _ in range(n_act)]

    # Explicit scoped-VMEM budget sized from actual residency (with slack),
    # capped at the smallest physical VMEM (v7x: 64 MiB per TensorCore).
    est = sum(_size_bytes(a.shape, a.dtype) for a in flat_inputs)
    est += _size_bytes((Bp, Kp), jnp.float32)
    est += _size_bytes((T * Bp, 4 * Mp), jnp.float32)
    est += n_act * _size_bytes((T * Bp, Mp), compute_dtype)
    vmem_limit = int(min(64 * 1024 * 1024,
                         max(16 * 1024 * 1024, 2 * est + (2 << 20))))

    unroll = True if T <= 16 else 4

    kernel = functools.partial(
        _fused_kernel, T=T, Bp=Bp, Mp=Mp, L=L, n_act=n_act,
        compute_dtype=compute_dtype, unroll=unroll)

    return pl.pallas_call(
        kernel,
        out_shape=jax.ShapeDtypeStruct((Bp, Kp), jnp.float32),
        in_specs=[pl.BlockSpec(memory_space=pltpu.MemorySpace.VMEM)] * n_in,
        out_specs=pl.BlockSpec(memory_space=pltpu.MemorySpace.VMEM),
        scratch_shapes=scratch_shapes,
        compiler_params=pltpu.CompilerParams(vmem_limit_bytes=vmem_limit),
    )(*flat_inputs)


def rnn_forward(prepared, X):
    """X: (B, T, D) batch-first -> logits (B, K). h0 = c0 = 0 (as in the module)."""
    out_p = _rnn_forward_padded(tuple(prepared["layers"]),
                                prepared["fc_w"], prepared["fc_b"], X)
    return out_p[:X.shape[0], :prepared["K"]]


# ------------------------- Param init & one-time preparation -------------------
def init_params(key, n_inputs, n_hidden, n_layers, n_outputs):
    """Deterministic init matching PyTorch shapes (uniform +-1/sqrt(M))."""
    D, M, L, K = n_inputs, n_hidden, n_layers, n_outputs
    bound = 1.0 / np.sqrt(M)
    params = {"lstm": [], "fc": {}}
    for layer in range(L):
        din = D if layer == 0 else M
        key, k1, k2, k3, k4 = jax.random.split(key, 5)
        params["lstm"].append({
            "w_ih": jax.random.uniform(k1, (4 * M, din), jnp.float32, -bound, bound),
            "w_hh": jax.random.uniform(k2, (4 * M, M), jnp.float32, -bound, bound),
            "b_ih": jax.random.uniform(k3, (4 * M,), jnp.float32, -bound, bound),
            "b_hh": jax.random.uniform(k4, (4 * M,), jnp.float32, -bound, bound),
        })
    key, k1, k2 = jax.random.split(key, 3)
    params["fc"]["w"] = jax.random.uniform(k1, (K, M), jnp.float32, -bound, bound)
    params["fc"]["b"] = jax.random.uniform(k2, (K,), jnp.float32, -bound, bound)
    return params


def prepare_params(params, compute_dtype=jnp.float32):
    """One-time preprocessing: transpose, fold b_ih+b_hh, and zero-pad so that
    B -> mult of 8, M/D/K -> mult of 128, with every gate block on a 128-lane
    boundary.  Padded rows/cols are zero, which keeps padded hidden units
    exactly zero through the recurrence (tanh(0)=0 kills the candidate gate)."""
    lstm = params["lstm"]
    M = int(lstm[0]["w_hh"].shape[1])
    Mp = _round_up(M, 128)
    layers = []
    for i, lp in enumerate(lstm):
        din = int(lp["w_ih"].shape[1])
        dinp = _round_up(din, 128) if i == 0 else Mp
        wiT = lp["w_ih"].T                                  # (din, 4M)
        whT = lp["w_hh"].T                                  # (M,   4M)
        bsum = lp["b_ih"] + lp["b_hh"]                      # (4M,)
        w_ih_t = jnp.zeros((dinp, 4 * Mp), compute_dtype)
        w_hh_t = jnp.zeros((Mp, 4 * Mp), compute_dtype)
        b = jnp.zeros((1, 4 * Mp), jnp.float32)
        for g in range(4):
            w_ih_t = w_ih_t.at[:din, g * Mp:g * Mp + M].set(
                wiT[:, g * M:(g + 1) * M].astype(compute_dtype))
            w_hh_t = w_hh_t.at[:M, g * Mp:g * Mp + M].set(
                whT[:, g * M:(g + 1) * M].astype(compute_dtype))
            b = b.at[0, g * Mp:g * Mp + M].set(bsum[g * M:(g + 1) * M])
        layers.append((w_ih_t, w_hh_t, b))

    K = int(params["fc"]["w"].shape[0])
    Kp = _round_up(K, 128)
    fc_w = jnp.zeros((Mp, Kp), compute_dtype).at[:M, :K].set(
        params["fc"]["w"].T.astype(compute_dtype))
    fc_b = jnp.zeros((1, Kp), jnp.float32).at[0, :K].set(params["fc"]["b"])
    return {"layers": layers, "fc_w": fc_w, "fc_b": fc_b, "M": M, "K": K}


# ------------------------------ Pure-JAX reference ----------------------------
def rnn_reference(params, X, n_hidden):
    x = X.astype(jnp.float32)
    B, T, _ = x.shape
    M = n_hidden
    for lp in params["lstm"]:
        h = jnp.zeros((B, M), jnp.float32)
        c = jnp.zeros((B, M), jnp.float32)
        outs = []
        for t in range(T):
            gates = x[:, t, :] @ lp["w_ih"].T + h @ lp["w_hh"].T + lp["b_ih"] + lp["b_hh"]
            i_g = jax.nn.sigmoid(gates[:, 0 * M:1 * M])
            f_g = jax.nn.sigmoid(gates[:, 1 * M:2 * M])
            g_g = jnp.tanh(gates[:, 2 * M:3 * M])
            o_g = jax.nn.sigmoid(gates[:, 3 * M:4 * M])
            c = f_g * c + i_g * g_g
            h = o_g * jnp.tanh(c)
            outs.append(h)
        x = jnp.stack(outs, axis=1)
    return x[:, -1, :] @ params["fc"]["w"].T + params["fc"]["b"]


if __name__ == "__main__":
    # Small shapes consistent with the module: sequence of D-dim rows.
    B, T, D, M, L, K = 2, 8, 16, 32, 2, 10

    key = jax.random.PRNGKey(0)
    key, xkey = jax.random.split(key)
    X = jax.random.normal(xkey, (B, T, D), jnp.float32)

    params = init_params(key, n_inputs=D, n_hidden=M, n_layers=L, n_outputs=K)
    ref = rnn_reference(params, X, n_hidden=M)

    # f32 MXU path (bit-close to the f32 reference).
    prepared_f32 = prepare_params(params, compute_dtype=jnp.float32)
    out = jax.block_until_ready(rnn_forward(prepared_f32, X))
    assert out.shape == (B, K), out.shape
    np.testing.assert_allclose(np.asarray(out), np.asarray(ref), rtol=1e-4, atol=1e-4)

    # bf16 MXU-operand path (f32 accumulation + f32 gate math) for v6e/v7x peak.
    prepared_bf16 = prepare_params(params, compute_dtype=jnp.bfloat16)
    out_bf16 = jax.block_until_ready(rnn_forward(prepared_bf16, X))
    np.testing.assert_allclose(np.asarray(out_bf16), np.asarray(ref),
                               rtol=5e-2, atol=5e-2)

    print("KERNEL_OK")
</pallas_src>

<mosaic_0001>
module attributes {stable_mosaic.version = 11 : i64} {
  func.func @_fused_kernel(%arg0: memref<64x128xf32, #tpu.memory_space<vmem>>, %arg1: memref<128x512xf32, #tpu.memory_space<vmem>>, %arg2: memref<128x512xf32, #tpu.memory_space<vmem>>, %arg3: memref<1x512xf32, #tpu.memory_space<vmem>>, %arg4: memref<128x512xf32, #tpu.memory_space<vmem>>, %arg5: memref<128x512xf32, #tpu.memory_space<vmem>>, %arg6: memref<1x512xf32, #tpu.memory_space<vmem>>, %arg7: memref<128x128xf32, #tpu.memory_space<vmem>>, %arg8: memref<1x128xf32, #tpu.memory_space<vmem>>, %arg9: memref<8x128xf32, #tpu.memory_space<vmem>>, %arg10: memref<64x512xf32, #tpu.memory_space<vmem>>, %arg11: memref<64x128xf32, #tpu.memory_space<vmem>>) attributes {dimension_semantics = [], scalar_prefetch = 0 : i64, scratch_operands = 2 : i64, tpu.core_type = #tpu.core_type<tc>} {
    %c0 = arith.constant 0 : index
    %c0_0 = arith.constant 0 : index
    %0 = vector.load %arg0[%c0, %c0_0] : memref<64x128xf32, #tpu.memory_space<vmem>>, vector<64x128xf32>
    %c0_1 = arith.constant 0 : index
    %c0_2 = arith.constant 0 : index
    %1 = vector.load %arg1[%c0_1, %c0_2] : memref<128x512xf32, #tpu.memory_space<vmem>>, vector<128x512xf32>
    %cst = arith.constant dense<0.000000e+00> : vector<64x512xf32>
    %2 = tpu.matmul %0, %1, %cst {dimension_numbers = #tpu.dot_dimension_numbers<[1], [0], [0], [1], [0, 0, 1, 1], [], []>} : vector<64x128xf32>, vector<128x512xf32>, vector<64x512xf32> -> vector<64x512xf32>
    %c0_3 = arith.constant 0 : index
    %c0_4 = arith.constant 0 : index
    %3 = vector.load %arg10[%c0_3, %c0_4] : memref<64x512xf32, #tpu.memory_space<vmem>>, vector<64x512xf32>
    tpu.vector_store %arg10[%c0_3, %c0_4], %2 {strides = array<i32>} : memref<64x512xf32, #tpu.memory_space<vmem>>, vector<64x512xf32>,
    %c0_5 = arith.constant 0 : index
    %c0_6 = arith.constant 0 : index
    %4 = vector.load %arg2[%c0_5, %c0_6] : memref<128x512xf32, #tpu.memory_space<vmem>>, vector<128x512xf32>
    %c0_7 = arith.constant 0 : index
    %c0_8 = arith.constant 0 : index
    %5 = vector.load %arg3[%c0_7, %c0_8] : memref<1x512xf32, #tpu.memory_space<vmem>>, vector<1x512xf32>
    %cst_9 = arith.constant 0.000000e+00 : f32
    %6 = vector.broadcast %cst_9 : f32 to vector<8x128xf32>
    %cst_10 = arith.constant 0.000000e+00 : f32
    %7 = vector.broadcast %cst_10 : f32 to vector<8x128xf32>
    %c0_i32 = arith.constant 0 : i32
    %c8_i32 = arith.constant 8 : i32
    %8 = arith.muli %c0_i32, %c8_i32 : i32
    %9 = tpu.assume_multiple %8, 8 : i32
    %10 = arith.index_cast %9 : i32 to index
    %c0_11 = arith.constant 0 : index
    %11 = vector.load %arg10[%10, %c0_11] : memref<64x512xf32, #tpu.memory_space<vmem>>, vector<8x512xf32>
    %cst_12 = arith.constant dense<0.000000e+00> : vector<8x512xf32>
    %12 = tpu.matmul %6, %4, %cst_12 {dimension_numbers = #tpu.dot_dimension_numbers<[1], [0], [0], [1], [0, 0, 1, 1], [], []>} : vector<8x128xf32>, vector<128x512xf32>, vector<8x512xf32> -> vector<8x512xf32>
    %13 = arith.addf %11, %12 : vector<8x512xf32>
    %14 = vector.broadcast %5 : vector<1x512xf32> to vector<8x512xf32>
    %15 = arith.addf %13, %14 : vector<8x512xf32>
    %16 = vector.extract_strided_slice %15 {offsets = [0, 0], sizes = [8, 128], strides = [1, 1]} : vector<8x512xf32> to vector<8x128xf32>
    %cst_13 = arith.constant 5.000000e-01 : f32
    %17 = vector.broadcast %cst_13 : f32 to vector<8x128xf32>
    %18 = arith.mulf %17, %16 : vector<8x128xf32>
    %19 = math.tanh %18 : vector<8x128xf32>
    %cst_14 = arith.constant 5.000000e-01 : f32
    %20 = vector.broadcast %cst_14 : f32 to vector<8x128xf32>
    %21 = arith.mulf %20, %19 : vector<8x128xf32>
    %cst_15 = arith.constant 5.000000e-01 : f32
    %22 = vector.broadcast %cst_15 : f32 to vector<8x128xf32>
    %23 = arith.addf %21, %22 : vector<8x128xf32>
    %24 = vector.extract_strided_slice %15 {offsets = [0, 128], sizes = [8, 128], strides = [1, 1]} : vector<8x512xf32> to vector<8x128xf32>
    %cst_16 = arith.constant 5.000000e-01 : f32
    %25 = vector.broadcast %cst_16 : f32 to vector<8x128xf32>
    %26 = arith.mulf %25, %24 : vector<8x128xf32>
    %27 = math.tanh %26 : vector<8x128xf32>
    %cst_17 = arith.constant 5.000000e-01 : f32
    %28 = vector.broadcast %cst_17 : f32 to vector<8x128xf32>
    %29 = arith.mulf %28, %27 : vector<8x128xf32>
    %cst_18 = arith.constant 5.000000e-01 : f32
    %30 = vector.broadcast %cst_18 : f32 to vector<8x128xf32>
    %31 = arith.addf %29, %30 : vector<8x128xf32>
    %32 = vector.extract_strided_slice %15 {offsets = [0, 256], sizes = [8, 128], strides = [1, 1]} : vector<8x512xf32> to vector<8x128xf32>
    %33 = math.tanh %32 : vector<8x128xf32>
    %34 = vector.extract_strided_slice %15 {offsets = [0, 384], sizes = [8, 128], strides = [1, 1]} : vector<8x512xf32> to vector<8x128xf32>
    %cst_19 = arith.constant 5.000000e-01 : f32
    %35 = vector.broadcast %cst_19 : f32 to vector<8x128xf32>
    %36 = arith.mulf %35, %34 : vector<8x128xf32>
    %37 = math.tanh %36 : vector<8x128xf32>
    %cst_20 = arith.constant 5.000000e-01 : f32
    %38 = vector.broadcast %cst_20 : f32 to vector<8x128xf32>
    %39 = arith.mulf %38, %37 : vector<8x128xf32>
    %cst_21 = arith.constant 5.000000e-01 : f32
    %40 = vector.broadcast %cst_21 : f32 to vector<8x128xf32>
    %41 = arith.addf %39, %40 : vector<8x128xf32>
    %42 = arith.mulf %31, %7 : vector<8x128xf32>
    %43 = arith.mulf %23, %33 : vector<8x128xf32>
    %44 = arith.addf %42, %43 : vector<8x128xf32>
    %45 = math.tanh %44 : vector<8x128xf32>
    %46 = arith.mulf %41, %45 : vector<8x128xf32>
    %47 = arith.index_cast %9 : i32 to index
    %c0_22 = arith.constant 0 : index
    %48 = vector.load %arg11[%47, %c0_22] : memref<64x128xf32, #tpu.memory_space<vmem>>, vector<8x128xf32>
    tpu.vector_store %arg11[%47, %c0_22], %46 {strides = array<i32>} : memref<64x128xf32, #tpu.memory_space<vmem>>, vector<8x128xf32>,
    %c1_i32 = arith.constant 1 : i32
    %c8_i32_23 = arith.constant 8 : i32
    %49 = arith.muli %c1_i32, %c8_i32_23 : i32
    %50 = tpu.assume_multiple %49, 8 : i32
    %51 = arith.index_cast %50 : i32 to index
    %c0_24 = arith.constant 0 : index
    %52 = vector.load %arg10[%51, %c0_24] : memref<64x512xf32, #tpu.memory_space<vmem>>, vector<8x512xf32>
    %cst_25 = arith.constant dense<0.000000e+00> : vector<8x512xf32>
    %53 = tpu.matmul %46, %4, %cst_25 {dimension_numbers = #tpu.dot_dimension_numbers<[1], [0], [0], [1], [0, 0, 1, 1], [], []>} : vector<8x128xf32>, vector<128x512xf32>, vector<8x512xf32> -> vector<8x512xf32>
    %54 = arith.addf %52, %53 : vector<8x512xf32>
    %55 = vector.broadcast %5 : vector<1x512xf32> to vector<8x512xf32>
    %56 = arith.addf %54, %55 : vector<8x512xf32>
    %57 = vector.extract_strided_slice %56 {offsets = [0, 0], sizes = [8, 128], strides = [1, 1]} : vector<8x512xf32> to vector<8x128xf32>
    %cst_26 = arith.constant 5.000000e-01 : f32
    %58 = vector.broadcast %cst_26 : f32 to vector<8x128xf32>
    %59 = arith.mulf %58, %57 : vector<8x128xf32>
    %60 = math.tanh %59 : vector<8x128xf32>
    %cst_27 = arith.constant 5.000000e-01 : f32
    %61 = vector.broadcast %cst_27 : f32 to vector<8x128xf32>
    %62 = arith.mulf %61, %60 : vector<8x128xf32>
    %cst_28 = arith.constant 5.000000e-01 : f32
    %63 = vector.broadcast %cst_28 : f32 to vector<8x128xf32>
    %64 = arith.addf %62, %63 : vector<8x128xf32>
    %65 = vector.extract_strided_slice %56 {offsets = [0, 128], sizes = [8, 128], strides = [1, 1]} : vector<8x512xf32> to vector<8x128xf32>
    %cst_29 = arith.constant 5.000000e-01 : f32
    %66 = vector.broadcast %cst_29 : f32 to vector<8x128xf32>
    %67 = arith.mulf %66, %65 : vector<8x128xf32>
    %68 = math.tanh %67 : vector<8x128xf32>
    %cst_30 = arith.constant 5.000000e-01 : f32
    %69 = vector.broadcast %cst_30 : f32 to vector<8x128xf32>
    %70 = arith.mulf %69, %68 : vector<8x128xf32>
    %cst_31 = arith.constant 5.000000e-01 : f32
    %71 = vector.broadcast %cst_31 : f32 to vector<8x128xf32>
    %72 = arith.addf %70, %71 : vector<8x128xf32>
    %73 = vector.extract_strided_slice %56 {offsets = [0, 256], sizes = [8, 128], strides = [1, 1]} : vector<8x512xf32> to vector<8x128xf32>
    %74 = math.tanh %73 : vector<8x128xf32>
    %75 = vector.extract_strided_slice %56 {offsets = [0, 384], sizes = [8, 128], strides = [1, 1]} : vector<8x512xf32> to vector<8x128xf32>
    %cst_32 = arith.constant 5.000000e-01 : f32
    %76 = vector.broadcast %cst_32 : f32 to vector<8x128xf32>
    %77 = arith.mulf %76, %75 : vector<8x128xf32>
    %78 = math.tanh %77 : vector<8x128xf32>
    %cst_33 = arith.constant 5.000000e-01 : f32
    %79 = vector.broadcast %cst_33 : f32 to vector<8x128xf32>
    %80 = arith.mulf %79, %78 : vector<8x128xf32>
    %cst_34 = arith.constant 5.000000e-01 : f32
    %81 = vector.broadcast %cst_34 : f32 to vector<8x128xf32>
    %82 = arith.addf %80, %81 : vector<8x128xf32>
    %83 = arith.mulf %72, %44 : vector<8x128xf32>
    %84 = arith.mulf %64, %74 : vector<8x128xf32>
    %85 = arith.addf %83, %84 : vector<8x128xf32>
    %86 = math.tanh %85 : vector<8x128xf32>
    %87 = arith.mulf %82, %86 : vector<8x128xf32>
    %88 = arith.index_cast %50 : i32 to index
    %c0_35 = arith.constant 0 : index
    %89 = vector.load %arg11[%88, %c0_35] : memref<64x128xf32, #tpu.memory_space<vmem>>, vector<8x128xf32>
    tpu.vector_store %arg11[%88, %c0_35], %87 {strides = array<i32>} : memref<64x128xf32, #tpu.memory_space<vmem>>, vector<8x128xf32>,
    %c2_i32 = arith.constant 2 : i32
    %c8_i32_36 = arith.constant 8 : i32
    %90 = arith.muli %c2_i32, %c8_i32_36 : i32
    %91 = tpu.assume_multiple %90, 8 : i32
    %92 = arith.index_cast %91 : i32 to index
    %c0_37 = arith.constant 0 : index
    %93 = vector.load %arg10[%92, %c0_37] : memref<64x512xf32, #tpu.memory_space<vmem>>, vector<8x512xf32>
    %cst_38 = arith.constant dense<0.000000e+00> : vector<8x512xf32>
    %94 = tpu.matmul %87, %4, %cst_38 {dimension_numbers = #tpu.dot_dimension_numbers<[1], [0], [0], [1], [0, 0, 1, 1], [], []>} : vector<8x128xf32>, vector<128x512xf32>, vector<8x512xf32> -> vector<8x512xf32>
    %95 = arith.addf %93, %94 : vector<8x512xf32>
    %96 = vector.broadcast %5 : vector<1x512xf32> to vector<8x512xf32>
    %97 = arith.addf %95, %96 : vector<8x512xf32>
    %98 = vector.extract_strided_slice %97 {offsets = [0, 0], sizes = [8, 128], strides = [1, 1]} : vector<8x512xf32> to vector<8x128xf32>
    %cst_39 = arith.constant 5.000000e-01 : f32
    %99 = vector.broadcast %cst_39 : f32 to vector<8x128xf32>
    %100 = arith.mulf %99, %98 : vector<8x128xf32>
    %101 = math.tanh %100 : vector<8x128xf32>
    %cst_40 = arith.constant 5.000000e-01 : f32
    %102 = vector.broadcast %cst_40 : f32 to vector<8x128xf32>
    %103 = arith.mulf %102, %101 : vector<8x128xf32>
    %cst_41 = arith.constant 5.000000e-01 : f32
    %104 = vector.broadcast %cst_41 : f32 to vector<8x128xf32>
    %105 = arith.addf %103, %104 : vector<8x128xf32>
    %106 = vector.extract_strided_slice %97 {offsets = [0, 128], sizes = [8, 128], strides = [1, 1]} : vector<8x512xf32> to vector<8x128xf32>
    %cst_42 = arith.constant 5.000000e-01 : f32
    %107 = vector.broadcast %cst_42 : f32 to vector<8x128xf32>
    %108 = arith.mulf %107, %106 : vector<8x128xf32>
    %109 = math.tanh %108 : vector<8x128xf32>
    %cst_43 = arith.constant 5.000000e-01 : f32
    %110 = vector.broadcast %cst_43 : f32 to vector<8x128xf32>
    %111 = arith.mulf %110, %109 : vector<8x128xf32>
    %cst_44 = arith.constant 5.000000e-01 : f32
    %112 = vector.broadcast %cst_44 : f32 to vector<8x128xf32>
    %113 = arith.addf %111, %112 : vector<8x128xf32>
    %114 = vector.extract_strided_slice %97 {offsets = [0, 256], sizes = [8, 128], strides = [1, 1]} : vector<8x512xf32> to vector<8x128xf32>
    %115 = math.tanh %114 : vector<8x128xf32>
    %116 = vector.extract_strided_slice %97 {offsets = [0, 384], sizes = [8, 128], strides = [1, 1]} : vector<8x512xf32> to vector<8x128xf32>
    %cst_45 = arith.constant 5.000000e-01 : f32
    %117 = vector.broadcast %cst_45 : f32 to vector<8x128xf32>
    %118 = arith.mulf %117, %116 : vector<8x128xf32>
    %119 = math.tanh %118 : vector<8x128xf32>
    %cst_46 = arith.constant 5.000000e-01 : f32
    %120 = vector.broadcast %cst_46 : f32 to vector<8x128xf32>
    %121 = arith.mulf %120, %119 : vector<8x128xf32>
    %cst_47 = arith.constant 5.000000e-01 : f32
    %122 = vector.broadcast %cst_47 : f32 to vector<8x128xf32>
    %123 = arith.addf %121, %122 : vector<8x128xf32>
    %124 = arith.mulf %113, %85 : vector<8x128xf32>
    %125 = arith.mulf %105, %115 : vector<8x128xf32>
    %126 = arith.addf %124, %125 : vector<8x128xf32>
    %127 = math.tanh %126 : vector<8x128xf32>
    %128 = arith.mulf %123, %127 : vector<8x128xf32>
    %129 = arith.index_cast %91 : i32 to index
    %c0_48 = arith.constant 0 : index
    %130 = vector.load %arg11[%129, %c0_48] : memref<64x128xf32, #tpu.memory_space<vmem>>, vector<8x128xf32>
    tpu.vector_store %arg11[%129, %c0_48], %128 {strides = array<i32>} : memref<64x128xf32, #tpu.memory_space<vmem>>, vector<8x128xf32>,
    %c3_i32 = arith.constant 3 : i32
    %c8_i32_49 = arith.constant 8 : i32
    %131 = arith.muli %c3_i32, %c8_i32_49 : i32
    %132 = tpu.assume_multiple %131, 8 : i32
    %133 = arith.index_cast %132 : i32 to index
    %c0_50 = arith.constant 0 : index
    %134 = vector.load %arg10[%133, %c0_50] : memref<64x512xf32, #tpu.memory_space<vmem>>, vector<8x512xf32>
    %cst_51 = arith.constant dense<0.000000e+00> : vector<8x512xf32>
    %135 = tpu.matmul %128, %4, %cst_51 {dimension_numbers = #tpu.dot_dimension_numbers<[1], [0], [0], [1], [0, 0, 1, 1], [], []>} : vector<8x128xf32>, vector<128x512xf32>, vector<8x512xf32> -> vector<8x512xf32>
    %136 = arith.addf %134, %135 : vector<8x512xf32>
    %137 = vector.broadcast %5 : vector<1x512xf32> to vector<8x512xf32>
    %138 = arith.addf %136, %137 : vector<8x512xf32>
    %139 = vector.extract_strided_slice %138 {offsets = [0, 0], sizes = [8, 128], strides = [1, 1]} : vector<8x512xf32> to vector<8x128xf32>
    %cst_52 = arith.constant 5.000000e-01 : f32
    %140 = vector.broadcast %cst_52 : f32 to vector<8x128xf32>
    %141 = arith.mulf %140, %139 : vector<8x128xf32>
    %142 = math.tanh %141 : vector<8x128xf32>
    %cst_53 = arith.constant 5.000000e-01 : f32
    %143 = vector.broadcast %cst_53 : f32 to vector<8x128xf32>
    %144 = arith.mulf %143, %142 : vector<8x128xf32>
    %cst_54 = arith.constant 5.000000e-01 : f32
    %145 = vector.broadcast %cst_54 : f32 to vector<8x128xf32>
    %146 = arith.addf %144, %145 : vector<8x128xf32>
    %147 = vector.extract_strided_slice %138 {offsets = [0, 128], sizes = [8, 128], strides = [1, 1]} : vector<8x512xf32> to vector<8x128xf32>
    %cst_55 = arith.constant 5.000000e-01 : f32
    %148 = vector.broadcast %cst_55 : f32 to vector<8x128xf32>
    %149 = arith.mulf %148, %147 : vector<8x128xf32>
    %150 = math.tanh %149 : vector<8x128xf32>
    %cst_56 = arith.constant 5.000000e-01 : f32
    %151 = vector.broadcast %cst_56 : f32 to vector<8x128xf32>
    %152 = arith.mulf %151, %150 : vector<8x128xf32>
    %cst_57 = arith.constant 5.000000e-01 : f32
    %153 = vector.broadcast %cst_57 : f32 to vector<8x128xf32>
    %154 = arith.addf %152, %153 : vector<8x128xf32>
    %155 = vector.extract_strided_slice %138 {offsets = [0, 256], sizes = [8, 128], strides = [1, 1]} : vector<8x512xf32> to vector<8x128xf32>
    %156 = math.tanh %155 : vector<8x128xf32>
    %157 = vector.extract_strided_slice %138 {offsets = [0, 384], sizes = [8, 128], strides = [1, 1]} : vector<8x512xf32> to vector<8x128xf32>
    %cst_58 = arith.constant 5.000000e-01 : f32
    %158 = vector.broadcast %cst_58 : f32 to vector<8x128xf32>
    %159 = arith.mulf %158, %157 : vector<8x128xf32>
    %160 = math.tanh %159 : vector<8x128xf32>
    %cst_59 = arith.constant 5.000000e-01 : f32
    %161 = vector.broadcast %cst_59 : f32 to vector<8x128xf32>
    %162 = arith.mulf %161, %160 : vector<8x128xf32>
    %cst_60 = arith.constant 5.000000e-01 : f32
    %163 = vector.broadcast %cst_60 : f32 to vector<8x128xf32>
    %164 = arith.addf %162, %163 : vector<8x128xf32>
    %165 = arith.mulf %154, %126 : vector<8x128xf32>
    %166 = arith.mulf %146, %156 : vector<8x128xf32>
    %167 = arith.addf %165, %166 : vector<8x128xf32>
    %168 = math.tanh %167 : vector<8x128xf32>
    %169 = arith.mulf %164, %168 : vector<8x128xf32>
    %170 = arith.index_cast %132 : i32 to index
    %c0_61 = arith.constant 0 : index
    %171 = vector.load %arg11[%170, %c0_61] : memref<64x128xf32, #tpu.memory_space<vmem>>, vector<8x128xf32>
    tpu.vector_store %arg11[%170, %c0_61], %169 {strides = array<i32>} : memref<64x128xf32, #tpu.memory_space<vmem>>, vector<8x128xf32>,
    %c4_i32 = arith.constant 4 : i32
    %c8_i32_62 = arith.constant 8 : i32
    %172 = arith.muli %c4_i32, %c8_i32_62 : i32
    %173 = tpu.assume_multiple %172, 8 : i32
    %174 = arith.index_cast %173 : i32 to index
    %c0_63 = arith.constant 0 : index
    %175 = vector.load %arg10[%174, %c0_63] : memref<64x512xf32, #tpu.memory_space<vmem>>, vector<8x512xf32>
    %cst_64 = arith.constant dense<0.000000e+00> : vector<8x512xf32>
    %176 = tpu.matmul %169, %4, %cst_64 {dimension_numbers = #tpu.dot_dimension_numbers<[1], [0], [0], [1], [0, 0, 1, 1], [], []>} : vector<8x128xf32>, vector<128x512xf32>, vector<8x512xf32> -> vector<8x512xf32>
    %177 = arith.addf %175, %176 : vector<8x512xf32>
    %178 = vector.broadcast %5 : vector<1x512xf32> to vector<8x512xf32>
    %179 = arith.addf %177, %178 : vector<8x512xf32>
    %180 = vector.extract_strided_slice %179 {offsets = [0, 0], sizes = [8, 128], strides = [1, 1]} : vector<8x512xf32> to vector<8x128xf32>
    %cst_65 = arith.constant 5.000000e-01 : f32
    %181 = vector.broadcast %cst_65 : f32 to vector<8x128xf32>
    %182 = arith.mulf %181, %180 : vector<8x128xf32>
    %183 = math.tanh %182 : vector<8x128xf32>
    %cst_66 = arith.constant 5.000000e-01 : f32
    %184 = vector.broadcast %cst_66 : f32 to vector<8x128xf32>
    %185 = arith.mulf %184, %183 : vector<8x128xf32>
    %cst_67 = arith.constant 5.000000e-01 : f32
    %186 = vector.broadcast %cst_67 : f32 to vector<8x128xf32>
    %187 = arith.addf %185, %186 : vector<8x128xf32>
    %188 = vector.extract_strided_slice %179 {offsets = [0, 128], sizes = [8, 128], strides = [1, 1]} : vector<8x512xf32> to vector<8x128xf32>
    %cst_68 = arith.constant 5.000000e-01 : f32
    %189 = vector.broadcast %cst_68 : f32 to vector<8x128xf32>
    %190 = arith.mulf %189, %188 : vector<8x128xf32>
    %191 = math.tanh %190 : vector<8x128xf32>
    %cst_69 = arith.constant 5.000000e-01 : f32
    %192 = vector.broadcast %cst_69 : f32 to vector<8x128xf32>
    %193 = arith.mulf %192, %191 : vector<8x128xf32>
    %cst_70 = arith.constant 5.000000e-01 : f32
    %194 = vector.broadcast %cst_70 : f32 to vector<8x128xf32>
    %195 = arith.addf %193, %194 : vector<8x128xf32>
    %196 = vector.extract_strided_slice %179 {offsets = [0, 256], sizes = [8, 128], strides = [1, 1]} : vector<8x512xf32> to vector<8x128xf32>
    %197 = math.tanh %196 : vector<8x128xf32>
    %198 = vector.extract_strided_slice %179 {offsets = [0, 384], sizes = [8, 128], strides = [1, 1]} : vector<8x512xf32> to vector<8x128xf32>
    %cst_71 = arith.constant 5.000000e-01 : f32
    %199 = vector.broadcast %cst_71 : f32 to vector<8x128xf32>
    %200 = arith.mulf %199, %198 : vector<8x128xf32>
    %201 = math.tanh %200 : vector<8x128xf32>
    %cst_72 = arith.constant 5.000000e-01 : f32
    %202 = vector.broadcast %cst_72 : f32 to vector<8x128xf32>
    %203 = arith.mulf %202, %201 : vector<8x128xf32>
    %cst_73 = arith.constant 5.000000e-01 : f32
    %204 = vector.broadcast %cst_73 : f32 to vector<8x128xf32>
    %205 = arith.addf %203, %204 : vector<8x128xf32>
    %206 = arith.mulf %195, %167 : vector<8x128xf32>
    %207 = arith.mulf %187, %197 : vector<8x128xf32>
    %208 = arith.addf %206, %207 : vector<8x128xf32>
    %209 = math.tanh %208 : vector<8x128xf32>
    %210 = arith.mulf %205, %209 : vector<8x128xf32>
    %211 = arith.index_cast %173 : i32 to index
    %c0_74 = arith.constant 0 : index
    %212 = vector.load %arg11[%211, %c0_74] : memref<64x128xf32, #tpu.memory_space<vmem>>, vector<8x128xf32>
    tpu.vector_store %arg11[%211, %c0_74], %210 {strides = array<i32>} : memref<64x128xf32, #tpu.memory_space<vmem>>, vector<8x128xf32>,
    %c5_i32 = arith.constant 5 : i32
    %c8_i32_75 = arith.constant 8 : i32
    %213 = arith.muli %c5_i32, %c8_i32_75 : i32
    %214 = tpu.assume_multiple %213, 8 : i32
    %215 = arith.index_cast %214 : i32 to index
    %c0_76 = arith.constant 0 : index
    %216 = vector.load %arg10[%215, %c0_76] : memref<64x512xf32, #tpu.memory_space<vmem>>, vector<8x512xf32>
    %cst_77 = arith.constant dense<0.000000e+00> : vector<8x512xf32>
    %217 = tpu.matmul %210, %4, %cst_77 {dimension_numbers = #tpu.dot_dimension_numbers<[1], [0], [0], [1], [0, 0, 1, 1], [], []>} : vector<8x128xf32>, vector<128x512xf32>, vector<8x512xf32> -> vector<8x512xf32>
    %218 = arith.addf %216, %217 : vector<8x512xf32>
    %219 = vector.broadcast %5 : vector<1x512xf32> to vector<8x512xf32>
    %220 = arith.addf %218, %219 : vector<8x512xf32>
    %221 = vector.extract_strided_slice %220 {offsets = [0, 0], sizes = [8, 128], strides = [1, 1]} : vector<8x512xf32> to vector<8x128xf32>
    %cst_78 = arith.constant 5.000000e-01 : f32
    %222 = vector.broadcast %cst_78 : f32 to vector<8x128xf32>
    %223 = arith.mulf %222, %221 : vector<8x128xf32>
    %224 = math.tanh %223 : vector<8x128xf32>
    %cst_79 = arith.constant 5.000000e-01 : f32
    %225 = vector.broadcast %cst_79 : f32 to vector<8x128xf32>
    %226 = arith.mulf %225, %224 : vector<8x128xf32>
    %cst_80 = arith.constant 5.000000e-01 : f32
    %227 = vector.broadcast %cst_80 : f32 to vector<8x128xf32>
    %228 = arith.addf %226, %227 : vector<8x128xf32>
    %229 = vector.extract_strided_slice %220 {offsets = [0, 128], sizes = [8, 128], strides = [1, 1]} : vector<8x512xf32> to vector<8x128xf32>
    %cst_81 = arith.constant 5.000000e-01 : f32
    %230 = vector.broadcast %cst_81 : f32 to vector<8x128xf32>
    %231 = arith.mulf %230, %229 : vector<8x128xf32>
    %232 = math.tanh %231 : vector<8x128xf32>
    %cst_82 = arith.constant 5.000000e-01 : f32
    %233 = vector.broadcast %cst_82 : f32 to vector<8x128xf32>
    %234 = arith.mulf %233, %232 : vector<8x128xf32>
    %cst_83 = arith.constant 5.000000e-01 : f32
    %235 = vector.broadcast %cst_83 : f32 to vector<8x128xf32>
    %236 = arith.addf %234, %235 : vector<8x128xf32>
    %237 = vector.extract_strided_slice %220 {offsets = [0, 256], sizes = [8, 128], strides = [1, 1]} : vector<8x512xf32> to vector<8x128xf32>
    %238 = math.tanh %237 : vector<8x128xf32>
    %239 = vector.extract_strided_slice %220 {offsets = [0, 384], sizes = [8, 128], strides = [1, 1]} : vector<8x512xf32> to vector<8x128xf32>
    %cst_84 = arith.constant 5.000000e-01 : f32
    %240 = vector.broadcast %cst_84 : f32 to vector<8x128xf32>
    %241 = arith.mulf %240, %239 : vector<8x128xf32>
    %242 = math.tanh %241 : vector<8x128xf32>
    %cst_85 = arith.constant 5.000000e-01 : f32
    %243 = vector.broadcast %cst_85 : f32 to vector<8x128xf32>
    %244 = arith.mulf %243, %242 : vector<8x128xf32>
    %cst_86 = arith.constant 5.000000e-01 : f32
    %245 = vector.broadcast %cst_86 : f32 to vector<8x128xf32>
    %246 = arith.addf %244, %245 : vector<8x128xf32>
    %247 = arith.mulf %236, %208 : vector<8x128xf32>
    %248 = arith.mulf %228, %238 : vector<8x128xf32>
    %249 = arith.addf %247, %248 : vector<8x128xf32>
    %250 = math.tanh %249 : vector<8x128xf32>
    %251 = arith.mulf %246, %250 : vector<8x128xf32>
    %252 = arith.index_cast %214 : i32 to index
    %c0_87 = arith.constant 0 : index
    %253 = vector.load %arg11[%252, %c0_87] : memref<64x128xf32, #tpu.memory_space<vmem>>, vector<8x128xf32>
    tpu.vector_store %arg11[%252, %c0_87], %251 {strides = array<i32>} : memref<64x128xf32, #tpu.memory_space<vmem>>, vector<8x128xf32>,
    %c6_i32 = arith.constant 6 : i32
    %c8_i32_88 = arith.constant 8 : i32
    %254 = arith.muli %c6_i32, %c8_i32_88 : i32
    %255 = tpu.assume_multiple %254, 8 : i32
    %256 = arith.index_cast %255 : i32 to index
    %c0_89 = arith.constant 0 : index
    %257 = vector.load %arg10[%256, %c0_89] : memref<64x512xf32, #tpu.memory_space<vmem>>, vector<8x512xf32>
    %cst_90 = arith.constant dense<0.000000e+00> : vector<8x512xf32>
    %258 = tpu.matmul %251, %4, %cst_90 {dimension_numbers = #tpu.dot_dimension_numbers<[1], [0], [0], [1], [0, 0, 1, 1], [], []>} : vector<8x128xf32>, vector<128x512xf32>, vector<8x512xf32> -> vector<8x512xf32>
    %259 = arith.addf %257, %258 : vector<8x512xf32>
    %260 = vector.broadcast %5 : vector<1x512xf32> to vector<8x512xf32>
    %261 = arith.addf %259, %260 : vector<8x512xf32>
    %262 = vector.extract_strided_slice %261 {offsets = [0, 0], sizes = [8, 128], strides = [1, 1]} : vector<8x512xf32> to vector<8x128xf32>
    %cst_91 = arith.constant 5.000000e-01 : f32
    %263 = vector.broadcast %cst_91 : f32 to vector<8x128xf32>
    %264 = arith.mulf %263, %262 : vector<8x128xf32>
    %265 = math.tanh %264 : vector<8x128xf32>
    %cst_92 = arith.constant 5.000000e-01 : f32
    %266 = vector.broadcast %cst_92 : f32 to vector<8x128xf32>
    %267 = arith.mulf %266, %265 : vector<8x128xf32>
    %cst_93 = arith.constant 5.000000e-01 : f32
    %268 = vector.broadcast %cst_93 : f32 to vector<8x128xf32>
    %269 = arith.addf %267, %268 : vector<8x128xf32>
    %270 = vector.extract_strided_slice %261 {offsets = [0, 128], sizes = [8, 128], strides = [1, 1]} : vector<8x512xf32> to vector<8x128xf32>
    %cst_94 = arith.constant 5.000000e-01 : f32
    %271 = vector.broadcast %cst_94 : f32 to vector<8x128xf32>
    %272 = arith.mulf %271, %270 : vector<8x128xf32>
    %273 = math.tanh %272 : vector<8x128xf32>
    %cst_95 = arith.constant 5.000000e-01 : f32
    %274 = vector.broadcast %cst_95 : f32 to vector<8x128xf32>
    %275 = arith.mulf %274, %273 : vector<8x128xf32>
    %cst_96 = arith.constant 5.000000e-01 : f32
    %276 = vector.broadcast %cst_96 : f32 to vector<8x128xf32>
    %277 = arith.addf %275, %276 : vector<8x128xf32>
    %278 = vector.extract_strided_slice %261 {offsets = [0, 256], sizes = [8, 128], strides = [1, 1]} : vector<8x512xf32> to vector<8x128xf32>
    %279 = math.tanh %278 : vector<8x128xf32>
    %280 = vector.extract_strided_slice %261 {offsets = [0, 384], sizes = [8, 128], strides = [1, 1]} : vector<8x512xf32> to vector<8x128xf32>
    %cst_97 = arith.constant 5.000000e-01 : f32
    %281 = vector.broadcast %cst_97 : f32 to vector<8x128xf32>
    %282 = arith.mulf %281, %280 : vector<8x128xf32>
    %283 = math.tanh %282 : vector<8x128xf32>
    %cst_98 = arith.constant 5.000000e-01 : f32
    %284 = vector.broadcast %cst_98 : f32 to vector<8x128xf32>
    %285 = arith.mulf %284, %283 : vector<8x128xf32>
    %cst_99 = arith.constant 5.000000e-01 : f32
    %286 = vector.broadcast %cst_99 : f32 to vector<8x128xf32>
    %287 = arith.addf %285, %286 : vector<8x128xf32>
    %288 = arith.mulf %277, %249 : vector<8x128xf32>
    %289 = arith.mulf %269, %279 : vector<8x128xf32>
    %290 = arith.addf %288, %289 : vector<8x128xf32>
    %291 = math.tanh %290 : vector<8x128xf32>
    %292 = arith.mulf %287, %291 : vector<8x128xf32>
    %293 = arith.index_cast %255 : i32 to index
    %c0_100 = arith.constant 0 : index
    %294 = vector.load %arg11[%293, %c0_100] : memref<64x128xf32, #tpu.memory_space<vmem>>, vector<8x128xf32>
    tpu.vector_store %arg11[%293, %c0_100], %292 {strides = array<i32>} : memref<64x128xf32, #tpu.memory_space<vmem>>, vector<8x128xf32>,
    %c7_i32 = arith.constant 7 : i32
    %c8_i32_101 = arith.constant 8 : i32
    %295 = arith.muli %c7_i32, %c8_i32_101 : i32
    %296 = tpu.assume_multiple %295, 8 : i32
    %297 = arith.index_cast %296 : i32 to index
    %c0_102 = arith.constant 0 : index
    %298 = vector.load %arg10[%297, %c0_102] : memref<64x512xf32, #tpu.memory_space<vmem>>, vector<8x512xf32>
    %cst_103 = arith.constant dense<0.000000e+00> : vector<8x512xf32>
    %299 = tpu.matmul %292, %4, %cst_103 {dimension_numbers = #tpu.dot_dimension_numbers<[1], [0], [0], [1], [0, 0, 1, 1], [], []>} : vector<8x128xf32>, vector<128x512xf32>, vector<8x512xf32> -> vector<8x512xf32>
    %300 = arith.addf %298, %299 : vector<8x512xf32>
    %301 = vector.broadcast %5 : vector<1x512xf32> to vector<8x512xf32>
    %302 = arith.addf %300, %301 : vector<8x512xf32>
    %303 = vector.extract_strided_slice %302 {offsets = [0, 0], sizes = [8, 128], strides = [1, 1]} : vector<8x512xf32> to vector<8x128xf32>
    %cst_104 = arith.constant 5.000000e-01 : f32
    %304 = vector.broadcast %cst_104 : f32 to vector<8x128xf32>
    %305 = arith.mulf %304, %303 : vector<8x128xf32>
    %306 = math.tanh %305 : vector<8x128xf32>
    %cst_105 = arith.constant 5.000000e-01 : f32
    %307 = vector.broadcast %cst_105 : f32 to vector<8x128xf32>
    %308 = arith.mulf %307, %306 : vector<8x128xf32>
    %cst_106 = arith.constant 5.000000e-01 : f32
    %309 = vector.broadcast %cst_106 : f32 to vector<8x128xf32>
    %310 = arith.addf %308, %309 : vector<8x128xf32>
    %311 = vector.extract_strided_slice %302 {offsets = [0, 128], sizes = [8, 128], strides = [1, 1]} : vector<8x512xf32> to vector<8x128xf32>
    %cst_107 = arith.constant 5.000000e-01 : f32
    %312 = vector.broadcast %cst_107 : f32 to vector<8x128xf32>
    %313 = arith.mulf %312, %311 : vector<8x128xf32>
    %314 = math.tanh %313 : vector<8x128xf32>
    %cst_108 = arith.constant 5.000000e-01 : f32
    %315 = vector.broadcast %cst_108 : f32 to vector<8x128xf32>
    %316 = arith.mulf %315, %314 : vector<8x128xf32>
    %cst_109 = arith.constant 5.000000e-01 : f32
    %317 = vector.broadcast %cst_109 : f32 to vector<8x128xf32>
    %318 = arith.addf %316, %317 : vector<8x128xf32>
    %319 = vector.extract_strided_slice %302 {offsets = [0, 256], sizes = [8, 128], strides = [1, 1]} : vector<8x512xf32> to vector<8x128xf32>
    %320 = math.tanh %319 : vector<8x128xf32>
    %321 = vector.extract_strided_slice %302 {offsets = [0, 384], sizes = [8, 128], strides = [1, 1]} : vector<8x512xf32> to vector<8x128xf32>
    %cst_110 = arith.constant 5.000000e-01 : f32
    %322 = vector.broadcast %cst_110 : f32 to vector<8x128xf32>
    %323 = arith.mulf %322, %321 : vector<8x128xf32>
    %324 = math.tanh %323 : vector<8x128xf32>
    %cst_111 = arith.constant 5.000000e-01 : f32
    %325 = vector.broadcast %cst_111 : f32 to vector<8x128xf32>
    %326 = arith.mulf %325, %324 : vector<8x128xf32>
    %cst_112 = arith.constant 5.000000e-01 : f32
    %327 = vector.broadcast %cst_112 : f32 to vector<8x128xf32>
    %328 = arith.addf %326, %327 : vector<8x128xf32>
    %329 = arith.mulf %318, %290 : vector<8x128xf32>
    %330 = arith.mulf %310, %320 : vector<8x128xf32>
    %331 = arith.addf %329, %330 : vector<8x128xf32>
    %332 = math.tanh %331 : vector<8x128xf32>
    %333 = arith.mulf %328, %332 : vector<8x128xf32>
    %334 = arith.index_cast %296 : i32 to index
    %c0_113 = arith.constant 0 : index
    %335 = vector.load %arg11[%334, %c0_113] : memref<64x128xf32, #tpu.memory_space<vmem>>, vector<8x128xf32>
    tpu.vector_store %arg11[%334, %c0_113], %333 {strides = array<i32>} : memref<64x128xf32, #tpu.memory_space<vmem>>, vector<8x128xf32>,
    %c8_i32_114 = arith.constant 8 : i32
    %c0_115 = arith.constant 0 : index
    %c0_116 = arith.constant 0 : index
    %336 = vector.load %arg11[%c0_115, %c0_116] : memref<64x128xf32, #tpu.memory_space<vmem>>, vector<64x128xf32>
    %c0_117 = arith.constant 0 : index
    %c0_118 = arith.constant 0 : index
    %337 = vector.load %arg4[%c0_117, %c0_118] : memref<128x512xf32, #tpu.memory_space<vmem>>, vector<128x512xf32>
    %cst_119 = arith.constant dense<0.000000e+00> : vector<64x512xf32>
    %338 = tpu.matmul %336, %337, %cst_119 {dimension_numbers = #tpu.dot_dimension_numbers<[1], [0], [0], [1], [0, 0, 1, 1], [], []>} : vector<64x128xf32>, vector<128x512xf32>, vector<64x512xf32> -> vector<64x512xf32>
    %c0_120 = arith.constant 0 : index
    %c0_121 = arith.constant 0 : index
    %339 = vector.load %arg10[%c0_120, %c0_121] : memref<64x512xf32, #tpu.memory_space<vmem>>, vector<64x512xf32>
    tpu.vector_store %arg10[%c0_120, %c0_121], %338 {strides = array<i32>} : memref<64x512xf32, #tpu.memory_space<vmem>>, vector<64x512xf32>,
    %c0_122 = arith.constant 0 : index
    %c0_123 = arith.constant 0 : index
    %340 = vector.load %arg5[%c0_122, %c0_123] : memref<128x512xf32, #tpu.memory_space<vmem>>, vector<128x512xf32>
    %c0_124 = arith.constant 0 : index
    %c0_125 = arith.constant 0 : index
    %341 = vector.load %arg6[%c0_124, %c0_125] : memref<1x512xf32, #tpu.memory_space<vmem>>, vector<1x512xf32>
    %cst_126 = arith.constant 0.000000e+00 : f32
    %342 = vector.broadcast %cst_126 : f32 to vector<8x128xf32>
    %cst_127 = arith.constant 0.000000e+00 : f32
    %343 = vector.broadcast %cst_127 : f32 to vector<8x128xf32>
    %c0_i32_128 = arith.constant 0 : i32
    %c8_i32_129 = arith.constant 8 : i32
    %344 = arith.muli %c0_i32_128, %c8_i32_129 : i32
    %345 = tpu.assume_multiple %344, 8 : i32
    %346 = arith.index_cast %345 : i32 to index
    %c0_130 = arith.constant 0 : index
    %347 = vector.load %arg10[%346, %c0_130] : memref<64x512xf32, #tpu.memory_space<vmem>>, vector<8x512xf32>
    %cst_131 = arith.constant dense<0.000000e+00> : vector<8x512xf32>
    %348 = tpu.matmul %342, %340, %cst_131 {dimension_numbers = #tpu.dot_dimension_numbers<[1], [0], [0], [1], [0, 0, 1, 1], [], []>} : vector<8x128xf32>, vector<128x512xf32>, vector<8x512xf32> -> vector<8x512xf32>
    %349 = arith.addf %347, %348 : vector<8x512xf32>
    %350 = vector.broadcast %341 : vector<1x512xf32> to vector<8x512xf32>
    %351 = arith.addf %349, %350 : vector<8x512xf32>
    %352 = vector.extract_strided_slice %351 {offsets = [0, 0], sizes = [8, 128], strides = [1, 1]} : vector<8x512xf32> to vector<8x128xf32>
    %cst_132 = arith.constant 5.000000e-01 : f32
    %353 = vector.broadcast %cst_132 : f32 to vector<8x128xf32>
    %354 = arith.mulf %353, %352 : vector<8x128xf32>
    %355 = math.tanh %354 : vector<8x128xf32>
    %cst_133 = arith.constant 5.000000e-01 : f32
    %356 = vector.broadcast %cst_133 : f32 to vector<8x128xf32>
    %357 = arith.mulf %356, %355 : vector<8x128xf32>
    %cst_134 = arith.constant 5.000000e-01 : f32
    %358 = vector.broadcast %cst_134 : f32 to vector<8x128xf32>
    %359 = arith.addf %357, %358 : vector<8x128xf32>
    %360 = vector.extract_strided_slice %351 {offsets = [0, 128], sizes = [8, 128], strides = [1, 1]} : vector<8x512xf32> to vector<8x128xf32>
    %cst_135 = arith.constant 5.000000e-01 : f32
    %361 = vector.broadcast %cst_135 : f32 to vector<8x128xf32>
    %362 = arith.mulf %361, %360 : vector<8x128xf32>
    %363 = math.tanh %362 : vector<8x128xf32>
    %cst_136 = arith.constant 5.000000e-01 : f32
    %364 = vector.broadcast %cst_136 : f32 to vector<8x128xf32>
    %365 = arith.mulf %364, %363 : vector<8x128xf32>
    %cst_137 = arith.constant 5.000000e-01 : f32
    %366 = vector.broadcast %cst_137 : f32 to vector<8x128xf32>
    %367 = arith.addf %365, %366 : vector<8x128xf32>
    %368 = vector.extract_strided_slice %351 {offsets = [0, 256], sizes = [8, 128], strides = [1, 1]} : vector<8x512xf32> to vector<8x128xf32>
    %369 = math.tanh %368 : vector<8x128xf32>
    %370 = vector.extract_strided_slice %351 {offsets = [0, 384], sizes = [8, 128], strides = [1, 1]} : vector<8x512xf32> to vector<8x128xf32>
    %cst_138 = arith.constant 5.000000e-01 : f32
    %371 = vector.broadcast %cst_138 : f32 to vector<8x128xf32>
    %372 = arith.mulf %371, %370 : vector<8x128xf32>
    %373 = math.tanh %372 : vector<8x128xf32>
    %cst_139 = arith.constant 5.000000e-01 : f32
    %374 = vector.broadcast %cst_139 : f32 to vector<8x128xf32>
    %375 = arith.mulf %374, %373 : vector<8x128xf32>
    %cst_140 = arith.constant 5.000000e-01 : f32
    %376 = vector.broadcast %cst_140 : f32 to vector<8x128xf32>
    %377 = arith.addf %375, %376 : vector<8x128xf32>
    %378 = arith.mulf %367, %343 : vector<8x128xf32>
    %379 = arith.mulf %359, %369 : vector<8x128xf32>
    %380 = arith.addf %378, %379 : vector<8x128xf32>
    %381 = math.tanh %380 : vector<8x128xf32>
    %382 = arith.mulf %377, %381 : vector<8x128xf32>
    %c1_i32_141 = arith.constant 1 : i32
    %c8_i32_142 = arith.constant 8 : i32
    %383 = arith.muli %c1_i32_141, %c8_i32_142 : i32
    %384 = tpu.assume_multiple %383, 8 : i32
    %385 = arith.index_cast %384 : i32 to index
    %c0_143 = arith.constant 0 : index
    %386 = vector.load %arg10[%385, %c0_143] : memref<64x512xf32, #tpu.memory_space<vmem>>, vector<8x512xf32>
    %cst_144 = arith.constant dense<0.000000e+00> : vector<8x512xf32>
    %387 = tpu.matmul %382, %340, %cst_144 {dimension_numbers = #tpu.dot_dimension_numbers<[1], [0], [0], [1], [0, 0, 1, 1], [], []>} : vector<8x128xf32>, vector<128x512xf32>, vector<8x512xf32> -> vector<8x512xf32>
    %388 = arith.addf %386, %387 : vector<8x512xf32>
    %389 = vector.broadcast %341 : vector<1x512xf32> to vector<8x512xf32>
    %390 = arith.addf %388, %389 : vector<8x512xf32>
    %391 = vector.extract_strided_slice %390 {offsets = [0, 0], sizes = [8, 128], strides = [1, 1]} : vector<8x512xf32> to vector<8x128xf32>
    %cst_145 = arith.constant 5.000000e-01 : f32
    %392 = vector.broadcast %cst_145 : f32 to vector<8x128xf32>
    %393 = arith.mulf %392, %391 : vector<8x128xf32>
    %394 = math.tanh %393 : vector<8x128xf32>
    %cst_146 = arith.constant 5.000000e-01 : f32
    %395 = vector.broadcast %cst_146 : f32 to vector<8x128xf32>
    %396 = arith.mulf %395, %394 : vector<8x128xf32>
    %cst_147 = arith.constant 5.000000e-01 : f32
    %397 = vector.broadcast %cst_147 : f32 to vector<8x128xf32>
    %398 = arith.addf %396, %397 : vector<8x128xf32>
    %399 = vector.extract_strided_slice %390 {offsets = [0, 128], sizes = [8, 128], strides = [1, 1]} : vector<8x512xf32> to vector<8x128xf32>
    %cst_148 = arith.constant 5.000000e-01 : f32
    %400 = vector.broadcast %cst_148 : f32 to vector<8x128xf32>
    %401 = arith.mulf %400, %399 : vector<8x128xf32>
    %402 = math.tanh %401 : vector<8x128xf32>
    %cst_149 = arith.constant 5.000000e-01 : f32
    %403 = vector.broadcast %cst_149 : f32 to vector<8x128xf32>
    %404 = arith.mulf %403, %402 : vector<8x128xf32>
    %cst_150 = arith.constant 5.000000e-01 : f32
    %405 = vector.broadcast %cst_150 : f32 to vector<8x128xf32>
    %406 = arith.addf %404, %405 : vector<8x128xf32>
    %407 = vector.extract_strided_slice %390 {offsets = [0, 256], sizes = [8, 128], strides = [1, 1]} : vector<8x512xf32> to vector<8x128xf32>
    %408 = math.tanh %407 : vector<8x128xf32>
    %409 = vector.extract_strided_slice %390 {offsets = [0, 384], sizes = [8, 128], strides = [1, 1]} : vector<8x512xf32> to vector<8x128xf32>
    %cst_151 = arith.constant 5.000000e-01 : f32
    %410 = vector.broadcast %cst_151 : f32 to vector<8x128xf32>
    %411 = arith.mulf %410, %409 : vector<8x128xf32>
    %412 = math.tanh %411 : vector<8x128xf32>
    %cst_152 = arith.constant 5.000000e-01 : f32
    %413 = vector.broadcast %cst_152 : f32 to vector<8x128xf32>
    %414 = arith.mulf %413, %412 : vector<8x128xf32>
    %cst_153 = arith.constant 5.000000e-01 : f32
    %415 = vector.broadcast %cst_153 : f32 to vector<8x128xf32>
    %416 = arith.addf %414, %415 : vector<8x128xf32>
    %417 = arith.mulf %406, %380 : vector<8x128xf32>
    %418 = arith.mulf %398, %408 : vector<8x128xf32>
    %419 = arith.addf %417, %418 : vector<8x128xf32>
    %420 = math.tanh %419 : vector<8x128xf32>
    %421 = arith.mulf %416, %420 : vector<8x128xf32>
    %c2_i32_154 = arith.constant 2 : i32
    %c8_i32_155 = arith.constant 8 : i32
    %422 = arith.muli %c2_i32_154, %c8_i32_155 : i32
    %423 = tpu.assume_multiple %422, 8 : i32
    %424 = arith.index_cast %423 : i32 to index
    %c0_156 = arith.constant 0 : index
    %425 = vector.load %arg10[%424, %c0_156] : memref<64x512xf32, #tpu.memory_space<vmem>>, vector<8x512xf32>
    %cst_157 = arith.constant dense<0.000000e+00> : vector<8x512xf32>
    %426 = tpu.matmul %421, %340, %cst_157 {dimension_numbers = #tpu.dot_dimension_numbers<[1], [0], [0], [1], [0, 0, 1, 1], [], []>} : vector<8x128xf32>, vector<128x512xf32>, vector<8x512xf32> -> vector<8x512xf32>
    %427 = arith.addf %425, %426 : vector<8x512xf32>
    %428 = vector.broadcast %341 : vector<1x512xf32> to vector<8x512xf32>
    %429 = arith.addf %427, %428 : vector<8x512xf32>
    %430 = vector.extract_strided_slice %429 {offsets = [0, 0], sizes = [8, 128], strides = [1, 1]} : vector<8x512xf32> to vector<8x128xf32>
    %cst_158 = arith.constant 5.000000e-01 : f32
    %431 = vector.broadcast %cst_158 : f32 to vector<8x128xf32>
    %432 = arith.mulf %431, %430 : vector<8x128xf32>
    %433 = math.tanh %432 : vector<8x128xf32>
    %cst_159 = arith.constant 5.000000e-01 : f32
    %434 = vector.broadcast %cst_159 : f32 to vector<8x128xf32>
    %435 = arith.mulf %434, %433 : vector<8x128xf32>
    %cst_160 = arith.constant 5.000000e-01 : f32
    %436 = vector.broadcast %cst_160 : f32 to vector<8x128xf32>
    %437 = arith.addf %435, %436 : vector<8x128xf32>
    %438 = vector.extract_strided_slice %429 {offsets = [0, 128], sizes = [8, 128], strides = [1, 1]} : vector<8x512xf32> to vector<8x128xf32>
    %cst_161 = arith.constant 5.000000e-01 : f32
    %439 = vector.broadcast %cst_161 : f32 to vector<8x128xf32>
    %440 = arith.mulf %439, %438 : vector<8x128xf32>
    %441 = math.tanh %440 : vector<8x128xf32>
    %cst_162 = arith.constant 5.000000e-01 : f32
    %442 = vector.broadcast %cst_162 : f32 to vector<8x128xf32>
    %443 = arith.mulf %442, %441 : vector<8x128xf32>
    %cst_163 = arith.constant 5.000000e-01 : f32
    %444 = vector.broadcast %cst_163 : f32 to vector<8x128xf32>
    %445 = arith.addf %443, %444 : vector<8x128xf32>
    %446 = vector.extract_strided_slice %429 {offsets = [0, 256], sizes = [8, 128], strides = [1, 1]} : vector<8x512xf32> to vector<8x128xf32>
    %447 = math.tanh %446 : vector<8x128xf32>
    %448 = vector.extract_strided_slice %429 {offsets = [0, 384], sizes = [8, 128], strides = [1, 1]} : vector<8x512xf32> to vector<8x128xf32>
    %cst_164 = arith.constant 5.000000e-01 : f32
    %449 = vector.broadcast %cst_164 : f32 to vector<8x128xf32>
    %450 = arith.mulf %449, %448 : vector<8x128xf32>
    %451 = math.tanh %450 : vector<8x128xf32>
    %cst_165 = arith.constant 5.000000e-01 : f32
    %452 = vector.broadcast %cst_165 : f32 to vector<8x128xf32>
    %453 = arith.mulf %452, %451 : vector<8x128xf32>
    %cst_166 = arith.constant 5.000000e-01 : f32
    %454 = vector.broadcast %cst_166 : f32 to vector<8x128xf32>
    %455 = arith.addf %453, %454 : vector<8x128xf32>
    %456 = arith.mulf %445, %419 : vector<8x128xf32>
    %457 = arith.mulf %437, %447 : vector<8x128xf32>
    %458 = arith.addf %456, %457 : vector<8x128xf32>
    %459 = math.tanh %458 : vector<8x128xf32>
    %460 = arith.mulf %455, %459 : vector<8x128xf32>
    %c3_i32_167 = arith.constant 3 : i32
    %c8_i32_168 = arith.constant 8 : i32
    %461 = arith.muli %c3_i32_167, %c8_i32_168 : i32
    %462 = tpu.assume_multiple %461, 8 : i32
    %463 = arith.index_cast %462 : i32 to index
    %c0_169 = arith.constant 0 : index
    %464 = vector.load %arg10[%463, %c0_169] : memref<64x512xf32, #tpu.memory_space<vmem>>, vector<8x512xf32>
    %cst_170 = arith.constant dense<0.000000e+00> : vector<8x512xf32>
    %465 = tpu.matmul %460, %340, %cst_170 {dimension_numbers = #tpu.dot_dimension_numbers<[1], [0], [0], [1], [0, 0, 1, 1], [], []>} : vector<8x128xf32>, vector<128x512xf32>, vector<8x512xf32> -> vector<8x512xf32>
    %466 = arith.addf %464, %465 : vector<8x512xf32>
    %467 = vector.broadcast %341 : vector<1x512xf32> to vector<8x512xf32>
    %468 = arith.addf %466, %467 : vector<8x512xf32>
    %469 = vector.extract_strided_slice %468 {offsets = [0, 0], sizes = [8, 128], strides = [1, 1]} : vector<8x512xf32> to vector<8x128xf32>
    %cst_171 = arith.constant 5.000000e-01 : f32
    %470 = vector.broadcast %cst_171 : f32 to vector<8x128xf32>
    %471 = arith.mulf %470, %469 : vector<8x128xf32>
    %472 = math.tanh %471 : vector<8x128xf32>
    %cst_172 = arith.constant 5.000000e-01 : f32
    %473 = vector.broadcast %cst_172 : f32 to vector<8x128xf32>
    %474 = arith.mulf %473, %472 : vector<8x128xf32>
    %cst_173 = arith.constant 5.000000e-01 : f32
    %475 = vector.broadcast %cst_173 : f32 to vector<8x128xf32>
    %476 = arith.addf %474, %475 : vector<8x128xf32>
    %477 = vector.extract_strided_slice %468 {offsets = [0, 128], sizes = [8, 128], strides = [1, 1]} : vector<8x512xf32> to vector<8x128xf32>
    %cst_174 = arith.constant 5.000000e-01 : f32
    %478 = vector.broadcast %cst_174 : f32 to vector<8x128xf32>
    %479 = arith.mulf %478, %477 : vector<8x128xf32>
    %480 = math.tanh %479 : vector<8x128xf32>
    %cst_175 = arith.constant 5.000000e-01 : f32
    %481 = vector.broadcast %cst_175 : f32 to vector<8x128xf32>
    %482 = arith.mulf %481, %480 : vector<8x128xf32>
    %cst_176 = arith.constant 5.000000e-01 : f32
    %483 = vector.broadcast %cst_176 : f32 to vector<8x128xf32>
    %484 = arith.addf %482, %483 : vector<8x128xf32>
    %485 = vector.extract_strided_slice %468 {offsets = [0, 256], sizes = [8, 128], strides = [1, 1]} : vector<8x512xf32> to vector<8x128xf32>
    %486 = math.tanh %485 : vector<8x128xf32>
    %487 = vector.extract_strided_slice %468 {offsets = [0, 384], sizes = [8, 128], strides = [1, 1]} : vector<8x512xf32> to vector<8x128xf32>
    %cst_177 = arith.constant 5.000000e-01 : f32
    %488 = vector.broadcast %cst_177 : f32 to vector<8x128xf32>
    %489 = arith.mulf %488, %487 : vector<8x128xf32>
    %490 = math.tanh %489 : vector<8x128xf32>
    %cst_178 = arith.constant 5.000000e-01 : f32
    %491 = vector.broadcast %cst_178 : f32 to vector<8x128xf32>
    %492 = arith.mulf %491, %490 : vector<8x128xf32>
    %cst_179 = arith.constant 5.000000e-01 : f32
    %493 = vector.broadcast %cst_179 : f32 to vector<8x128xf32>
    %494 = arith.addf %492, %493 : vector<8x128xf32>
    %495 = arith.mulf %484, %458 : vector<8x128xf32>
    %496 = arith.mulf %476, %486 : vector<8x128xf32>
    %497 = arith.addf %495, %496 : vector<8x128xf32>
    %498 = math.tanh %497 : vector<8x128xf32>
    %499 = arith.mulf %494, %498 : vector<8x128xf32>
    %c4_i32_180 = arith.constant 4 : i32
    %c8_i32_181 = arith.constant 8 : i32
    %500 = arith.muli %c4_i32_180, %c8_i32_181 : i32
    %501 = tpu.assume_multiple %500, 8 : i32
    %502 = arith.index_cast %501 : i32 to index
    %c0_182 = arith.constant 0 : index
    %503 = vector.load %arg10[%502, %c0_182] : memref<64x512xf32, #tpu.memory_space<vmem>>, vector<8x512xf32>
    %cst_183 = arith.constant dense<0.000000e+00> : vector<8x512xf32>
    %504 = tpu.matmul %499, %340, %cst_183 {dimension_numbers = #tpu.dot_dimension_numbers<[1], [0], [0], [1], [0, 0, 1, 1], [], []>} : vector<8x128xf32>, vector<128x512xf32>, vector<8x512xf32> -> vector<8x512xf32>
    %505 = arith.addf %503, %504 : vector<8x512xf32>
    %506 = vector.broadcast %341 : vector<1x512xf32> to vector<8x512xf32>
    %507 = arith.addf %505, %506 : vector<8x512xf32>
    %508 = vector.extract_strided_slice %507 {offsets = [0, 0], sizes = [8, 128], strides = [1, 1]} : vector<8x512xf32> to vector<8x128xf32>
    %cst_184 = arith.constant 5.000000e-01 : f32
    %509 = vector.broadcast %cst_184 : f32 to vector<8x128xf32>
    %510 = arith.mulf %509, %508 : vector<8x128xf32>
    %511 = math.tanh %510 : vector<8x128xf32>
    %cst_185 = arith.constant 5.000000e-01 : f32
    %512 = vector.broadcast %cst_185 : f32 to vector<8x128xf32>
    %513 = arith.mulf %512, %511 : vector<8x128xf32>
    %cst_186 = arith.constant 5.000000e-01 : f32
    %514 = vector.broadcast %cst_186 : f32 to vector<8x128xf32>
    %515 = arith.addf %513, %514 : vector<8x128xf32>
    %516 = vector.extract_strided_slice %507 {offsets = [0, 128], sizes = [8, 128], strides = [1, 1]} : vector<8x512xf32> to vector<8x128xf32>
    %cst_187 = arith.constant 5.000000e-01 : f32
    %517 = vector.broadcast %cst_187 : f32 to vector<8x128xf32>
    %518 = arith.mulf %517, %516 : vector<8x128xf32>
    %519 = math.tanh %518 : vector<8x128xf32>
    %cst_188 = arith.constant 5.000000e-01 : f32
    %520 = vector.broadcast %cst_188 : f32 to vector<8x128xf32>
    %521 = arith.mulf %520, %519 : vector<8x128xf32>
    %cst_189 = arith.constant 5.000000e-01 : f32
    %522 = vector.broadcast %cst_189 : f32 to vector<8x128xf32>
    %523 = arith.addf %521, %522 : vector<8x128xf32>
    %524 = vector.extract_strided_slice %507 {offsets = [0, 256], sizes = [8, 128], strides = [1, 1]} : vector<8x512xf32> to vector<8x128xf32>
    %525 = math.tanh %524 : vector<8x128xf32>
    %526 = vector.extract_strided_slice %507 {offsets = [0, 384], sizes = [8, 128], strides = [1, 1]} : vector<8x512xf32> to vector<8x128xf32>
    %cst_190 = arith.constant 5.000000e-01 : f32
    %527 = vector.broadcast %cst_190 : f32 to vector<8x128xf32>
    %528 = arith.mulf %527, %526 : vector<8x128xf32>
    %529 = math.tanh %528 : vector<8x128xf32>
    %cst_191 = arith.constant 5.000000e-01 : f32
    %530 = vector.broadcast %cst_191 : f32 to vector<8x128xf32>
    %531 = arith.mulf %530, %529 : vector<8x128xf32>
    %cst_192 = arith.constant 5.000000e-01 : f32
    %532 = vector.broadcast %cst_192 : f32 to vector<8x128xf32>
    %533 = arith.addf %531, %532 : vector<8x128xf32>
    %534 = arith.mulf %523, %497 : vector<8x128xf32>
    %535 = arith.mulf %515, %525 : vector<8x128xf32>
    %536 = arith.addf %534, %535 : vector<8x128xf32>
    %537 = math.tanh %536 : vector<8x128xf32>
    %538 = arith.mulf %533, %537 : vector<8x128xf32>
    %c5_i32_193 = arith.constant 5 : i32
    %c8_i32_194 = arith.constant 8 : i32
    %539 = arith.muli %c5_i32_193, %c8_i32_194 : i32
    %540 = tpu.assume_multiple %539, 8 : i32
    %541 = arith.index_cast %540 : i32 to index
    %c0_195 = arith.constant 0 : index
    %542 = vector.load %arg10[%541, %c0_195] : memref<64x512xf32, #tpu.memory_space<vmem>>, vector<8x512xf32>
    %cst_196 = arith.constant dense<0.000000e+00> : vector<8x512xf32>
    %543 = tpu.matmul %538, %340, %cst_196 {dimension_numbers = #tpu.dot_dimension_numbers<[1], [0], [0], [1], [0, 0, 1, 1], [], []>} : vector<8x128xf32>, vector<128x512xf32>, vector<8x512xf32> -> vector<8x512xf32>
    %544 = arith.addf %542, %543 : vector<8x512xf32>
    %545 = vector.broadcast %341 : vector<1x512xf32> to vector<8x512xf32>
    %546 = arith.addf %544, %545 : vector<8x512xf32>
    %547 = vector.extract_strided_slice %546 {offsets = [0, 0], sizes = [8, 128], strides = [1, 1]} : vector<8x512xf32> to vector<8x128xf32>
    %cst_197 = arith.constant 5.000000e-01 : f32
    %548 = vector.broadcast %cst_197 : f32 to vector<8x128xf32>
    %549 = arith.mulf %548, %547 : vector<8x128xf32>
    %550 = math.tanh %549 : vector<8x128xf32>
    %cst_198 = arith.constant 5.000000e-01 : f32
    %551 = vector.broadcast %cst_198 : f32 to vector<8x128xf32>
    %552 = arith.mulf %551, %550 : vector<8x128xf32>
    %cst_199 = arith.constant 5.000000e-01 : f32
    %553 = vector.broadcast %cst_199 : f32 to vector<8x128xf32>
    %554 = arith.addf %552, %553 : vector<8x128xf32>
    %555 = vector.extract_strided_slice %546 {offsets = [0, 128], sizes = [8, 128], strides = [1, 1]} : vector<8x512xf32> to vector<8x128xf32>
    %cst_200 = arith.constant 5.000000e-01 : f32
    %556 = vector.broadcast %cst_200 : f32 to vector<8x128xf32>
    %557 = arith.mulf %556, %555 : vector<8x128xf32>
    %558 = math.tanh %557 : vector<8x128xf32>
    %cst_201 = arith.constant 5.000000e-01 : f32
    %559 = vector.broadcast %cst_201 : f32 to vector<8x128xf32>
    %560 = arith.mulf %559, %558 : vector<8x128xf32>
    %cst_202 = arith.constant 5.000000e-01 : f32
    %561 = vector.broadcast %cst_202 : f32 to vector<8x128xf32>
    %562 = arith.addf %560, %561 : vector<8x128xf32>
    %563 = vector.extract_strided_slice %546 {offsets = [0, 256], sizes = [8, 128], strides = [1, 1]} : vector<8x512xf32> to vector<8x128xf32>
    %564 = math.tanh %563 : vector<8x128xf32>
    %565 = vector.extract_strided_slice %546 {offsets = [0, 384], sizes = [8, 128], strides = [1, 1]} : vector<8x512xf32> to vector<8x128xf32>
    %cst_203 = arith.constant 5.000000e-01 : f32
    %566 = vector.broadcast %cst_203 : f32 to vector<8x128xf32>
    %567 = arith.mulf %566, %565 : vector<8x128xf32>
    %568 = math.tanh %567 : vector<8x128xf32>
    %cst_204 = arith.constant 5.000000e-01 : f32
    %569 = vector.broadcast %cst_204 : f32 to vector<8x128xf32>
    %570 = arith.mulf %569, %568 : vector<8x128xf32>
    %cst_205 = arith.constant 5.000000e-01 : f32
    %571 = vector.broadcast %cst_205 : f32 to vector<8x128xf32>
    %572 = arith.addf %570, %571 : vector<8x128xf32>
    %573 = arith.mulf %562, %536 : vector<8x128xf32>
    %574 = arith.mulf %554, %564 : vector<8x128xf32>
    %575 = arith.addf %573, %574 : vector<8x128xf32>
    %576 = math.tanh %575 : vector<8x128xf32>
    %577 = arith.mulf %572, %576 : vector<8x128xf32>
    %c6_i32_206 = arith.constant 6 : i32
    %c8_i32_207 = arith.constant 8 : i32
    %578 = arith.muli %c6_i32_206, %c8_i32_207 : i32
    %579 = tpu.assume_multiple %578, 8 : i32
    %580 = arith.index_cast %579 : i32 to index
    %c0_208 = arith.constant 0 : index
    %581 = vector.load %arg10[%580, %c0_208] : memref<64x512xf32, #tpu.memory_space<vmem>>, vector<8x512xf32>
    %cst_209 = arith.constant dense<0.000000e+00> : vector<8x512xf32>
    %582 = tpu.matmul %577, %340, %cst_209 {dimension_numbers = #tpu.dot_dimension_numbers<[1], [0], [0], [1], [0, 0, 1, 1], [], []>} : vector<8x128xf32>, vector<128x512xf32>, vector<8x512xf32> -> vector<8x512xf32>
    %583 = arith.addf %581, %582 : vector<8x512xf32>
    %584 = vector.broadcast %341 : vector<1x512xf32> to vector<8x512xf32>
    %585 = arith.addf %583, %584 : vector<8x512xf32>
    %586 = vector.extract_strided_slice %585 {offsets = [0, 0], sizes = [8, 128], strides = [1, 1]} : vector<8x512xf32> to vector<8x128xf32>
    %cst_210 = arith.constant 5.000000e-01 : f32
    %587 = vector.broadcast %cst_210 : f32 to vector<8x128xf32>
    %588 = arith.mulf %587, %586 : vector<8x128xf32>
    %589 = math.tanh %588 : vector<8x128xf32>
    %cst_211 = arith.constant 5.000000e-01 : f32
    %590 = vector.broadcast %cst_211 : f32 to vector<8x128xf32>
    %591 = arith.mulf %590, %589 : vector<8x128xf32>
    %cst_212 = arith.constant 5.000000e-01 : f32
    %592 = vector.broadcast %cst_212 : f32 to vector<8x128xf32>
    %593 = arith.addf %591, %592 : vector<8x128xf32>
    %594 = vector.extract_strided_slice %585 {offsets = [0, 128], sizes = [8, 128], strides = [1, 1]} : vector<8x512xf32> to vector<8x128xf32>
    %cst_213 = arith.constant 5.000000e-01 : f32
    %595 = vector.broadcast %cst_213 : f32 to vector<8x128xf32>
    %596 = arith.mulf %595, %594 : vector<8x128xf32>
    %597 = math.tanh %596 : vector<8x128xf32>
    %cst_214 = arith.constant 5.000000e-01 : f32
    %598 = vector.broadcast %cst_214 : f32 to vector<8x128xf32>
    %599 = arith.mulf %598, %597 : vector<8x128xf32>
    %cst_215 = arith.constant 5.000000e-01 : f32
    %600 = vector.broadcast %cst_215 : f32 to vector<8x128xf32>
    %601 = arith.addf %599, %600 : vector<8x128xf32>
    %602 = vector.extract_strided_slice %585 {offsets = [0, 256], sizes = [8, 128], strides = [1, 1]} : vector<8x512xf32> to vector<8x128xf32>
    %603 = math.tanh %602 : vector<8x128xf32>
    %604 = vector.extract_strided_slice %585 {offsets = [0, 384], sizes = [8, 128], strides = [1, 1]} : vector<8x512xf32> to vector<8x128xf32>
    %cst_216 = arith.constant 5.000000e-01 : f32
    %605 = vector.broadcast %cst_216 : f32 to vector<8x128xf32>
    %606 = arith.mulf %605, %604 : vector<8x128xf32>
    %607 = math.tanh %606 : vector<8x128xf32>
    %cst_217 = arith.constant 5.000000e-01 : f32
    %608 = vector.broadcast %cst_217 : f32 to vector<8x128xf32>
    %609 = arith.mulf %608, %607 : vector<8x128xf32>
    %cst_218 = arith.constant 5.000000e-01 : f32
    %610 = vector.broadcast %cst_218 : f32 to vector<8x128xf32>
    %611 = arith.addf %609, %610 : vector<8x128xf32>
    %612 = arith.mulf %601, %575 : vector<8x128xf32>
    %613 = arith.mulf %593, %603 : vector<8x128xf32>
    %614 = arith.addf %612, %613 : vector<8x128xf32>
    %615 = math.tanh %614 : vector<8x128xf32>
    %616 = arith.mulf %611, %615 : vector<8x128xf32>
    %c7_i32_219 = arith.constant 7 : i32
    %c8_i32_220 = arith.constant 8 : i32
    %617 = arith.muli %c7_i32_219, %c8_i32_220 : i32
    %618 = tpu.assume_multiple %617, 8 : i32
    %619 = arith.index_cast %618 : i32 to index
    %c0_221 = arith.constant 0 : index
    %620 = vector.load %arg10[%619, %c0_221] : memref<64x512xf32, #tpu.memory_space<vmem>>, vector<8x512xf32>
    %cst_222 = arith.constant dense<0.000000e+00> : vector<8x512xf32>
    %621 = tpu.matmul %616, %340, %cst_222 {dimension_numbers = #tpu.dot_dimension_numbers<[1], [0], [0], [1], [0, 0, 1, 1], [], []>} : vector<8x128xf32>, vector<128x512xf32>, vector<8x512xf32> -> vector<8x512xf32>
    %622 = arith.addf %620, %621 : vector<8x512xf32>
    %623 = vector.broadcast %341 : vector<1x512xf32> to vector<8x512xf32>
    %624 = arith.addf %622, %623 : vector<8x512xf32>
    %625 = vector.extract_strided_slice %624 {offsets = [0, 0], sizes = [8, 128], strides = [1, 1]} : vector<8x512xf32> to vector<8x128xf32>
    %cst_223 = arith.constant 5.000000e-01 : f32
    %626 = vector.broadcast %cst_223 : f32 to vector<8x128xf32>
    %627 = arith.mulf %626, %625 : vector<8x128xf32>
    %628 = math.tanh %627 : vector<8x128xf32>
    %cst_224 = arith.constant 5.000000e-01 : f32
    %629 = vector.broadcast %cst_224 : f32 to vector<8x128xf32>
    %630 = arith.mulf %629, %628 : vector<8x128xf32>
    %cst_225 = arith.constant 5.000000e-01 : f32
    %631 = vector.broadcast %cst_225 : f32 to vector<8x128xf32>
    %632 = arith.addf %630, %631 : vector<8x128xf32>
    %633 = vector.extract_strided_slice %624 {offsets = [0, 128], sizes = [8, 128], strides = [1, 1]} : vector<8x512xf32> to vector<8x128xf32>
    %cst_226 = arith.constant 5.000000e-01 : f32
    %634 = vector.broadcast %cst_226 : f32 to vector<8x128xf32>
    %635 = arith.mulf %634, %633 : vector<8x128xf32>
    %636 = math.tanh %635 : vector<8x128xf32>
    %cst_227 = arith.constant 5.000000e-01 : f32
    %637 = vector.broadcast %cst_227 : f32 to vector<8x128xf32>
    %638 = arith.mulf %637, %636 : vector<8x128xf32>
    %cst_228 = arith.constant 5.000000e-01 : f32
    %639 = vector.broadcast %cst_228 : f32 to vector<8x128xf32>
    %640 = arith.addf %638, %639 : vector<8x128xf32>
    %641 = vector.extract_strided_slice %624 {offsets = [0, 256], sizes = [8, 128], strides = [1, 1]} : vector<8x512xf32> to vector<8x128xf32>
    %642 = math.tanh %641 : vector<8x128xf32>
    %643 = vector.extract_strided_slice %624 {offsets = [0, 384], sizes = [8, 128], strides = [1, 1]} : vector<8x512xf32> to vector<8x128xf32>
    %cst_229 = arith.constant 5.000000e-01 : f32
    %644 = vector.broadcast %cst_229 : f32 to vector<8x128xf32>
    %645 = arith.mulf %644, %643 : vector<8x128xf32>
    %646 = math.tanh %645 : vector<8x128xf32>
    %cst_230 = arith.constant 5.000000e-01 : f32
    %647 = vector.broadcast %cst_230 : f32 to vector<8x128xf32>
    %648 = arith.mulf %647, %646 : vector<8x128xf32>
    %cst_231 = arith.constant 5.000000e-01 : f32
    %649 = vector.broadcast %cst_231 : f32 to vector<8x128xf32>
    %650 = arith.addf %648, %649 : vector<8x128xf32>
    %651 = arith.mulf %640, %614 : vector<8x128xf32>
    %652 = arith.mulf %632, %642 : vector<8x128xf32>
    %653 = arith.addf %651, %652 : vector<8x128xf32>
    %654 = math.tanh %653 : vector<8x128xf32>
    %655 = arith.mulf %650, %654 : vector<8x128xf32>
    %c8_i32_232 = arith.constant 8 : i32
    %c0_233 = arith.constant 0 : index
    %c0_234 = arith.constant 0 : index
    %656 = vector.load %arg7[%c0_233, %c0_234] : memref<128x128xf32, #tpu.memory_space<vmem>>, vector<128x128xf32>
    %cst_235 = arith.constant dense<0.000000e+00> : vector<8x128xf32>
    %657 = tpu.matmul %655, %656, %cst_235 {dimension_numbers = #tpu.dot_dimension_numbers<[1], [0], [0], [1], [0, 0, 1, 1], [], []>} : vector<8x128xf32>, vector<128x128xf32>, vector<8x128xf32> -> vector<8x128xf32>
    %c0_236 = arith.constant 0 : index
    %c0_237 = arith.constant 0 : index
    %658 = vector.load %arg8[%c0_236, %c0_237] : memref<1x128xf32, #tpu.memory_space<vmem>>, vector<1x128xf32>
    %659 = vector.broadcast %658 : vector<1x128xf32> to vector<8x128xf32>
    %660 = arith.addf %657, %659 : vector<8x128xf32>
    %c0_238 = arith.constant 0 : index
    %c0_239 = arith.constant 0 : index
    %661 = vector.load %arg9[%c0_238, %c0_239] : memref<8x128xf32, #tpu.memory_space<vmem>>, vector<8x128xf32>
    tpu.vector_store %arg9[%c0_238, %c0_239], %660 {strides = array<i32>} : memref<8x128xf32, #tpu.memory_space<vmem>>, vector<8x128xf32>,
    return
  }
}

</mosaic_0001>

<bundles_post_ra>
// kernel: _rnn_forward_padded.1
= control target key start
LH: loop header
LB: loop body
LE: loop exit
PB: predicated region body
PF: predicated region fallthrough
CT: control target
= control target key end

     0   :  { %14 = vsyncpa [#allocation5], 0  ;;  %s5139_s0 = inlined_call_operand.vmem [shape: f32[64,128], index: 0, kind: input, shape index: {}]   ;;  %s5140_s1 = inlined_call_operand.hbm [shape: f32[128,512], index: 1, kind: input, shape index: {}]   ;;  %s5141_s2 = inlined_call_operand.hbm [shape: f32[128,512], index: 2, kind: input, shape index: {}]   ;;  %s5142_s3 = inlined_call_operand.vmem [shape: f32[1,512], index: 3, kind: input, shape index: {}]   ;;  %s5143_s4 = inlined_call_operand.hbm [shape: f32[128,512], index: 4, kind: input, shape index: {}]   ;;  %s5144_s5 = inlined_call_operand.hbm [shape: f32[128,512], index: 5, kind: input, shape index: {}]   ;;  %s5145_s6 = inlined_call_operand.vmem [shape: f32[1,512], index: 6, kind: input, shape index: {}]   ;;  %s5146_s7 = inlined_call_operand.hbm [shape: f32[128,128], index: 7, kind: input, shape index: {}]   ;;  %s5147_s8 = inlined_call_operand.vmem [shape: f32[1,128], index: 8, kind: input, shape index: {}]   ;;  %s5148_s9 = inlined_call_operand.hbm [shape: f32[8,128], index: 9, kind: output, shape index: {}]  }
   0x1   :  { %15 = vsyncpa [#allocation8], 0 }
   0x2   :  { %16 = vsyncpa [#allocation11], 0 }
   0x3   :  { %17 = vsyncpa [#allocation6], 0  ;;  %s37_s11 = sshll.u32 %s5141_s2, 4  ;;  %s3113_s12 = smov [#allocation7]   ;;  %s38_s11 = int_to_ptr.hbm [resolvable:$true] %s37_s11 }
   0x4   :  { %s39_s13 = sshll.u32 %s3113_s12, 4  ;;  %s65_s16 = sshll.u32 %s5144_s5, 4  ;;  %s40_s13 = int_to_ptr.vmem [resolvable:$true] %s39_s13  ;;  %s66_s16 = int_to_ptr.hbm [resolvable:$true] %s65_s16 }
   0x5   :  { %s3114_s17 = smov 512   ;;  %s3115_s18 = smov 32  }
   0x6   :  { %45 = dma.hbm_to_vmem [thread:$0]  %s38_s11, 8192, %s40_s13, [#allocation8], %s3114_s17, %s3114_s17, %s3115_s18  }
   0x7   :  { %s3116_s19 = smov [#allocation10]   ;;  %s24_s23 = sshll.u32 %s5140_s1, 4  ;;  %s25_s23 = int_to_ptr.hbm [resolvable:$true] %s24_s23 }
   0x8   :  { %s67_s20 = sshll.u32 %s3116_s19, 4  ;;  %s52_s25 = sshll.u32 %s5143_s4, 4  ;;  %s68_s20 = int_to_ptr.vmem [resolvable:$true] %s67_s20  ;;  %s53_s25 = int_to_ptr.hbm [resolvable:$true] %s52_s25 }
   0x9   :  { %73 = dma.hbm_to_vmem [thread:$0]  %s66_s16, 8192, %s68_s20, [#allocation11], %s3114_s17, %s3114_s17, %s3115_s18  }
   0xa   :  { %s3117_s26 = smov [#allocation4]   ;;  %s3118_s5 = smov [#allocation9]  }
   0xb   :  { %s26_s27 = sshll.u32 %s3117_s26, 4  ;;  %s54_s28 = sshll.u32 %s3118_s5, 4  ;;  %s27_s27 = int_to_ptr.vmem [resolvable:$true] %s26_s27  ;;  %s55_s28 = int_to_ptr.vmem [resolvable:$true] %s54_s28 }
   0xc   :  { %32 = dma.hbm_to_vmem [thread:$0]  %s25_s23, 8192, %s27_s27, [#allocation5], %s3114_s17, %s3114_s17, %s3115_s18  }
   0xd   :  { %s80_s10 = sshll.u32 %s5146_s7, 4  ;;  %s3119_s1 = smov [#allocation12]   ;;  %s81_s10 = int_to_ptr.hbm [resolvable:$true] %s80_s10 }
   0xe   :  { %60 = dma.hbm_to_vmem [thread:$0]  %s53_s25, 8192, %s55_s28, [#allocation8], %s3114_s17, %s3114_s17, %s3115_s18  }
   0xf   :  { %s82_s11 = sshll.u32 %s3119_s1, 4  ;;  %s3120_s12 = smov 128   ;;  %s83_s11 = int_to_ptr.vmem [resolvable:$true] %s82_s11 }
  0x10   :  { %s3121_s13 = smov 8  }
  0x11   :  { %88 = dma.hbm_to_vmem [thread:$0]  %s81_s10, 2048, %s83_s11, [#allocation11], %s3120_s12, %s3120_s12, %s3121_s13  }
  0x12   :  { %3105 = dma.done.wait [#allocation5], 8192  }
  0x13   :  { %3106 = vsyncadd [#allocation5], 4294959104 }
  0x14   :  { %3107 = dma.done.wait [#allocation8], 16384  }
  0x15   :  { %3108 = vsyncadd [#allocation8], 4294950912 }
  0x16   :  { %3109 = dma.done.wait [#allocation11], 10240  }
  0x17   :  { %3110 = vsyncadd [#allocation11], 4294957056  ;;  %v179_v0 = vld [vmem:[#allocation4 + $0x1e0] sm:$0xff]  ;;  %v180_v1 = vld [vmem:[#allocation4 + $0x1e8] sm:$0xff]  ;;  %s3123_s29 = smov [#allocation13]   ;;  %s2642_s11 = sshll.u32 %s5148_s9, 4  ;;  %s2643_s11 = int_to_ptr.hbm [resolvable:$true] %s2642_s11 }
  0x18   :  { %v181_v2 = vld [vmem:[#allocation4 + $0x1f0] sm:$0xff]  ;;  %183 = vmatpush.msra.mxu0 %v179_v0  ;;  %224 = vmatpush.msra.mxu1 %v180_v1  ;;  %v182_v3 = vld [vmem:[#allocation4 + $0x1f8] sm:$0xff]  ;;  %v175_v4 = vld [vmem:[#allocation4 + $0x1c0] sm:$0xff]  ;;  %s2640_s30 = sshll.u32 %s3123_s29, 4  ;;  %s2641_s30 = int_to_ptr.vmem [resolvable:$true] %s2640_s30 }
  0x19   :  { %v176_v5 = vld [vmem:[#allocation4 + $0x1c8] sm:$0xff]  ;;  %265 = vmatpush.msra.mxu2 %v181_v2  ;;  %306 = vmatpush.msra.mxu3 %v182_v3  ;;  %v177_v6 = vld [vmem:[#allocation4 + $0x1d0] sm:$0xff]  ;;  %v178_v7 = vld [vmem:[#allocation4 + $0x1d8] sm:$0xff] }
  0x1a   :  { %v171_v8 = vld [vmem:[#allocation4 + $0x1a0] sm:$0xff]  ;;  %184 = vmatpush.msra.mxu0 %v175_v4  ;;  %225 = vmatpush.msra.mxu1 %v176_v5  ;;  %v172_v9 = vld [vmem:[#allocation4 + $0x1a8] sm:$0xff]  ;;  %v173_v10 = vld [vmem:[#allocation4 + $0x1b0] sm:$0xff] }
  0x1b   :  { %v174_v11 = vld [vmem:[#allocation4 + $0x1b8] sm:$0xff]  ;;  %266 = vmatpush.msra.mxu2 %v177_v6  ;;  %307 = vmatpush.msra.mxu3 %v178_v7  ;;  %v167_v12 = vld [vmem:[#allocation4 + $0x180] sm:$0xff]  ;;  %v168_v13 = vld [vmem:[#allocation4 + $0x188] sm:$0xff] }
  0x1c   :  { %185 = vmatpush.msra.mxu0 %v171_v8  ;;  %226 = vmatpush.msra.mxu1 %v172_v9  ;;  %v169_v14 = vld [vmem:[#allocation4 + $0x190] sm:$0xff]  ;;  %v170_v15 = vld [vmem:[#allocation4 + $0x198] sm:$0xff]  ;;  %v163_v16 = vld [vmem:[#allocation4 + $0x160] sm:$0xff] }
  0x1d   :  { %267 = vmatpush.msra.mxu2 %v173_v10  ;;  %308 = vmatpush.msra.mxu3 %v174_v11  ;;  %v164_v17 = vld [vmem:[#allocation4 + $0x168] sm:$0xff]  ;;  %v165_v18 = vld [vmem:[#allocation4 + $0x170] sm:$0xff]  ;;  %v166_v19 = vld [vmem:[#allocation4 + $0x178] sm:$0xff] }
  0x1e   :  { %186 = vmatpush.msra.mxu0 %v167_v12  ;;  %227 = vmatpush.msra.mxu1 %v168_v13  ;;  %v159_v20 = vld [vmem:[#allocation4 + $0x140] sm:$0xff]  ;;  %v160_v21 = vld [vmem:[#allocation4 + $0x148] sm:$0xff]  ;;  %v161_v22 = vld [vmem:[#allocation4 + $0x150] sm:$0xff] }
  0x1f   :  { %268 = vmatpush.msra.mxu2 %v169_v14  ;;  %309 = vmatpush.msra.mxu3 %v170_v15  ;;  %v162_v23 = vld [vmem:[#allocation4 + $0x158] sm:$0xff]  ;;  %v155_v24 = vld [vmem:[#allocation4 + $0x120] sm:$0xff]  ;;  %v156_v25 = vld [vmem:[#allocation4 + $0x128] sm:$0xff] }
  0x20   :  { %187 = vmatpush.msra.mxu0 %v163_v16  ;;  %228 = vmatpush.msra.mxu1 %v164_v17  ;;  %v157_v26 = vld [vmem:[#allocation4 + $0x130] sm:$0xff]  ;;  %v158_v27 = vld [vmem:[#allocation4 + $0x138] sm:$0xff]  ;;  %v151_v28 = vld [vmem:[#allocation4 + $0x100] sm:$0xff] }
  0x21   :  { %269 = vmatpush.msra.mxu2 %v165_v18  ;;  %310 = vmatpush.msra.mxu3 %v166_v19  ;;  %v152_v29 = vld [vmem:[#allocation4 + $0x108] sm:$0xff]  ;;  %v153_v30 = vld [vmem:[#allocation4 + $0x110] sm:$0xff]  ;;  %v154_v31 = vld [vmem:[#allocation4 + $0x118] sm:$0xff] }
  0x22   :  { %188 = vmatpush.msra.mxu0 %v159_v20  ;;  %229 = vmatpush.msra.mxu1 %v160_v21  ;;  %v147_v32 = vld [vmem:[#allocation4 + $0xe0] sm:$0xff]  ;;  %v148_v33 = vld [vmem:[#allocation4 + $0xe8] sm:$0xff]  ;;  %v149_v34 = vld [vmem:[#allocation4 + $0xf0] sm:$0xff] }
  0x23   :  { %270 = vmatpush.msra.mxu2 %v161_v22  ;;  %311 = vmatpush.msra.mxu3 %v162_v23  ;;  %v150_v35 = vld [vmem:[#allocation4 + $0xf8] sm:$0xff]  ;;  %v143_v36 = vld [vmem:[#allocation4 + $0xc0] sm:$0xff]  ;;  %v144_v37 = vld [vmem:[#allocation4 + $0xc8] sm:$0xff] }
  0x24   :  { %189 = vmatpush.msra.mxu0 %v155_v24  ;;  %230 = vmatpush.msra.mxu1 %v156_v25  ;;  %v145_v38 = vld [vmem:[#allocation4 + $0xd0] sm:$0xff]  ;;  %v146_v39 = vld [vmem:[#allocation4 + $0xd8] sm:$0xff]  ;;  %v139_v40 = vld [vmem:[#allocation4 + $0xa0] sm:$0xff] }
  0x25   :  { %271 = vmatpush.msra.mxu2 %v157_v26  ;;  %312 = vmatpush.msra.mxu3 %v158_v27  ;;  %v140_v41 = vld [vmem:[#allocation4 + $0xa8] sm:$0xff]  ;;  %v141_v42 = vld [vmem:[#allocation4 + $0xb0] sm:$0xff]  ;;  %v142_v43 = vld [vmem:[#allocation4 + $0xb8] sm:$0xff] }
  0x26   :  { %190 = vmatpush.msra.mxu0 %v151_v28  ;;  %231 = vmatpush.msra.mxu1 %v152_v29  ;;  %v135_v44 = vld [vmem:[#allocation4 + $0x80] sm:$0xff]  ;;  %v136_v45 = vld [vmem:[#allocation4 + $0x88] sm:$0xff]  ;;  %v137_v46 = vld [vmem:[#allocation4 + $0x90] sm:$0xff] }
  0x27   :  { %272 = vmatpush.msra.mxu2 %v153_v30  ;;  %313 = vmatpush.msra.mxu3 %v154_v31  ;;  %v138_v47 = vld [vmem:[#allocation4 + $0x98] sm:$0xff]  ;;  %v131_v48 = vld [vmem:[#allocation4 + $0x60] sm:$0xff]  ;;  %v132_v49 = vld [vmem:[#allocation4 + $0x68] sm:$0xff] }
  0x28   :  { %191 = vmatpush.msra.mxu0 %v147_v32  ;;  %232 = vmatpush.msra.mxu1 %v148_v33  ;;  %v133_v50 = vld [vmem:[#allocation4 + $0x70] sm:$0xff]  ;;  %v134_v51 = vld [vmem:[#allocation4 + $0x78] sm:$0xff]  ;;  %v127_v52 = vld [vmem:[#allocation4 + $0x40] sm:$0xff] }
  0x29   :  { %273 = vmatpush.msra.mxu2 %v149_v34  ;;  %314 = vmatpush.msra.mxu3 %v150_v35  ;;  %v128_v53 = vld [vmem:[#allocation4 + $0x48] sm:$0xff]  ;;  %v129_v54 = vld [vmem:[#allocation4 + $0x50] sm:$0xff]  ;;  %v130_v55 = vld [vmem:[#allocation4 + $0x58] sm:$0xff] }
  0x2a   :  { %192 = vmatpush.msra.mxu0 %v143_v36  ;;  %233 = vmatpush.msra.mxu1 %v144_v37  ;;  %v123_v56 = vld [vmem:[#allocation4 + $0x20] sm:$0xff]  ;;  %v124_v57 = vld [vmem:[#allocation4 + $0x28] sm:$0xff]  ;;  %v125_v58 = vld [vmem:[#allocation4 + $0x30] sm:$0xff] }
  0x2b   :  { %274 = vmatpush.msra.mxu2 %v145_v38  ;;  %315 = vmatpush.msra.mxu3 %v146_v39  ;;  %v126_v59 = vld [vmem:[#allocation4 + $0x38] sm:$0xff]  ;;  %v119_v60 = vld [vmem:[#allocation4] sm:$0xff]  ;;  %v120_v61 = vld [vmem:[#allocation4 + $0x8] sm:$0xff] }
  0x2c   :  { %193 = vmatpush.msra.mxu0 %v139_v40  ;;  %234 = vmatpush.msra.mxu1 %v140_v41  ;;  %v121_v62 = vld [vmem:[#allocation4 + $0x10] sm:$0xff]  ;;  %v122_v63 = vld [vmem:[#allocation4 + $0x18] sm:$0xff]  ;;  %v111_v0 = vld [vmem:[%s5139_s0] sm:$0xff] }
  0x2d   :  { %275 = vmatpush.msra.mxu2 %v141_v42  ;;  %316 = vmatpush.msra.mxu3 %v142_v43  ;;  %v3192_v1 = vld [vmem:[#allocation7 + $0x1e0] sm:$0xff]  ;;  %v3194_v2 = vld [vmem:[#allocation7 + $0x1e8] sm:$0xff]  ;;  %v3196_v3 = vld [vmem:[#allocation7 + $0x1f0] sm:$0xff] }
  0x2e   :  { %194 = vmatpush.msra.mxu0 %v135_v44  ;;  %235 = vmatpush.msra.mxu1 %v136_v45  ;;  %v3198_v4 = vld [vmem:[#allocation7 + $0x1f8] sm:$0xff]  ;;  %v3200_v5 = vld [vmem:[#allocation7 + $0x1c0] sm:$0xff]  ;;  %v3202_v6 = vld [vmem:[#allocation7 + $0x1c8] sm:$0xff] }
  0x2f   :  { %276 = vmatpush.msra.mxu2 %v137_v46  ;;  %317 = vmatpush.msra.mxu3 %v138_v47  ;;  %v3206_v7 = vld [vmem:[#allocation7 + $0x1d0] sm:$0xff]  ;;  %v3208_v8 = vld [vmem:[#allocation7 + $0x1d8] sm:$0xff]  ;;  %v3212_v9 = vld [vmem:[#allocation7 + $0x1a0] sm:$0xff] }
  0x30   :  { %195 = vmatpush.msra.mxu0 %v131_v48  ;;  %236 = vmatpush.msra.mxu1 %v132_v49  ;;  %v3214_v10 = vld [vmem:[#allocation7 + $0x1a8] sm:$0xff]  ;;  %v3218_v11 = vld [vmem:[#allocation7 + $0x1b0] sm:$0xff]  ;;  %v3220_v12 = vld [vmem:[#allocation7 + $0x1b8] sm:$0xff] }
  0x31   :  { %277 = vmatpush.msra.mxu2 %v133_v50  ;;  %318 = vmatpush.msra.mxu3 %v134_v51  ;;  %v112_v13 = vld [vmem:[%s5139_s0 + $0x8] sm:$0xff]  ;;  %v3230_v14 = vld [vmem:[#allocation7 + $0x180] sm:$0xff]  ;;  %v3235_v16 = vld [vmem:[#allocation7 + $0x190] sm:$0xff] }
  0x32   :  { %196 = vmatpush.msra.mxu0 %v127_v52  ;;  %237 = vmatpush.msra.mxu1 %v128_v53  ;;  %v3232_v15 = vld [vmem:[#allocation7 + $0x188] sm:$0xff]  ;;  %v3237_v17 = vld [vmem:[#allocation7 + $0x198] sm:$0xff]  ;;  %v3239_v18 = vld [vmem:[#allocation7 + $0x160] sm:$0xff] }
  0x33   :  { %278 = vmatpush.msra.mxu2 %v129_v54  ;;  %319 = vmatpush.msra.mxu3 %v130_v55  ;;  %v3241_v19 = vld [vmem:[#allocation7 + $0x168] sm:$0xff]  ;;  %v3245_v20 = vld [vmem:[#allocation7 + $0x170] sm:$0xff]  ;;  %v3247_v21 = vld [vmem:[#allocation7 + $0x178] sm:$0xff] }
  0x34   :  { %197 = vmatpush.msra.mxu0 %v123_v56  ;;  %238 = vmatpush.msra.mxu1 %v124_v57  ;;  %v3251_v22 = vld [vmem:[#allocation7 + $0x140] sm:$0xff]  ;;  %v3253_v23 = vld [vmem:[#allocation7 + $0x148] sm:$0xff]  ;;  %v3257_v24 = vld [vmem:[#allocation7 + $0x150] sm:$0xff] }
  0x35   :  { %279 = vmatpush.msra.mxu2 %v125_v58  ;;  %320 = vmatpush.msra.mxu3 %v126_v59  ;;  %v3259_v25 = vld [vmem:[#allocation7 + $0x158] sm:$0xff]  ;;  %v113_v26 = vld [vmem:[%s5139_s0 + $0x10] sm:$0xff]  ;;  %v3269_v27 = vld [vmem:[#allocation7 + $0x120] sm:$0xff] }
  0x36   :  { %198 = vmatpush.msra.mxu0 %v119_v60  ;;  %239 = vmatpush.msra.mxu1 %v120_v61  ;;  %v3271_v28 = vld [vmem:[#allocation7 + $0x128] sm:$0xff]  ;;  %v3274_v29 = vld [vmem:[#allocation7 + $0x130] sm:$0xff]  ;;  %v3276_v30 = vld [vmem:[#allocation7 + $0x138] sm:$0xff] }
  0x37   :  { %280 = vmatpush.msra.mxu2 %v121_v62  ;;  %321 = vmatpush.msra.mxu3 %v122_v63  ;;  %v3278_v31 = vld [vmem:[#allocation7 + $0x100] sm:$0xff]  ;;  %v3280_v32 = vld [vmem:[#allocation7 + $0x108] sm:$0xff]  ;;  %v3284_v33 = vld [vmem:[#allocation7 + $0x110] sm:$0xff] }
  0x38   :  { %199 = vmatmul.f32.vlgmr.msra.gmra.mxu0 %v111_v0  ;;  %240 = vmatmul.f32.vlgmr.msra.gmra.mxu1 %v111_v0  ;;  %v3286_v34 = vld [vmem:[#allocation7 + $0x118] sm:$0xff]  ;;  %v3290_v35 = vld [vmem:[#allocation7 + $0xe0] sm:$0xff]  ;;  %v3292_v36 = vld [vmem:[#allocation7 + $0xe8] sm:$0xff] }
  0x39   :  { %281 = vmatmul.f32.vlgmr.msra.gmra.mxu2 %v111_v0  ;;  %322 = vmatmul.f32.vlgmr.msra.gmra.mxu3 %v111_v0  ;;  %v3296_v37 = vld [vmem:[#allocation7 + $0xf0] sm:$0xff]  ;;  %v3298_v38 = vld [vmem:[#allocation7 + $0xf8] sm:$0xff]  ;;  %v3308_v40 = vld [vmem:[#allocation7 + $0xc0] sm:$0xff] }
  0x3a   :  { %451 = vmatpush.msrb.mxu0 %v3192_v1  ;;  %471 = vmatpush.msrb.mxu1 %v3194_v2  ;;  %v114_v39 = vld [vmem:[%s5139_s0 + $0x18] sm:$0xff]  ;;  %v3310_v41 = vld [vmem:[#allocation7 + $0xc8] sm:$0xff]  ;;  %v3313_v42 = vld [vmem:[#allocation7 + $0xd0] sm:$0xff] }
  0x3b   :  { %491 = vmatpush.msrb.mxu2 %v3196_v3  ;;  %511 = vmatpush.msrb.mxu3 %v3198_v4  ;;  %v3315_v43 = vld [vmem:[#allocation7 + $0xd8] sm:$0xff]  ;;  %v3317_v44 = vld [vmem:[#allocation7 + $0xa0] sm:$0xff]  ;;  %v3319_v45 = vld [vmem:[#allocation7 + $0xa8] sm:$0xff] }
  0x3c   :  { %452 = vmatpush.msrb.mxu0 %v3200_v5  ;;  %472 = vmatpush.msrb.mxu1 %v3202_v6  ;;  %v3323_v46 = vld [vmem:[#allocation7 + $0xb0] sm:$0xff]  ;;  %v3325_v47 = vld [vmem:[#allocation7 + $0xb8] sm:$0xff]  ;;  %v3329_v48 = vld [vmem:[#allocation7 + $0x80] sm:$0xff] }
  0x3d   :  { %492 = vmatpush.msrb.mxu2 %v3206_v7  ;;  %512 = vmatpush.msrb.mxu3 %v3208_v8  ;;  %5347 = vst [vmem:[#allocation18_spill] sm:$0xff] %v3323_v46  ;;  %v3331_v49 = vld [vmem:[#allocation7 + $0x88] sm:$0xff]  ;;  %v3335_v50 = vld [vmem:[#allocation7 + $0x90] sm:$0xff]  ;;  %v3337_v51 = vld [vmem:[#allocation7 + $0x98] sm:$0xff] }
  0x3e   :  { %453 = vmatpush.msrb.mxu0 %v3212_v9  ;;  %473 = vmatpush.msrb.mxu1 %v3214_v10  ;;  %5348 = vst [vmem:[#allocation19_spill] sm:$0xff] %v3325_v47  ;;  %v115_v52 = vld [vmem:[%s5139_s0 + $0x20] sm:$0xff]  ;;  %v3349_v54 = vld [vmem:[#allocation7 + $0x68] sm:$0xff]  ;;  %v3352_v55 = vld [vmem:[#allocation7 + $0x70] sm:$0xff] }
  0x3f   :  { %493 = vmatpush.msrb.mxu2 %v3218_v11  ;;  %513 = vmatpush.msrb.mxu3 %v3220_v12  ;;  %5349 = vst [vmem:[#allocation20_spill] sm:$0xff] %v3329_v48  ;;  %v3347_v53 = vld [vmem:[#allocation7 + $0x60] sm:$0xff]  ;;  %v3354_v56 = vld [vmem:[#allocation7 + $0x78] sm:$0xff]  ;;  %v3358_v58 = vld [vmem:[#allocation7 + $0x48] sm:$0xff] }
  0x40   :  { %202 = vmatmul.f32.gmra.mxu0 %v112_v13  ;;  %243 = vmatmul.f32.gmra.mxu1 %v112_v13  ;;  %5350 = vst [vmem:[#allocation21_spill] sm:$0xff] %v3331_v49  ;;  %v3356_v57 = vld [vmem:[#allocation7 + $0x40] sm:$0xff]  ;;  %v3362_v59 = vld [vmem:[#allocation7 + $0x50] sm:$0xff]  ;;  %v3364_v60 = vld [vmem:[#allocation7 + $0x58] sm:$0xff] }
  0x41   :  { %284 = vmatmul.f32.gmra.mxu2 %v112_v13  ;;  %325 = vmatmul.f32.gmra.mxu3 %v112_v13  ;;  %5351 = vst [vmem:[#allocation22_spill] sm:$0xff] %v3335_v50  ;;  %v3368_v61 = vld [vmem:[#allocation7 + $0x20] sm:$0xff]  ;;  %v3370_v62 = vld [vmem:[#allocation7 + $0x28] sm:$0xff]  ;;  %v3374_v63 = vld [vmem:[#allocation7 + $0x30] sm:$0xff] }
  0x42   :  { %454 = vmatpush.msrb.mxu0 %v3230_v14  ;;  %474 = vmatpush.msrb.mxu1 %v3232_v15  ;;  %5352 = vst [vmem:[#allocation23_spill] sm:$0xff] %v3337_v51  ;;  %v3376_v0 = vld [vmem:[#allocation7 + $0x38] sm:$0xff]  ;;  %v116_v13 = vld [vmem:[%s5139_s0 + $0x28] sm:$0xff] }
  0x43   :  { %494 = vmatpush.msrb.mxu2 %v3235_v16  ;;  %514 = vmatpush.msrb.mxu3 %v3237_v17  ;;  %5353 = vst [vmem:[#allocation24_spill] sm:$0xff] %v3347_v53 }
  0x44   :  { %455 = vmatpush.msrb.mxu0 %v3239_v18  ;;  %475 = vmatpush.msrb.mxu1 %v3241_v19  ;;  %5354 = vst [vmem:[#allocation25_spill] sm:$0xff] %v3349_v54 }
  0x45   :  { %495 = vmatpush.msrb.mxu2 %v3245_v20  ;;  %515 = vmatpush.msrb.mxu3 %v3247_v21  ;;  %5355 = vst [vmem:[#allocation26_spill] sm:$0xff] %v3352_v55 }
  0x46   :  { %456 = vmatpush.msrb.mxu0 %v3251_v22  ;;  %476 = vmatpush.msrb.mxu1 %v3253_v23  ;;  %5356 = vst [vmem:[#allocation27_spill] sm:$0xff] %v3354_v56 }
  0x47   :  { %496 = vmatpush.msrb.mxu2 %v3257_v24  ;;  %516 = vmatpush.msrb.mxu3 %v3259_v25  ;;  %5357 = vst [vmem:[#allocation28_spill] sm:$0xff] %v3356_v57 }
  0x48   :  { %205 = vmatmul.f32.gmra.mxu0 %v113_v26  ;;  %246 = vmatmul.f32.gmra.mxu1 %v113_v26  ;;  %5358 = vst [vmem:[#allocation29_spill] sm:$0xff] %v3358_v58 }
  0x49   :  { %287 = vmatmul.f32.gmra.mxu2 %v113_v26  ;;  %328 = vmatmul.f32.gmra.mxu3 %v113_v26  ;;  %5359 = vst [vmem:[#allocation30_spill] sm:$0xff] %v3362_v59  ;;  %v3386_v26 = vld [vmem:[#allocation7] sm:$0xff] }
  0x4a   :  { %457 = vmatpush.msrb.mxu0 %v3269_v27  ;;  %477 = vmatpush.msrb.mxu1 %v3271_v28  ;;  %5360 = vst [vmem:[#allocation31_spill] sm:$0xff] %v3364_v60 }
  0x4b   :  { %497 = vmatpush.msrb.mxu2 %v3274_v29  ;;  %517 = vmatpush.msrb.mxu3 %v3276_v30  ;;  %5361 = vst [vmem:[#allocation32_spill] sm:$0xff] %v3368_v61 }
  0x4c   :  { %458 = vmatpush.msrb.mxu0 %v3278_v31  ;;  %478 = vmatpush.msrb.mxu1 %v3280_v32  ;;  %5362 = vst [vmem:[#allocation33_spill] sm:$0xff] %v3370_v62 }
  0x4d   :  { %498 = vmatpush.msrb.mxu2 %v3284_v33  ;;  %518 = vmatpush.msrb.mxu3 %v3286_v34  ;;  %5363 = vst [vmem:[#allocation34_spill] sm:$0xff] %v3374_v63 }
  0x4e   :  { %459 = vmatpush.msrb.mxu0 %v3290_v35  ;;  %479 = vmatpush.msrb.mxu1 %v3292_v36  ;;  %5364 = vst [vmem:[#allocation35_spill] sm:$0xff] %v3376_v0 }
  0x4f   :  { %499 = vmatpush.msrb.mxu2 %v3296_v37  ;;  %519 = vmatpush.msrb.mxu3 %v3298_v38  ;;  %5365 = vst [vmem:[#allocation36_spill] sm:$0xff] %v3386_v26 }
  0x50   :  { %208 = vmatmul.f32.gmra.mxu0 %v114_v39  ;;  %249 = vmatmul.f32.gmra.mxu1 %v114_v39 }
  0x51   :  { %290 = vmatmul.f32.gmra.mxu2 %v114_v39  ;;  %331 = vmatmul.f32.gmra.mxu3 %v114_v39  ;;  %v3388_v39 = vld [vmem:[#allocation7 + $0x8] sm:$0xff] }
  0x52   :  { %460 = vmatpush.msrb.mxu0 %v3308_v40  ;;  %480 = vmatpush.msrb.mxu1 %v3310_v41  ;;  %5366 = vst [vmem:[#allocation37_spill] sm:$0xff] %v3388_v39 }
  0x53   :  { %500 = vmatpush.msrb.mxu2 %v3313_v42  ;;  %520 = vmatpush.msrb.mxu3 %v3315_v43 }
  0x54   :  { %461 = vmatpush.msrb.mxu0 %v3317_v44  ;;  %481 = vmatpush.msrb.mxu1 %v3319_v45 }
  0x55   :  { %501 = vmatpush.msrb.mxu2 %v3323_v46  ;;  %521 = vmatpush.msrb.mxu3 %v3325_v47 }
  0x56   :  { %462 = vmatpush.msrb.mxu0 %v3329_v48  ;;  %482 = vmatpush.msrb.mxu1 %v3331_v49 }
  0x57   :  { %502 = vmatpush.msrb.mxu2 %v3335_v50  ;;  %522 = vmatpush.msrb.mxu3 %v3337_v51 }
  0x58   :  { %211 = vmatmul.f32.gmra.mxu0 %v115_v52  ;;  %252 = vmatmul.f32.gmra.mxu1 %v115_v52 }
  0x59   :  { %293 = vmatmul.f32.gmra.mxu2 %v115_v52  ;;  %334 = vmatmul.f32.gmra.mxu3 %v115_v52  ;;  %v3391_v52 = vld [vmem:[#allocation7 + $0x10] sm:$0xff] }
  0x5a   :  { %463 = vmatpush.msrb.mxu0 %v3347_v53  ;;  %483 = vmatpush.msrb.mxu1 %v3349_v54  ;;  %5367 = vst [vmem:[#allocation38_spill] sm:$0xff] %v3391_v52 }
  0x5b   :  { %503 = vmatpush.msrb.mxu2 %v3352_v55  ;;  %523 = vmatpush.msrb.mxu3 %v3354_v56 }
  0x5c   :  { %464 = vmatpush.msrb.mxu0 %v3356_v57  ;;  %484 = vmatpush.msrb.mxu1 %v3358_v58  ;;  %v3393_v58 = vld [vmem:[#allocation7 + $0x18] sm:$0xff] }
  0x5d   :  { %504 = vmatpush.msrb.mxu2 %v3362_v59  ;;  %524 = vmatpush.msrb.mxu3 %v3364_v60  ;;  %5368 = vst [vmem:[#allocation39_spill] sm:$0xff] %v3393_v58 }
  0x5e   :  { %465 = vmatpush.msrb.mxu0 %v3368_v61  ;;  %485 = vmatpush.msrb.mxu1 %v3370_v62 }
  0x5f   :  { %505 = vmatpush.msrb.mxu2 %v3374_v63  ;;  %525 = vmatpush.msrb.mxu3 %v3376_v0  ;;  %v117_v0 = vld [vmem:[%s5139_s0 + $0x30] sm:$0xff] }
  0x60   :  { %214 = vmatmul.f32.gmra.mxu0 %v116_v13  ;;  %255 = vmatmul.f32.gmra.mxu1 %v116_v13 }
  0x61   :  { %296 = vmatmul.f32.gmra.mxu2 %v116_v13  ;;  %337 = vmatmul.f32.gmra.mxu3 %v116_v13  ;;  %v118_v13 = vld [vmem:[%s5139_s0 + $0x38] sm:$0xff] }
  0x62   :  { %466 = vmatpush.msrb.mxu0 %v3386_v26  ;;  %486 = vmatpush.msrb.mxu1 %v3388_v39 }
  0x63   :  { %506 = vmatpush.msrb.mxu2 %v3391_v52  ;;  %526 = vmatpush.msrb.mxu3 %v3393_v58 }
  0x64   :  { %574 = vmatpush.msra.mxu0 %v3192_v1  ;;  %594 = vmatpush.msra.mxu1 %v3194_v2 }
  0x65   :  { %614 = vmatpush.msra.mxu2 %v3196_v3  ;;  %634 = vmatpush.msra.mxu3 %v3198_v4 }
  0x66   :  { %575 = vmatpush.msra.mxu0 %v3200_v5  ;;  %595 = vmatpush.msra.mxu1 %v3202_v6 }
  0x67   :  { %615 = vmatpush.msra.mxu2 %v3206_v7  ;;  %635 = vmatpush.msra.mxu3 %v3208_v8 }
  0x68   :  { %217 = vmatmul.f32.gmra.mxu0 %v117_v0  ;;  %258 = vmatmul.f32.gmra.mxu1 %v117_v0 }
  0x69   :  { %299 = vmatmul.f32.gmra.mxu2 %v117_v0  ;;  %340 = vmatmul.f32.gmra.mxu3 %v117_v0  ;;  %v5153_v0 = vmov 0.0  }
  0x6a   :  { %576 = vmatpush.msra.mxu0 %v3212_v9  ;;  %596 = vmatpush.msra.mxu1 %v3214_v10 }
  0x6b   :  { %616 = vmatpush.msra.mxu2 %v3218_v11  ;;  %636 = vmatpush.msra.mxu3 %v3220_v12 }
  0x6c   :  { %577 = vmatpush.msra.mxu0 %v3230_v14  ;;  %597 = vmatpush.msra.mxu1 %v3232_v15 }
  0x6d   :  { %617 = vmatpush.msra.mxu2 %v3235_v16  ;;  %637 = vmatpush.msra.mxu3 %v3237_v17 }
  0x6e   :  { %578 = vmatpush.msra.mxu0 %v3239_v18  ;;  %598 = vmatpush.msra.mxu1 %v3241_v19 }
  0x6f   :  { %618 = vmatpush.msra.mxu2 %v3245_v20  ;;  %638 = vmatpush.msra.mxu3 %v3247_v21 }
  0x70   :  { %220 = vmatmul.f32.gmra.mxu0 %v118_v13  ;;  %261 = vmatmul.f32.gmra.mxu1 %v118_v13 }
  0x71   :  { %302 = vmatmul.f32.gmra.mxu2 %v118_v13  ;;  %343 = vmatmul.f32.gmra.mxu3 %v118_v13  ;;  %v5369_v13 = vld [vmem:[#allocation29_spill] sm:$0xff] }
  0x72   :  { %579 = vmatpush.msra.mxu0 %v3251_v22  ;;  %599 = vmatpush.msra.mxu1 %v3253_v23 }
  0x73   :  { %619 = vmatpush.msra.mxu2 %v3257_v24  ;;  %639 = vmatpush.msra.mxu3 %v3259_v25 }
  0x74   :  { %580 = vmatpush.msra.mxu0 %v3269_v27  ;;  %600 = vmatpush.msra.mxu1 %v3271_v28 }
  0x75   :  { %620 = vmatpush.msra.mxu2 %v3274_v29  ;;  %640 = vmatpush.msra.mxu3 %v3276_v30 }
  0x76   :  { %581 = vmatpush.msra.mxu0 %v3278_v31  ;;  %601 = vmatpush.msra.mxu1 %v3280_v32 }
  0x77   :  { %621 = vmatpush.msra.mxu2 %v3284_v33  ;;  %641 = vmatpush.msra.mxu3 %v3286_v34 }
  0x78   :  { %467 = vmatmul.f32.vlgmr.msrb.gmra.mxu0 %v5153_v0  ;;  %487 = vmatmul.f32.vlgmr.msrb.gmra.mxu1 %v5153_v0 }
  0x79   :  { %507 = vmatmul.f32.vlgmr.msrb.gmra.mxu2 %v5153_v0  ;;  %527 = vmatmul.f32.vlgmr.msrb.gmra.mxu3 %v5153_v0  ;;  %v5370_v0 = vld [vmem:[#allocation35_spill] sm:$0xff] }
  0x7a   :  { %582 = vmatpush.msra.mxu0 %v3290_v35  ;;  %602 = vmatpush.msra.mxu1 %v3292_v36 }
  0x7b   :  { %622 = vmatpush.msra.mxu2 %v3296_v37  ;;  %642 = vmatpush.msra.mxu3 %v3298_v38 }
  0x7c   :  { %583 = vmatpush.msra.mxu0 %v3308_v40  ;;  %603 = vmatpush.msra.mxu1 %v3310_v41 }
  0x7d   :  { %623 = vmatpush.msra.mxu2 %v3313_v42  ;;  %643 = vmatpush.msra.mxu3 %v3315_v43 }
  0x7e   :  { %584 = vmatpush.msra.mxu0 %v3317_v44  ;;  %604 = vmatpush.msra.mxu1 %v3319_v45 }
  0x7f   :  { %624 = vmatpush.msra.mxu2 %v3323_v46  ;;  %644 = vmatpush.msra.mxu3 %v3325_v47 }
  0x80   :  { %585 = vmatpush.msra.mxu0 %v3329_v48  ;;  %605 = vmatpush.msra.mxu1 %v3331_v49 }
  0x81   :  { %625 = vmatpush.msra.mxu2 %v3335_v50  ;;  %645 = vmatpush.msra.mxu3 %v3337_v51 }
  0x82   :  { %586 = vmatpush.msra.mxu0 %v3347_v53  ;;  %606 = vmatpush.msra.mxu1 %v3349_v54 }
  0x83   :  { %626 = vmatpush.msra.mxu2 %v3352_v55  ;;  %646 = vmatpush.msra.mxu3 %v3354_v56 }
  0x84   :  { %587 = vmatpush.msra.mxu0 %v3356_v57  ;;  %607 = vmatpush.msra.mxu1 %v5369_v13 }
  0x85   :  { %627 = vmatpush.msra.mxu2 %v3362_v59  ;;  %647 = vmatpush.msra.mxu3 %v3364_v60 }
  0x86   :  { %588 = vmatpush.msra.mxu0 %v3368_v61  ;;  %608 = vmatpush.msra.mxu1 %v3370_v62 }
  0x87   :  { %628 = vmatpush.msra.mxu2 %v3374_v63  ;;  %648 = vmatpush.msra.mxu3 %v5370_v0 }
  0x88   :  { %589 = vmatpush.msra.mxu0 %v3386_v26  ;;  %609 = vmatpush.msra.mxu1 %v3388_v39 }
  0x89   :  { %629 = vmatpush.msra.mxu2 %v3391_v52  ;;  %649 = vmatpush.msra.mxu3 %v3393_v58 }
  0x8a   :  { %689 = vmatpush.msrb.mxu0 %v3192_v1  ;;  %709 = vmatpush.msrb.mxu1 %v3194_v2 }
  0x8b   :  { %729 = vmatpush.msrb.mxu2 %v3196_v3  ;;  %749 = vmatpush.msrb.mxu3 %v3198_v4 }
  0x8c   :  { %690 = vmatpush.msrb.mxu0 %v3200_v5  ;;  %710 = vmatpush.msrb.mxu1 %v3202_v6 }
  0x8d   :  { %730 = vmatpush.msrb.mxu2 %v3206_v7  ;;  %750 = vmatpush.msrb.mxu3 %v3208_v8 }
  0x8e   :  { %691 = vmatpush.msrb.mxu0 %v3212_v9  ;;  %711 = vmatpush.msrb.mxu1 %v3214_v10 }
  0x8f   :  { %731 = vmatpush.msrb.mxu2 %v3218_v11  ;;  %751 = vmatpush.msrb.mxu3 %v3220_v12 }
  0x90   :  { %692 = vmatpush.msrb.mxu0 %v3230_v14  ;;  %712 = vmatpush.msrb.mxu1 %v3232_v15 }
  0x91   :  { %732 = vmatpush.msrb.mxu2 %v3235_v16  ;;  %752 = vmatpush.msrb.mxu3 %v3237_v17 }
  0x92   :  { %693 = vmatpush.msrb.mxu0 %v3239_v18  ;;  %713 = vmatpush.msrb.mxu1 %v3241_v19 }
  0x93   :  { %733 = vmatpush.msrb.mxu2 %v3245_v20  ;;  %753 = vmatpush.msrb.mxu3 %v3247_v21 }
  0x94   :  { %694 = vmatpush.msrb.mxu0 %v3251_v22  ;;  %714 = vmatpush.msrb.mxu1 %v3253_v23 }
  0x95   :  { %734 = vmatpush.msrb.mxu2 %v3257_v24  ;;  %754 = vmatpush.msrb.mxu3 %v3259_v25 }
  0x96   :  { %695 = vmatpush.msrb.mxu0 %v3269_v27  ;;  %715 = vmatpush.msrb.mxu1 %v3271_v28 }
  0x97   :  { %735 = vmatpush.msrb.mxu2 %v3274_v29  ;;  %755 = vmatpush.msrb.mxu3 %v3276_v30 }
  0x98   :  { %696 = vmatpush.msrb.mxu0 %v3278_v31  ;;  %716 = vmatpush.msrb.mxu1 %v3280_v32 }
  0x99   :  { %736 = vmatpush.msrb.mxu2 %v3284_v33  ;;  %756 = vmatpush.msrb.mxu3 %v3286_v34 }
  0x9a   :  { %697 = vmatpush.msrb.mxu0 %v3290_v35  ;;  %717 = vmatpush.msrb.mxu1 %v3292_v36 }
  0x9b   :  { %737 = vmatpush.msrb.mxu2 %v3296_v37  ;;  %757 = vmatpush.msrb.mxu3 %v3298_v38 }
  0x9c   :  { %698 = vmatpush.msrb.mxu0 %v3308_v40  ;;  %718 = vmatpush.msrb.mxu1 %v3310_v41 }
  0x9d   :  { %738 = vmatpush.msrb.mxu2 %v3313_v42  ;;  %758 = vmatpush.msrb.mxu3 %v3315_v43 }
  0x9e   :  { %699 = vmatpush.msrb.mxu0 %v3317_v44  ;;  %719 = vmatpush.msrb.mxu1 %v3319_v45 }
  0x9f   :  { %739 = vmatpush.msrb.mxu2 %v3323_v46  ;;  %759 = vmatpush.msrb.mxu3 %v3325_v47 }
  0xa0   :  { %700 = vmatpush.msrb.mxu0 %v3329_v48  ;;  %720 = vmatpush.msrb.mxu1 %v3331_v49 }
  0xa1   :  { %740 = vmatpush.msrb.mxu2 %v3335_v50  ;;  %760 = vmatpush.msrb.mxu3 %v3337_v51 }
  0xa2   :  { %701 = vmatpush.msrb.mxu0 %v3347_v53  ;;  %721 = vmatpush.msrb.mxu1 %v3349_v54 }
  0xa3   :  { %741 = vmatpush.msrb.mxu2 %v3352_v55  ;;  %761 = vmatpush.msrb.mxu3 %v3354_v56 }
  0xa4   :  { %702 = vmatpush.msrb.mxu0 %v3356_v57  ;;  %722 = vmatpush.msrb.mxu1 %v5369_v13 }
  0xa5   :  { %742 = vmatpush.msrb.mxu2 %v3362_v59  ;;  %762 = vmatpush.msrb.mxu3 %v3364_v60 }
  0xa6   :  { %703 = vmatpush.msrb.mxu0 %v3368_v61  ;;  %723 = vmatpush.msrb.mxu1 %v3370_v62 }
  0xa7   :  { %743 = vmatpush.msrb.mxu2 %v3374_v63  ;;  %763 = vmatpush.msrb.mxu3 %v5370_v0 }
  0xa8   :  { %704 = vmatpush.msrb.mxu0 %v3386_v26  ;;  %724 = vmatpush.msrb.mxu1 %v3388_v39 }
  0xa9   :  { %744 = vmatpush.msrb.mxu2 %v3391_v52  ;;  %764 = vmatpush.msrb.mxu3 %v3393_v58 }
  0xb5   :  { %v200_v13 = vpop.f32.mrf.mxu0  ;;  %v241_v59 = vpop.f32.mrf.mxu1 }
  0xbc   :  { %v282_v57 = vpop.f32.mrf.mxu2  ;;  %v323_v60 = vpop.f32.mrf.mxu3 }
  0xbd   :  { %v3537_v56 = vpop.f32.mrf.mxu0  ;;  %v3539_v61 = vpop.f32.mrf.mxu1 }
  0xbe   :  { %5371 = vst [vmem:[#allocation40_spill] sm:$0xff] %v3537_v56 }
  0xbf   :  { %5372 = vst [vmem:[#allocation41_spill] sm:$0xff] %v3539_v61 }
  0xc4   :  { %v3541_v62 = vpop.f32.mrf.mxu2  ;;  %v3543_v63 = vpop.f32.mrf.mxu3 }
  0xc5   :  { %5373 = vst [vmem:[#allocation42_spill] sm:$0xff] %v3541_v62  ;;  %v3545_v0 = vpop.f32.mrf.mxu0  ;;  %v3547_v26 = vpop.f32.mrf.mxu1 }
  0xc6   :  { %5374 = vst [vmem:[#allocation43_spill] sm:$0xff] %v3543_v63 }
  0xc7   :  { %5375 = vst [vmem:[#allocation44_spill] sm:$0xff] %v3545_v0 }
  0xc8   :  { %5376 = vst [vmem:[#allocation45_spill] sm:$0xff] %v3547_v26 }
  0xcc   :  { %v3549_v39 = vpop.f32.mrf.mxu2  ;;  %v3551_v52 = vpop.f32.mrf.mxu3 }
  0xcd   :  { %5377 = vst [vmem:[#allocation46_spill] sm:$0xff] %v3549_v39  ;;  %v3553_v58 = vpop.f32.mrf.mxu0  ;;  %v3555_v55 = vpop.f32.mrf.mxu1 }
  0xce   :  { %5378 = vst [vmem:[#allocation47_spill] sm:$0xff] %v3551_v52 }
  0xcf   :  { %5379 = vst [vmem:[#allocation48_spill] sm:$0xff] %v3553_v58 }
  0xd0   :  { %5380 = vst [vmem:[#allocation49_spill] sm:$0xff] %v3555_v55 }
  0xd4   :  { %v3557_v54 = vpop.f32.mrf.mxu2  ;;  %v3559_v56 = vpop.f32.mrf.mxu3 }
  0xd5   :  { %5381 = vst [vmem:[#allocation50_spill] sm:$0xff] %v3557_v54  ;;  %v3561_v61 = vpop.f32.mrf.mxu0  ;;  %v3563_v62 = vpop.f32.mrf.mxu1 }
  0xd6   :  { %5382 = vst [vmem:[#allocation51_spill] sm:$0xff] %v3559_v56 }
  0xd7   :  { %5383 = vst [vmem:[#allocation52_spill] sm:$0xff] %v3561_v61 }
  0xd8   :  { %5384 = vst [vmem:[#allocation53_spill] sm:$0xff] %v3563_v62 }
  0xdc   :  { %v3565_v63 = vpop.f32.mrf.mxu2  ;;  %v3567_v0 = vpop.f32.mrf.mxu3 }
  0xdd   :  { %5385 = vst [vmem:[#allocation54_spill] sm:$0xff] %v3565_v63  ;;  %v3569_v26 = vpop.f32.mrf.mxu0  ;;  %v3571_v39 = vpop.f32.mrf.mxu1 }
  0xde   :  { %5386 = vst [vmem:[#allocation55_spill] sm:$0xff] %v3567_v0 }
  0xdf   :  { %5387 = vst [vmem:[#allocation56_spill] sm:$0xff] %v3569_v26 }
  0xe0   :  { %5388 = vst [vmem:[#allocation57_spill] sm:$0xff] %v3571_v39  ;;  %v443_v39 = vld [vmem:[%s5142_s3] sm:$0xf] }
  0xe1   :  { %v3602_v50 = vperm.slane %v443_v39, 2  ;;  %v3604_v49 = vperm.slane %v443_v39, 3 }
  0xe4   :  { %v3573_v52 = vpop.f32.mrf.mxu2  ;;  %v3575_v58 = vpop.f32.mrf.mxu3 }
  0xe5   :  { %5389 = vst [vmem:[#allocation58_spill] sm:$0xff] %v3573_v52  ;;  %v3577_v55 = vpop.f32.mrf.mxu0  ;;  %v3579_v54 = vpop.f32.mrf.mxu1 }
  0xe6   :  { %5390 = vst [vmem:[#allocation59_spill] sm:$0xff] %v3575_v58  ;;  %v3596_v58 = vperm.slane %v443_v39, 0 }
  0xe7   :  { %5391 = vst [vmem:[#allocation60_spill] sm:$0xff] %v3577_v55  ;;  %v3598_v55 = vperm.slane %v443_v39, 1 }
  0xe8   :  { %5392 = vst [vmem:[#allocation61_spill] sm:$0xff] %v3579_v54 }
  0xe9   :  { %5399 = vst [vmem:[#allocation68_spill] sm:$0xff] %v3596_v58 }
  0xea   :  { %5400 = vst [vmem:[#allocation69_spill] sm:$0xff] %v3598_v55 }
  0xec   :  { %v3581_v56 = vpop.f32.mrf.mxu2  ;;  %v3583_v61 = vpop.f32.mrf.mxu3 }
  0xed   :  { %5393 = vst [vmem:[#allocation62_spill] sm:$0xff] %v3581_v56  ;;  %v3585_v62 = vpop.f32.mrf.mxu0  ;;  %v3587_v63 = vpop.f32.mrf.mxu1 }
  0xee   :  { %5394 = vst [vmem:[#allocation63_spill] sm:$0xff] %v3583_v61 }
  0xef   :  { %5395 = vst [vmem:[#allocation64_spill] sm:$0xff] %v3585_v62 }
  0xf0   :  { %5396 = vst [vmem:[#allocation65_spill] sm:$0xff] %v3587_v63 }
  0xf4   :  { %v3592_v26 = vpop.f32.mrf.mxu2  ;;  %v3594_v52 = vpop.f32.mrf.mxu3 }
  0xf5   :  { %5397 = vst [vmem:[#allocation66_spill] sm:$0xff] %v3592_v26  ;;  %v468_v54 = vpop.f32.mrf.mxu0  ;;  %v488_v56 = vpop.f32.mrf.mxu1 }
  0xf6   :  { %5398 = vst [vmem:[#allocation67_spill] sm:$0xff] %v3594_v52  ;;  %v531_v0 = vadd.f32 %v468_v54, %v200_v13  ;;  %v532_v61 = vadd.f32 %v488_v56, %v241_v59 }
  0xf8   :  { %v544_v62 = vadd.f32 %v3596_v58, %v531_v0  ;;  %v545_v63 = vadd.f32 %v3598_v55, %v532_v61 }
  0xfa   :  { %v548_v53 = vmul.f32 0.5, %v544_v62  ;;  %v552_v51 = vmul.f32 0.5, %v545_v63 }
  0xfc   :  { %2673 = vtanh.f32 %v548_v53  ;;  %v508_v52 = vpop.f32.mrf.mxu2  ;;  %v528_v26 = vpop.f32.mrf.mxu3 }
  0xfd   :  { %2675 = vtanh.f32 %v552_v51  ;;  %v533_v48 = vadd.f32 %v508_v52, %v282_v57  ;;  %v534_v47 = vadd.f32 %v528_v26, %v323_v60  ;;  %v5404_v60 = vld [vmem:[#allocation20_spill] sm:$0xff]  ;;  %v5405_v26 = vld [vmem:[#allocation21_spill] sm:$0xff]  ;;  %v5406_v52 = vld [vmem:[#allocation22_spill] sm:$0xff] }
  0xff   :  { %v546_v46 = vadd.f32 %v3602_v50, %v533_v48  ;;  %v547_v54 = vadd.f32 %v3604_v49, %v534_v47 }
 0x101   :  { %2677 = vtanh.f32 %v546_v46  ;;  %v557_v56 = vmul.f32 0.5, %v547_v54  ;;  %v5407_v54 = vld [vmem:[#allocation23_spill] sm:$0xff] }
 0x102   :  { %v2674_v59 = vpop.eup %2673 }
 0x103   :  { %v2676_v61 = vpop.eup %2675  ;;  %v550_v62 = vmul.f32 0.5, %v2674_v59  ;;  %2679 = vtanh.f32 %v557_v56  ;;  %v5408_v56 = vld [vmem:[#allocation24_spill] sm:$0xff]  ;;  %v5409_v59 = vld [vmem:[#allocation25_spill] sm:$0xff] }
 0x104   :  { %v554_v63 = vmul.f32 0.5, %v2676_v61  ;;  %v5410_v61 = vld [vmem:[#allocation26_spill] sm:$0xff] }
 0x105   :  { %v551_v0 = vadd.f32 0.5, %v550_v62  ;;  %v5411_v62 = vld [vmem:[#allocation27_spill] sm:$0xff] }
 0x106   :  { %v555_v39 = vadd.f32 0.5, %v554_v63  ;;  %v5412_v63 = vld [vmem:[#allocation28_spill] sm:$0xff] }
 0x107   :  { %v2678_v13 = vpop.eup %2677 }
 0x108   :  { %v561_v53 = vmul.f32 0.0, %v555_v39  ;;  %v562_v55 = vmul.f32 %v2678_v13, %v551_v0  ;;  %v5413_v0 = vld [vmem:[#allocation29_spill] sm:$0xff]  ;;  %v5414_v39 = vld [vmem:[#allocation30_spill] sm:$0xff]  ;;  %v5415_v13 = vld [vmem:[#allocation31_spill] sm:$0xff] }
 0x109   :  { %v2680_v58 = vpop.eup %2679 }
 0x10a   :  { %v3608_v51 = vadd.f32 %v562_v55, %v561_v53  ;;  %v559_v48 = vmul.f32 0.5, %v2680_v58  ;;  %v5402_v55 = vld [vmem:[#allocation18_spill] sm:$0xff]  ;;  %v5403_v58 = vld [vmem:[#allocation19_spill] sm:$0xff]  ;;  %v5416_v53 = vld [vmem:[#allocation32_spill] sm:$0xff] }
 0x10c   :  { %2681 = vtanh.f32 %v3608_v51  ;;  %v560_v57 = vadd.f32 0.5, %v559_v48  ;;  %v5417_v48 = vld [vmem:[#allocation33_spill] sm:$0xff] }
 0x112   :  { %v2682_v47 = vpop.eup %2681 }
 0x113   :  { %v3611_v46 = vmul.f32 %v2682_v47, %v560_v57  ;;  %v5418_v57 = vld [vmem:[#allocation34_spill] sm:$0xff]  ;;  %v5419_v47 = vld [vmem:[#allocation35_spill] sm:$0xff] }
 0x115   :  { %5401 = vst [vmem:[#allocation70_spill] sm:$0xff] %v3611_v46  ;;  %590 = vmatmul.f32.vlgmr.msra.gmra.mxu0 %v3611_v46  ;;  %610 = vmatmul.f32.vlgmr.msra.gmra.mxu1 %v3611_v46 }
 0x116   :  { %630 = vmatmul.f32.vlgmr.msra.gmra.mxu2 %v3611_v46  ;;  %650 = vmatmul.f32.vlgmr.msra.gmra.mxu3 %v3611_v46  ;;  %v5420_v46 = vld [vmem:[#allocation36_spill] sm:$0xff] }
 0x117   :  { %804 = vmatpush.msra.mxu0 %v3192_v1  ;;  %824 = vmatpush.msra.mxu1 %v3194_v2 }
 0x118   :  { %844 = vmatpush.msra.mxu2 %v3196_v3  ;;  %864 = vmatpush.msra.mxu3 %v3198_v4 }
 0x119   :  { %805 = vmatpush.msra.mxu0 %v3200_v5  ;;  %825 = vmatpush.msra.mxu1 %v3202_v6 }
 0x11a   :  { %845 = vmatpush.msra.mxu2 %v3206_v7  ;;  %865 = vmatpush.msra.mxu3 %v3208_v8 }
 0x11b   :  { %806 = vmatpush.msra.mxu0 %v3212_v9  ;;  %826 = vmatpush.msra.mxu1 %v3214_v10 }
 0x11c   :  { %846 = vmatpush.msra.mxu2 %v3218_v11  ;;  %866 = vmatpush.msra.mxu3 %v3220_v12 }
 0x11d   :  { %807 = vmatpush.msra.mxu0 %v3230_v14  ;;  %827 = vmatpush.msra.mxu1 %v3232_v15 }
 0x11e   :  { %847 = vmatpush.msra.mxu2 %v3235_v16  ;;  %867 = vmatpush.msra.mxu3 %v3237_v17 }
 0x11f   :  { %808 = vmatpush.msra.mxu0 %v3239_v18  ;;  %828 = vmatpush.msra.mxu1 %v3241_v19 }
 0x120   :  { %848 = vmatpush.msra.mxu2 %v3245_v20  ;;  %868 = vmatpush.msra.mxu3 %v3247_v21 }
 0x121   :  { %809 = vmatpush.msra.mxu0 %v3251_v22  ;;  %829 = vmatpush.msra.mxu1 %v3253_v23 }
 0x122   :  { %849 = vmatpush.msra.mxu2 %v3257_v24  ;;  %869 = vmatpush.msra.mxu3 %v3259_v25 }
 0x123   :  { %810 = vmatpush.msra.mxu0 %v3269_v27  ;;  %830 = vmatpush.msra.mxu1 %v3271_v28 }
 0x124   :  { %850 = vmatpush.msra.mxu2 %v3274_v29  ;;  %870 = vmatpush.msra.mxu3 %v3276_v30 }
 0x125   :  { %811 = vmatpush.msra.mxu0 %v3278_v31  ;;  %831 = vmatpush.msra.mxu1 %v3280_v32 }
 0x126   :  { %851 = vmatpush.msra.mxu2 %v3284_v33  ;;  %871 = vmatpush.msra.mxu3 %v3286_v34 }
 0x127   :  { %812 = vmatpush.msra.mxu0 %v3290_v35  ;;  %832 = vmatpush.msra.mxu1 %v3292_v36 }
 0x128   :  { %852 = vmatpush.msra.mxu2 %v3296_v37  ;;  %872 = vmatpush.msra.mxu3 %v3298_v38 }
 0x129   :  { %813 = vmatpush.msra.mxu0 %v3308_v40  ;;  %833 = vmatpush.msra.mxu1 %v3310_v41 }
 0x12a   :  { %853 = vmatpush.msra.mxu2 %v3313_v42  ;;  %873 = vmatpush.msra.mxu3 %v3315_v43 }
 0x12b   :  { %814 = vmatpush.msra.mxu0 %v3317_v44  ;;  %834 = vmatpush.msra.mxu1 %v3319_v45 }
 0x12c   :  { %854 = vmatpush.msra.mxu2 %v5402_v55  ;;  %874 = vmatpush.msra.mxu3 %v5403_v58  ;;  %v5429_v58 = vld [vmem:[#allocation43_spill] sm:$0xff] }
 0x12d   :  { %815 = vmatpush.msra.mxu0 %v5404_v60  ;;  %835 = vmatpush.msra.mxu1 %v5405_v26 }
 0x12e   :  { %855 = vmatpush.msra.mxu2 %v5406_v52  ;;  %875 = vmatpush.msra.mxu3 %v5407_v54  ;;  %v5426_v54 = vld [vmem:[#allocation68_spill] sm:$0xff]  ;;  %v5427_v52 = vld [vmem:[#allocation69_spill] sm:$0xff] }
 0x12f   :  { %816 = vmatpush.msra.mxu0 %v5408_v56  ;;  %836 = vmatpush.msra.mxu1 %v5409_v59  ;;  %v5424_v59 = vld [vmem:[#allocation40_spill] sm:$0xff]  ;;  %v5425_v56 = vld [vmem:[#allocation41_spill] sm:$0xff] }
 0x130   :  { %856 = vmatpush.msra.mxu2 %v5410_v61  ;;  %876 = vmatpush.msra.mxu3 %v5411_v62  ;;  %v5421_v61 = vld [vmem:[#allocation37_spill] sm:$0xff]  ;;  %v5422_v62 = vld [vmem:[#allocation38_spill] sm:$0xff] }
 0x131   :  { %817 = vmatpush.msra.mxu0 %v5412_v63  ;;  %837 = vmatpush.msra.mxu1 %v5413_v0  ;;  %v5423_v63 = vld [vmem:[#allocation39_spill] sm:$0xff] }
 0x132   :  { %857 = vmatpush.msra.mxu2 %v5414_v39  ;;  %877 = vmatpush.msra.mxu3 %v5415_v13 }
 0x133   :  { %818 = vmatpush.msra.mxu0 %v5416_v53  ;;  %838 = vmatpush.msra.mxu1 %v5417_v48 }
 0x134   :  { %858 = vmatpush.msra.mxu2 %v5418_v57  ;;  %878 = vmatpush.msra.mxu3 %v5419_v47 }
 0x135   :  { %819 = vmatpush.msra.mxu0 %v5420_v46  ;;  %839 = vmatpush.msra.mxu1 %v5421_v61  ;;  %v5428_v61 = vld [vmem:[#allocation42_spill] sm:$0xff] }
 0x136   :  { %859 = vmatpush.msra.mxu2 %v5422_v62  ;;  %879 = vmatpush.msra.mxu3 %v5423_v63 }
 0x192   :  { %v591_v0 = vpop.f32.mrf.mxu0  ;;  %v611_v39 = vpop.f32.mrf.mxu1 }
 0x193   :  { %v654_v13 = vadd.f32 %v591_v0, %v5424_v59  ;;  %v655_v53 = vadd.f32 %v611_v39, %v5425_v56 }
 0x195   :  { %v658_v48 = vadd.f32 %v654_v13, %v5426_v54  ;;  %v659_v57 = vadd.f32 %v655_v53, %v5427_v52 }
 0x197   :  { %v662_v26 = vmul.f32 0.5, %v658_v48  ;;  %v666_v47 = vmul.f32 0.5, %v659_v57 }
 0x199   :  { %2683 = vtanh.f32 %v662_v26  ;;  %v631_v46 = vpop.f32.mrf.mxu2  ;;  %v651_v60 = vpop.f32.mrf.mxu3 }
 0x19a   :  { %2685 = vtanh.f32 %v666_v47  ;;  %v656_v62 = vadd.f32 %v631_v46, %v5428_v61  ;;  %v657_v63 = vadd.f32 %v651_v60, %v5429_v58 }
 0x19c   :  { %v660_v55 = vadd.f32 %v656_v62, %v3602_v50  ;;  %v661_v59 = vadd.f32 %v657_v63, %v3604_v49 }
 0x19e   :  { %2687 = vtanh.f32 %v660_v55  ;;  %v671_v56 = vmul.f32 0.5, %v661_v59 }
 0x19f   :  { %v2684_v0 = vpop.eup %2683 }
 0x1a0   :  { %v2686_v39 = vpop.eup %2685  ;;  %v664_v13 = vmul.f32 0.5, %v2684_v0  ;;  %2689 = vtanh.f32 %v671_v56 }
 0x1a1   :  { %v668_v53 = vmul.f32 0.5, %v2686_v39 }
 0x1a2   :  { %v665_v48 = vadd.f32 0.5, %v664_v13 }
 0x1a3   :  { %v669_v26 = vadd.f32 0.5, %v668_v53 }
 0x1a4   :  { %v2688_v57 = vpop.eup %2687 }
 0x1a5   :  { %v675_v47 = vmul.f32 %v669_v26, %v3608_v51  ;;  %v676_v52 = vmul.f32 %v2688_v57, %v665_v48 }
 0x1a6   :  { %v2690_v46 = vpop.eup %2689 }
 0x1a7   :  { %v3690_v61 = vadd.f32 %v676_v52, %v675_v47  ;;  %v673_v58 = vmul.f32 0.5, %v2690_v46 }
 0x1a9   :  { %2691 = vtanh.f32 %v3690_v61  ;;  %v674_v60 = vadd.f32 0.5, %v673_v58 }
 0x1af   :  { %v2692_v55 = vpop.eup %2691 }
 0x1b0   :  { %v3693_v62 = vmul.f32 %v2692_v55, %v674_v60  ;;  %v3784_v60 = vld [vmem:[#allocation7 + $0x1e8] sm:$0xff]  ;;  %v3787_v55 = vld [vmem:[#allocation7 + $0x1f0] sm:$0xff] }
 0x1b2   :  { %5430 = vst [vmem:[#allocation40_spill] sm:$0xff] %v3693_v62  ;;  %705 = vmatmul.f32.vlgmr.msrb.gmra.mxu0 %v3693_v62  ;;  %725 = vmatmul.f32.vlgmr.msrb.gmra.mxu1 %v3693_v62 }
 0x1b3   :  { %745 = vmatmul.f32.vlgmr.msrb.gmra.mxu2 %v3693_v62  ;;  %765 = vmatmul.f32.vlgmr.msrb.gmra.mxu3 %v3693_v62  ;;  %v3919_v62 = vld [vmem:[#allocation7 + $0x90] sm:$0xff] }
 0x1b4   :  { %919 = vmatpush.msrb.mxu0 %v3192_v1  ;;  %939 = vmatpush.msrb.mxu1 %v3194_v2  ;;  %v5431_v1 = vld [vmem:[#allocation18_spill] sm:$0xff]  ;;  %v5432_v2 = vld [vmem:[#allocation19_spill] sm:$0xff] }
 0x1b5   :  { %959 = vmatpush.msrb.mxu2 %v3196_v3  ;;  %979 = vmatpush.msrb.mxu3 %v3198_v4  ;;  %v5433_v3 = vld [vmem:[#allocation20_spill] sm:$0xff]  ;;  %v5434_v4 = vld [vmem:[#allocation21_spill] sm:$0xff] }
 0x1b6   :  { %920 = vmatpush.msrb.mxu0 %v3200_v5  ;;  %940 = vmatpush.msrb.mxu1 %v3202_v6  ;;  %v5435_v5 = vld [vmem:[#allocation22_spill] sm:$0xff]  ;;  %v5436_v6 = vld [vmem:[#allocation23_spill] sm:$0xff]  ;;  %5464 = vst [vmem:[#allocation20_spill] sm:$0xff] %v3919_v62 }
 0x1b7   :  { %960 = vmatpush.msrb.mxu2 %v3206_v7  ;;  %980 = vmatpush.msrb.mxu3 %v3208_v8  ;;  %v5437_v7 = vld [vmem:[#allocation24_spill] sm:$0xff]  ;;  %v5438_v8 = vld [vmem:[#allocation25_spill] sm:$0xff] }
 0x1b8   :  { %921 = vmatpush.msrb.mxu0 %v3212_v9  ;;  %941 = vmatpush.msrb.mxu1 %v3214_v10  ;;  %v5439_v9 = vld [vmem:[#allocation26_spill] sm:$0xff]  ;;  %v5440_v10 = vld [vmem:[#allocation27_spill] sm:$0xff] }
 0x1b9   :  { %961 = vmatpush.msrb.mxu2 %v3218_v11  ;;  %981 = vmatpush.msrb.mxu3 %v3220_v12  ;;  %v5441_v11 = vld [vmem:[#allocation28_spill] sm:$0xff]  ;;  %v5442_v12 = vld [vmem:[#allocation29_spill] sm:$0xff] }
 0x1ba   :  { %922 = vmatpush.msrb.mxu0 %v3230_v14  ;;  %942 = vmatpush.msrb.mxu1 %v3232_v15  ;;  %v5443_v14 = vld [vmem:[#allocation30_spill] sm:$0xff]  ;;  %v5444_v15 = vld [vmem:[#allocation31_spill] sm:$0xff] }
 0x1bb   :  { %962 = vmatpush.msrb.mxu2 %v3235_v16  ;;  %982 = vmatpush.msrb.mxu3 %v3237_v17  ;;  %v5445_v16 = vld [vmem:[#allocation32_spill] sm:$0xff]  ;;  %v5446_v17 = vld [vmem:[#allocation33_spill] sm:$0xff] }
 0x1bc   :  { %923 = vmatpush.msrb.mxu0 %v3239_v18  ;;  %943 = vmatpush.msrb.mxu1 %v3241_v19  ;;  %v5447_v18 = vld [vmem:[#allocation34_spill] sm:$0xff]  ;;  %v5448_v19 = vld [vmem:[#allocation35_spill] sm:$0xff] }
 0x1bd   :  { %963 = vmatpush.msrb.mxu2 %v3245_v20  ;;  %983 = vmatpush.msrb.mxu3 %v3247_v21  ;;  %v5449_v20 = vld [vmem:[#allocation36_spill] sm:$0xff]  ;;  %v5450_v21 = vld [vmem:[#allocation37_spill] sm:$0xff] }
 0x1be   :  { %924 = vmatpush.msrb.mxu0 %v3251_v22  ;;  %944 = vmatpush.msrb.mxu1 %v3253_v23  ;;  %v5451_v22 = vld [vmem:[#allocation38_spill] sm:$0xff]  ;;  %v5452_v23 = vld [vmem:[#allocation39_spill] sm:$0xff] }
 0x1bf   :  { %964 = vmatpush.msrb.mxu2 %v3257_v24  ;;  %984 = vmatpush.msrb.mxu3 %v3259_v25 }
 0x1c0   :  { %925 = vmatpush.msrb.mxu0 %v3269_v27  ;;  %945 = vmatpush.msrb.mxu1 %v3271_v28  ;;  %v5453_v27 = vld [vmem:[#allocation44_spill] sm:$0xff] }
 0x1c1   :  { %965 = vmatpush.msrb.mxu2 %v3274_v29  ;;  %985 = vmatpush.msrb.mxu3 %v3276_v30  ;;  %v5454_v29 = vld [vmem:[#allocation45_spill] sm:$0xff] }
 0x1c2   :  { %926 = vmatpush.msrb.mxu0 %v3278_v31  ;;  %946 = vmatpush.msrb.mxu1 %v3280_v32  ;;  %v5455_v32 = vld [vmem:[#allocation69_spill] sm:$0xff] }
 0x1c3   :  { %966 = vmatpush.msrb.mxu2 %v3284_v33  ;;  %986 = vmatpush.msrb.mxu3 %v3286_v34 }
 0x1c4   :  { %927 = vmatpush.msrb.mxu0 %v3290_v35  ;;  %947 = vmatpush.msrb.mxu1 %v3292_v36 }
 0x1c5   :  { %967 = vmatpush.msrb.mxu2 %v3296_v37  ;;  %987 = vmatpush.msrb.mxu3 %v3298_v38  ;;  %v5456_v38 = vld [vmem:[#allocation46_spill] sm:$0xff] }
 0x1c6   :  { %928 = vmatpush.msrb.mxu0 %v3308_v40  ;;  %948 = vmatpush.msrb.mxu1 %v3310_v41  ;;  %v5457_v41 = vld [vmem:[#allocation47_spill] sm:$0xff] }
 0x1c7   :  { %968 = vmatpush.msrb.mxu2 %v3313_v42  ;;  %988 = vmatpush.msrb.mxu3 %v3315_v43 }
 0x1c8   :  { %929 = vmatpush.msrb.mxu0 %v3317_v44  ;;  %949 = vmatpush.msrb.mxu1 %v3319_v45 }
 0x1c9   :  { %969 = vmatpush.msrb.mxu2 %v5431_v1  ;;  %989 = vmatpush.msrb.mxu3 %v5432_v2  ;;  %v3790_v1 = vld [vmem:[#allocation7 + $0x1f8] sm:$0xff]  ;;  %v3793_v2 = vld [vmem:[#allocation7 + $0x1c0] sm:$0xff] }
 0x1ca   :  { %930 = vmatpush.msrb.mxu0 %v5433_v3  ;;  %950 = vmatpush.msrb.mxu1 %v5434_v4  ;;  %v3796_v3 = vld [vmem:[#allocation7 + $0x1c8] sm:$0xff]  ;;  %v3799_v4 = vld [vmem:[#allocation7 + $0x1d0] sm:$0xff] }
 0x1cb   :  { %970 = vmatpush.msrb.mxu2 %v5435_v5  ;;  %990 = vmatpush.msrb.mxu3 %v5436_v6  ;;  %v3802_v5 = vld [vmem:[#allocation7 + $0x1d8] sm:$0xff]  ;;  %v3805_v6 = vld [vmem:[#allocation7 + $0x1a0] sm:$0xff] }
 0x1cc   :  { %931 = vmatpush.msrb.mxu0 %v5437_v7  ;;  %951 = vmatpush.msrb.mxu1 %v5438_v8  ;;  %v3808_v7 = vld [vmem:[#allocation7 + $0x1a8] sm:$0xff]  ;;  %v3811_v8 = vld [vmem:[#allocation7 + $0x1b0] sm:$0xff] }
 0x1cd   :  { %971 = vmatpush.msrb.mxu2 %v5439_v9  ;;  %991 = vmatpush.msrb.mxu3 %v5440_v10  ;;  %v3814_v9 = vld [vmem:[#allocation7 + $0x1b8] sm:$0xff]  ;;  %v3817_v10 = vld [vmem:[#allocation7 + $0x180] sm:$0xff] }
 0x1ce   :  { %932 = vmatpush.msrb.mxu0 %v5441_v11  ;;  %952 = vmatpush.msrb.mxu1 %v5442_v12 }
 0x1cf   :  { %972 = vmatpush.msrb.mxu2 %v5443_v14  ;;  %992 = vmatpush.msrb.mxu3 %v5444_v15 }
 0x1d0   :  { %933 = vmatpush.msrb.mxu0 %v5445_v16  ;;  %953 = vmatpush.msrb.mxu1 %v5446_v17 }
 0x1d1   :  { %973 = vmatpush.msrb.mxu2 %v5447_v18  ;;  %993 = vmatpush.msrb.mxu3 %v5448_v19 }
 0x1d2   :  { %934 = vmatpush.msrb.mxu0 %v5449_v20  ;;  %954 = vmatpush.msrb.mxu1 %v5450_v21 }
 0x1d3   :  { %974 = vmatpush.msrb.mxu2 %v5451_v22  ;;  %994 = vmatpush.msrb.mxu3 %v5452_v23 }
 0x22f   :  { %v706_v24 = vpop.f32.mrf.mxu0  ;;  %v726_v25 = vpop.f32.mrf.mxu1 }
 0x230   :  { %v769_v28 = vadd.f32 %v706_v24, %v5453_v27  ;;  %v770_v30 = vadd.f32 %v726_v25, %v5454_v29  ;;  %v3820_v24 = vld [vmem:[#allocation7 + $0x188] sm:$0xff]  ;;  %v3823_v25 = vld [vmem:[#allocation7 + $0x190] sm:$0xff]  ;;  %v3826_v27 = vld [vmem:[#allocation7 + $0x198] sm:$0xff] }
 0x231   :  { %v3832_v29 = vld [vmem:[#allocation7 + $0x168] sm:$0xff] }
 0x232   :  { %v773_v31 = vadd.f32 %v769_v28, %v5426_v54  ;;  %v774_v33 = vadd.f32 %v770_v30, %v5455_v32  ;;  %v3829_v28 = vld [vmem:[#allocation7 + $0x160] sm:$0xff]  ;;  %v3835_v30 = vld [vmem:[#allocation7 + $0x170] sm:$0xff] }
 0x234   :  { %v777_v34 = vmul.f32 0.5, %v773_v31  ;;  %v781_v35 = vmul.f32 0.5, %v774_v33  ;;  %v3838_v31 = vld [vmem:[#allocation7 + $0x178] sm:$0xff]  ;;  %v3841_v33 = vld [vmem:[#allocation7 + $0x140] sm:$0xff] }
 0x236   :  { %2693 = vtanh.f32 %v777_v34  ;;  %v746_v36 = vpop.f32.mrf.mxu2  ;;  %v766_v37 = vpop.f32.mrf.mxu3  ;;  %v3844_v34 = vld [vmem:[#allocation7 + $0x148] sm:$0xff] }
 0x237   :  { %2695 = vtanh.f32 %v781_v35  ;;  %v771_v40 = vadd.f32 %v746_v36, %v5456_v38  ;;  %v772_v42 = vadd.f32 %v766_v37, %v5457_v41  ;;  %v3847_v35 = vld [vmem:[#allocation7 + $0x150] sm:$0xff]  ;;  %v3850_v36 = vld [vmem:[#allocation7 + $0x158] sm:$0xff]  ;;  %v3853_v37 = vld [vmem:[#allocation7 + $0x120] sm:$0xff] }
 0x238   :  { %v3856_v38 = vld [vmem:[#allocation7 + $0x128] sm:$0xff]  ;;  %v3862_v41 = vld [vmem:[#allocation7 + $0x138] sm:$0xff] }
 0x239   :  { %v775_v43 = vadd.f32 %v771_v40, %v3602_v50  ;;  %v776_v44 = vadd.f32 %v772_v42, %v3604_v49  ;;  %v3859_v40 = vld [vmem:[#allocation7 + $0x130] sm:$0xff]  ;;  %v3865_v42 = vld [vmem:[#allocation7 + $0x100] sm:$0xff] }
 0x23b   :  { %2697 = vtanh.f32 %v775_v43  ;;  %v786_v45 = vmul.f32 0.5, %v776_v44  ;;  %v3868_v43 = vld [vmem:[#allocation7 + $0x108] sm:$0xff]  ;;  %v3871_v44 = vld [vmem:[#allocation7 + $0x110] sm:$0xff] }
 0x23c   :  { %v2694_v51 = vpop.eup %2693 }
 0x23d   :  { %v2696_v52 = vpop.eup %2695  ;;  %v779_v63 = vmul.f32 0.5, %v2694_v51  ;;  %2699 = vtanh.f32 %v786_v45  ;;  %v3874_v45 = vld [vmem:[#allocation7 + $0x118] sm:$0xff]  ;;  %v3877_v51 = vld [vmem:[#allocation7 + $0xe0] sm:$0xff] }
 0x23e   :  { %v783_v59 = vmul.f32 0.5, %v2696_v52  ;;  %v3880_v52 = vld [vmem:[#allocation7 + $0xe8] sm:$0xff] }
 0x23f   :  { %v780_v56 = vadd.f32 0.5, %v779_v63  ;;  %v3883_v63 = vld [vmem:[#allocation7 + $0xf0] sm:$0xff] }
 0x240   :  { %v784_v0 = vadd.f32 0.5, %v783_v59  ;;  %v3886_v59 = vld [vmem:[#allocation7 + $0xf8] sm:$0xff] }
 0x241   :  { %v2698_v39 = vpop.eup %2697 }
 0x242   :  { %v790_v13 = vmul.f32 %v784_v0, %v3690_v61  ;;  %v791_v53 = vmul.f32 %v2698_v39, %v780_v56  ;;  %v3781_v61 = vld [vmem:[#allocation7 + $0x1e0] sm:$0xff]  ;;  %v3892_v0 = vld [vmem:[#allocation7 + $0xc8] sm:$0xff]  ;;  %v3895_v39 = vld [vmem:[#allocation7 + $0xd0] sm:$0xff] }
 0x243   :  { %v2700_v48 = vpop.eup %2699  ;;  %v3889_v56 = vld [vmem:[#allocation7 + $0xc0] sm:$0xff] }
 0x244   :  { %v3772_v26 = vadd.f32 %v791_v53, %v790_v13  ;;  %v788_v57 = vmul.f32 0.5, %v2700_v48  ;;  %v3898_v13 = vld [vmem:[#allocation7 + $0xd8] sm:$0xff]  ;;  %v3901_v53 = vld [vmem:[#allocation7 + $0xa0] sm:$0xff]  ;;  %v3904_v48 = vld [vmem:[#allocation7 + $0xa8] sm:$0xff] }
 0x245   :  { %5459 = vst [vmem:[#allocation68_spill] sm:$0xff] %v3904_v48 }
 0x246   :  { %2701 = vtanh.f32 %v3772_v26  ;;  %v789_v47 = vadd.f32 0.5, %v788_v57  ;;  %v3907_v57 = vld [vmem:[#allocation7 + $0xb0] sm:$0xff] }
 0x247   :  { %5460 = vst [vmem:[#allocation42_spill] sm:$0xff] %v3907_v57 }
 0x24c   :  { %v2702_v46 = vpop.eup %2701 }
 0x24d   :  { %v3775_v58 = vmul.f32 %v2702_v46, %v789_v47  ;;  %v3910_v47 = vld [vmem:[#allocation7 + $0xb8] sm:$0xff]  ;;  %v3913_v46 = vld [vmem:[#allocation7 + $0x80] sm:$0xff] }
 0x24e   :  { %5461 = vst [vmem:[#allocation43_spill] sm:$0xff] %v3910_v47 }
 0x24f   :  { %5458 = vst [vmem:[#allocation41_spill] sm:$0xff] %v3775_v58  ;;  %820 = vmatmul.f32.vlgmr.msra.gmra.mxu0 %v3775_v58  ;;  %840 = vmatmul.f32.vlgmr.msra.gmra.mxu1 %v3775_v58 }
 0x250   :  { %860 = vmatmul.f32.vlgmr.msra.gmra.mxu2 %v3775_v58  ;;  %880 = vmatmul.f32.vlgmr.msra.gmra.mxu3 %v3775_v58  ;;  %5462 = vst [vmem:[#allocation18_spill] sm:$0xff] %v3913_v46  ;;  %v3916_v58 = vld [vmem:[#allocation7 + $0x88] sm:$0xff] }
 0x251   :  { %1034 = vmatpush.msra.mxu0 %v3781_v61  ;;  %1054 = vmatpush.msra.mxu1 %v3784_v60  ;;  %5463 = vst [vmem:[#allocation19_spill] sm:$0xff] %v3916_v58 }
 0x252   :  { %1074 = vmatpush.msra.mxu2 %v3787_v55  ;;  %1094 = vmatpush.msra.mxu3 %v3790_v1 }
 0x253   :  { %1035 = vmatpush.msra.mxu0 %v3793_v2  ;;  %1055 = vmatpush.msra.mxu1 %v3796_v3 }
 0x254   :  { %1075 = vmatpush.msra.mxu2 %v3799_v4  ;;  %1095 = vmatpush.msra.mxu3 %v3802_v5 }
 0x255   :  { %1036 = vmatpush.msra.mxu0 %v3805_v6  ;;  %1056 = vmatpush.msra.mxu1 %v3808_v7 }
 0x256   :  { %1076 = vmatpush.msra.mxu2 %v3811_v8  ;;  %1096 = vmatpush.msra.mxu3 %v3814_v9 }
 0x257   :  { %1037 = vmatpush.msra.mxu0 %v3817_v10  ;;  %1057 = vmatpush.msra.mxu1 %v3820_v24 }
 0x258   :  { %1077 = vmatpush.msra.mxu2 %v3823_v25  ;;  %1097 = vmatpush.msra.mxu3 %v3826_v27 }
 0x259   :  { %1038 = vmatpush.msra.mxu0 %v3829_v28  ;;  %1058 = vmatpush.msra.mxu1 %v3832_v29 }
 0x25a   :  { %1078 = vmatpush.msra.mxu2 %v3835_v30  ;;  %1098 = vmatpush.msra.mxu3 %v3838_v31 }
 0x25b   :  { %1039 = vmatpush.msra.mxu0 %v3841_v33  ;;  %1059 = vmatpush.msra.mxu1 %v3844_v34 }
 0x25c   :  { %1079 = vmatpush.msra.mxu2 %v3847_v35  ;;  %1099 = vmatpush.msra.mxu3 %v3850_v36 }
 0x25d   :  { %1040 = vmatpush.msra.mxu0 %v3853_v37  ;;  %1060 = vmatpush.msra.mxu1 %v3856_v38 }
 0x25e   :  { %1080 = vmatpush.msra.mxu2 %v3859_v40  ;;  %1100 = vmatpush.msra.mxu3 %v3862_v41 }
 0x25f   :  { %1041 = vmatpush.msra.mxu0 %v3865_v42  ;;  %1061 = vmatpush.msra.mxu1 %v3868_v43 }
 0x260   :  { %1081 = vmatpush.msra.mxu2 %v3871_v44  ;;  %1101 = vmatpush.msra.mxu3 %v3874_v45 }
 0x261   :  { %1042 = vmatpush.msra.mxu0 %v3877_v51  ;;  %1062 = vmatpush.msra.mxu1 %v3880_v52 }
 0x262   :  { %1082 = vmatpush.msra.mxu2 %v3883_v63  ;;  %1102 = vmatpush.msra.mxu3 %v3886_v59 }
 0x263   :  { %1043 = vmatpush.msra.mxu0 %v3889_v56  ;;  %1063 = vmatpush.msra.mxu1 %v3892_v0 }
 0x264   :  { %1083 = vmatpush.msra.mxu2 %v3895_v39  ;;  %1103 = vmatpush.msra.mxu3 %v3898_v13 }
 0x265   :  { %1044 = vmatpush.msra.mxu0 %v3901_v53  ;;  %1064 = vmatpush.msra.mxu1 %v3904_v48  ;;  %v3922_v48 = vld [vmem:[#allocation7 + $0x98] sm:$0xff] }
 0x266   :  { %1084 = vmatpush.msra.mxu2 %v3907_v57  ;;  %1104 = vmatpush.msra.mxu3 %v3910_v47  ;;  %5465 = vst [vmem:[#allocation21_spill] sm:$0xff] %v3922_v48  ;;  %v3925_v57 = vld [vmem:[#allocation7 + $0x60] sm:$0xff]  ;;  %v3928_v47 = vld [vmem:[#allocation7 + $0x68] sm:$0xff] }
 0x267   :  { %1045 = vmatpush.msra.mxu0 %v3913_v46  ;;  %1065 = vmatpush.msra.mxu1 %v3916_v58  ;;  %5466 = vst [vmem:[#allocation22_spill] sm:$0xff] %v3925_v57  ;;  %v3931_v46 = vld [vmem:[#allocation7 + $0x70] sm:$0xff]  ;;  %v3934_v58 = vld [vmem:[#allocation7 + $0x78] sm:$0xff] }
 0x268   :  { %1085 = vmatpush.msra.mxu2 %v3919_v62  ;;  %1105 = vmatpush.msra.mxu3 %v3922_v48  ;;  %5467 = vst [vmem:[#allocation23_spill] sm:$0xff] %v3928_v47 }
 0x269   :  { %1046 = vmatpush.msra.mxu0 %v3925_v57  ;;  %1066 = vmatpush.msra.mxu1 %v3928_v47  ;;  %5468 = vst [vmem:[#allocation24_spill] sm:$0xff] %v3931_v46  ;;  %v5473_v57 = vld [vmem:[#allocation51_spill] sm:$0xff] }
 0x26a   :  { %1086 = vmatpush.msra.mxu2 %v3931_v46  ;;  %5469 = vst [vmem:[#allocation25_spill] sm:$0xff] %v3934_v58  ;;  %1106 = vmatpush.msra.mxu3 %v3934_v58  ;;  %v5471_v58 = vld [vmem:[#allocation49_spill] sm:$0xff] }
 0x26b   :  { %1047 = vmatpush.msra.mxu0 %v5441_v11  ;;  %1067 = vmatpush.msra.mxu1 %v5442_v12 }
 0x26c   :  { %1087 = vmatpush.msra.mxu2 %v5443_v14  ;;  %1107 = vmatpush.msra.mxu3 %v5444_v15  ;;  %v5470_v14 = vld [vmem:[#allocation48_spill] sm:$0xff] }
 0x26d   :  { %1048 = vmatpush.msra.mxu0 %v5445_v16  ;;  %1068 = vmatpush.msra.mxu1 %v5446_v17 }
 0x26e   :  { %1088 = vmatpush.msra.mxu2 %v5447_v18  ;;  %1108 = vmatpush.msra.mxu3 %v5448_v19 }
 0x26f   :  { %1049 = vmatpush.msra.mxu0 %v5449_v20  ;;  %1069 = vmatpush.msra.mxu1 %v5450_v21  ;;  %v5472_v21 = vld [vmem:[#allocation50_spill] sm:$0xff] }
 0x270   :  { %1089 = vmatpush.msra.mxu2 %v5451_v22  ;;  %1109 = vmatpush.msra.mxu3 %v5452_v23 }
 0x2cc   :  { %v821_v11 = vpop.f32.mrf.mxu0  ;;  %v841_v12 = vpop.f32.mrf.mxu1 }
 0x2cd   :  { %v884_v15 = vadd.f32 %v821_v11, %v5470_v14  ;;  %v885_v16 = vadd.f32 %v841_v12, %v5471_v58 }
 0x2cf   :  { %v888_v17 = vadd.f32 %v884_v15, %v5426_v54  ;;  %v889_v18 = vadd.f32 %v885_v16, %v5455_v32 }
 0x2d1   :  { %v892_v46 = vmul.f32 0.5, %v888_v17  ;;  %v896_v19 = vmul.f32 0.5, %v889_v18 }
 0x2d3   :  { %2703 = vtanh.f32 %v892_v46  ;;  %v861_v20 = vpop.f32.mrf.mxu2  ;;  %v881_v47 = vpop.f32.mrf.mxu3 }
 0x2d4   :  { %2705 = vtanh.f32 %v896_v19  ;;  %v886_v22 = vadd.f32 %v861_v20, %v5472_v21  ;;  %v887_v23 = vadd.f32 %v881_v47, %v5473_v57 }
 0x2d6   :  { %v890_v48 = vadd.f32 %v886_v22, %v3602_v50  ;;  %v891_v11 = vadd.f32 %v887_v23, %v3604_v49  ;;  %v5477_v23 = vld [vmem:[#allocation43_spill] sm:$0xff] }
 0x2d8   :  { %2707 = vtanh.f32 %v890_v48  ;;  %v901_v58 = vmul.f32 0.5, %v891_v11  ;;  %v5478_v11 = vld [vmem:[#allocation18_spill] sm:$0xff] }
 0x2d9   :  { %v2704_v12 = vpop.eup %2703 }
 0x2da   :  { %v2706_v14 = vpop.eup %2705  ;;  %v894_v15 = vmul.f32 0.5, %v2704_v12  ;;  %2709 = vtanh.f32 %v901_v58  ;;  %v5479_v58 = vld [vmem:[#allocation19_spill] sm:$0xff]  ;;  %v5480_v12 = vld [vmem:[#allocation21_spill] sm:$0xff] }
 0x2db   :  { %v898_v16 = vmul.f32 0.5, %v2706_v14  ;;  %v5481_v14 = vld [vmem:[#allocation22_spill] sm:$0xff] }
 0x2dc   :  { %v895_v17 = vadd.f32 0.5, %v894_v15  ;;  %v5482_v15 = vld [vmem:[#allocation23_spill] sm:$0xff] }
 0x2dd   :  { %v899_v46 = vadd.f32 0.5, %v898_v16  ;;  %v5483_v16 = vld [vmem:[#allocation24_spill] sm:$0xff] }
 0x2de   :  { %v2708_v18 = vpop.eup %2707 }
 0x2df   :  { %v905_v19 = vmul.f32 %v899_v46, %v3772_v26  ;;  %v906_v32 = vmul.f32 %v2708_v18, %v895_v17  ;;  %v5476_v26 = vld [vmem:[#allocation42_spill] sm:$0xff]  ;;  %v5484_v17 = vld [vmem:[#allocation25_spill] sm:$0xff] }
 0x2e0   :  { %v2710_v20 = vpop.eup %2709  ;;  %v4019_v46 = vld [vmem:[#allocation7 + $0x40] sm:$0xff]  ;;  %v4022_v18 = vld [vmem:[#allocation7 + $0x48] sm:$0xff] }
 0x2e1   :  { %v3958_v21 = vadd.f32 %v906_v32, %v905_v19  ;;  %v903_v57 = vmul.f32 0.5, %v2710_v20  ;;  %v5475_v32 = vld [vmem:[#allocation68_spill] sm:$0xff]  ;;  %5485 = vst [vmem:[#allocation27_spill] sm:$0xff] %v4019_v46  ;;  %v4025_v19 = vld [vmem:[#allocation7 + $0x50] sm:$0xff] }
 0x2e2   :  { %5486 = vst [vmem:[#allocation28_spill] sm:$0xff] %v4022_v18  ;;  %v4028_v20 = vld [vmem:[#allocation7 + $0x58] sm:$0xff] }
 0x2e3   :  { %2711 = vtanh.f32 %v3958_v21  ;;  %v904_v47 = vadd.f32 0.5, %v903_v57  ;;  %5487 = vst [vmem:[#allocation29_spill] sm:$0xff] %v4025_v19  ;;  %v4031_v57 = vld [vmem:[#allocation7 + $0x20] sm:$0xff] }
 0x2e4   :  { %5488 = vst [vmem:[#allocation30_spill] sm:$0xff] %v4028_v20 }
 0x2e5   :  { %5489 = vst [vmem:[#allocation31_spill] sm:$0xff] %v4031_v57 }
 0x2e9   :  { %v2712_v48 = vpop.eup %2711 }
 0x2ea   :  { %v3961_v22 = vmul.f32 %v2712_v48, %v904_v47  ;;  %v4034_v47 = vld [vmem:[#allocation7 + $0x28] sm:$0xff]  ;;  %v4037_v48 = vld [vmem:[#allocation7 + $0x30] sm:$0xff] }
 0x2eb   :  { %5490 = vst [vmem:[#allocation32_spill] sm:$0xff] %v4034_v47 }
 0x2ec   :  { %5474 = vst [vmem:[#allocation26_spill] sm:$0xff] %v3961_v22  ;;  %935 = vmatmul.f32.vlgmr.msrb.gmra.mxu0 %v3961_v22  ;;  %955 = vmatmul.f32.vlgmr.msrb.gmra.mxu1 %v3961_v22 }
 0x2ed   :  { %975 = vmatmul.f32.vlgmr.msrb.gmra.mxu2 %v3961_v22  ;;  %995 = vmatmul.f32.vlgmr.msrb.gmra.mxu3 %v3961_v22  ;;  %5491 = vst [vmem:[#allocation33_spill] sm:$0xff] %v4037_v48  ;;  %v4040_v22 = vld [vmem:[#allocation7 + $0x38] sm:$0xff] }
 0x2ee   :  { %1149 = vmatpush.msrb.mxu0 %v3781_v61  ;;  %1169 = vmatpush.msrb.mxu1 %v3784_v60  ;;  %5492 = vst [vmem:[#allocation34_spill] sm:$0xff] %v4040_v22 }
 0x2ef   :  { %1189 = vmatpush.msrb.mxu2 %v3787_v55  ;;  %1209 = vmatpush.msrb.mxu3 %v3790_v1 }
 0x2f0   :  { %1150 = vmatpush.msrb.mxu0 %v3793_v2  ;;  %1170 = vmatpush.msrb.mxu1 %v3796_v3 }
 0x2f1   :  { %1190 = vmatpush.msrb.mxu2 %v3799_v4  ;;  %1210 = vmatpush.msrb.mxu3 %v3802_v5 }
 0x2f2   :  { %1151 = vmatpush.msrb.mxu0 %v3805_v6  ;;  %1171 = vmatpush.msrb.mxu1 %v3808_v7 }
 0x2f3   :  { %1191 = vmatpush.msrb.mxu2 %v3811_v8  ;;  %1211 = vmatpush.msrb.mxu3 %v3814_v9 }
 0x2f4   :  { %1152 = vmatpush.msrb.mxu0 %v3817_v10  ;;  %1172 = vmatpush.msrb.mxu1 %v3820_v24 }
 0x2f5   :  { %1192 = vmatpush.msrb.mxu2 %v3823_v25  ;;  %1212 = vmatpush.msrb.mxu3 %v3826_v27 }
 0x2f6   :  { %1153 = vmatpush.msrb.mxu0 %v3829_v28  ;;  %1173 = vmatpush.msrb.mxu1 %v3832_v29 }
 0x2f7   :  { %1193 = vmatpush.msrb.mxu2 %v3835_v30  ;;  %1213 = vmatpush.msrb.mxu3 %v3838_v31 }
 0x2f8   :  { %1154 = vmatpush.msrb.mxu0 %v3841_v33  ;;  %1174 = vmatpush.msrb.mxu1 %v3844_v34 }
 0x2f9   :  { %1194 = vmatpush.msrb.mxu2 %v3847_v35  ;;  %1214 = vmatpush.msrb.mxu3 %v3850_v36 }
 0x2fa   :  { %1155 = vmatpush.msrb.mxu0 %v3853_v37  ;;  %1175 = vmatpush.msrb.mxu1 %v3856_v38 }
 0x2fb   :  { %1195 = vmatpush.msrb.mxu2 %v3859_v40  ;;  %1215 = vmatpush.msrb.mxu3 %v3862_v41 }
 0x2fc   :  { %1156 = vmatpush.msrb.mxu0 %v3865_v42  ;;  %1176 = vmatpush.msrb.mxu1 %v3868_v43 }
 0x2fd   :  { %1196 = vmatpush.msrb.mxu2 %v3871_v44  ;;  %1216 = vmatpush.msrb.mxu3 %v3874_v45 }
 0x2fe   :  { %1157 = vmatpush.msrb.mxu0 %v3877_v51  ;;  %1177 = vmatpush.msrb.mxu1 %v3880_v52 }
 0x2ff   :  { %1197 = vmatpush.msrb.mxu2 %v3883_v63  ;;  %1217 = vmatpush.msrb.mxu3 %v3886_v59 }
 0x300   :  { %1158 = vmatpush.msrb.mxu0 %v3889_v56  ;;  %1178 = vmatpush.msrb.mxu1 %v3892_v0 }
 0x301   :  { %1198 = vmatpush.msrb.mxu2 %v3895_v39  ;;  %1218 = vmatpush.msrb.mxu3 %v3898_v13 }
 0x302   :  { %1159 = vmatpush.msrb.mxu0 %v3901_v53  ;;  %1179 = vmatpush.msrb.mxu1 %v5475_v32 }
 0x303   :  { %1199 = vmatpush.msrb.mxu2 %v5476_v26  ;;  %1219 = vmatpush.msrb.mxu3 %v5477_v23  ;;  %v5501_v23 = vld [vmem:[#allocation55_spill] sm:$0xff] }
 0x304   :  { %1160 = vmatpush.msrb.mxu0 %v5478_v11  ;;  %1180 = vmatpush.msrb.mxu1 %v5479_v58 }
 0x305   :  { %1200 = vmatpush.msrb.mxu2 %v3919_v62  ;;  %1220 = vmatpush.msrb.mxu3 %v5480_v12 }
 0x306   :  { %1161 = vmatpush.msrb.mxu0 %v5481_v14  ;;  %1181 = vmatpush.msrb.mxu1 %v5482_v15  ;;  %v5499_v15 = vld [vmem:[#allocation69_spill] sm:$0xff] }
 0x307   :  { %1201 = vmatpush.msrb.mxu2 %v5483_v16  ;;  %1221 = vmatpush.msrb.mxu3 %v5484_v17  ;;  %v5498_v17 = vld [vmem:[#allocation53_spill] sm:$0xff] }
 0x308   :  { %1162 = vmatpush.msrb.mxu0 %v4019_v46  ;;  %1182 = vmatpush.msrb.mxu1 %v4022_v18  ;;  %v5497_v46 = vld [vmem:[#allocation52_spill] sm:$0xff] }
 0x309   :  { %1202 = vmatpush.msrb.mxu2 %v4025_v19  ;;  %1222 = vmatpush.msrb.mxu3 %v4028_v20  ;;  %v4043_v19 = vld [vmem:[#allocation7] sm:$0xff]  ;;  %v4046_v20 = vld [vmem:[#allocation7 + $0x8] sm:$0xff] }
 0x30a   :  { %1163 = vmatpush.msrb.mxu0 %v4031_v57  ;;  %1183 = vmatpush.msrb.mxu1 %v4034_v47  ;;  %5493 = vst [vmem:[#allocation35_spill] sm:$0xff] %v4043_v19  ;;  %v4049_v57 = vld [vmem:[#allocation7 + $0x10] sm:$0xff]  ;;  %v4052_v47 = vld [vmem:[#allocation7 + $0x18] sm:$0xff] }
 0x30b   :  { %1203 = vmatpush.msrb.mxu2 %v4037_v48  ;;  %1223 = vmatpush.msrb.mxu3 %v4040_v22  ;;  %5494 = vst [vmem:[#allocation36_spill] sm:$0xff] %v4046_v20 }
 0x30c   :  { %1164 = vmatpush.msrb.mxu0 %v4043_v19  ;;  %1184 = vmatpush.msrb.mxu1 %v4046_v20  ;;  %5495 = vst [vmem:[#allocation37_spill] sm:$0xff] %v4049_v57 }
 0x30d   :  { %1204 = vmatpush.msrb.mxu2 %v4049_v57  ;;  %5496 = vst [vmem:[#allocation38_spill] sm:$0xff] %v4052_v47  ;;  %1224 = vmatpush.msrb.mxu3 %v4052_v47  ;;  %v5500_v57 = vld [vmem:[#allocation54_spill] sm:$0xff] }
 0x369   :  { %v936_v48 = vpop.f32.mrf.mxu0  ;;  %v956_v18 = vpop.f32.mrf.mxu1 }
 0x36a   :  { %v999_v22 = vadd.f32 %v936_v48, %v5497_v46  ;;  %v1000_v16 = vadd.f32 %v956_v18, %v5498_v17 }
 0x36c   :  { %v1003_v19 = vadd.f32 %v999_v22, %v5426_v54  ;;  %v1004_v14 = vadd.f32 %v1000_v16, %v5499_v15 }
 0x36e   :  { %v1007_v12 = vmul.f32 0.5, %v1003_v19  ;;  %v1011_v20 = vmul.f32 0.5, %v1004_v14 }
 0x370   :  { %2713 = vtanh.f32 %v1007_v12  ;;  %v976_v62 = vpop.f32.mrf.mxu2  ;;  %v996_v58 = vpop.f32.mrf.mxu3 }
 0x371   :  { %2715 = vtanh.f32 %v1011_v20  ;;  %v1001_v11 = vadd.f32 %v976_v62, %v5500_v57  ;;  %v1002_v47 = vadd.f32 %v996_v58, %v5501_v23 }
 0x373   :  { %v1005_v26 = vadd.f32 %v1001_v11, %v3602_v50  ;;  %v1006_v46 = vadd.f32 %v1002_v47, %v3604_v49 }
 0x375   :  { %2717 = vtanh.f32 %v1005_v26  ;;  %v1016_v17 = vmul.f32 0.5, %v1006_v46 }
 0x376   :  { %v2714_v18 = vpop.eup %2713 }
 0x377   :  { %v2716_v22 = vpop.eup %2715  ;;  %v1009_v48 = vmul.f32 0.5, %v2714_v18  ;;  %2719 = vtanh.f32 %v1016_v17 }
 0x378   :  { %v1013_v16 = vmul.f32 0.5, %v2716_v22 }
 0x379   :  { %v1010_v14 = vadd.f32 0.5, %v1009_v48 }
 0x37a   :  { %v1014_v12 = vadd.f32 0.5, %v1013_v16 }
 0x37b   :  { %v2718_v19 = vpop.eup %2717 }
 0x37c   :  { %v1020_v20 = vmul.f32 %v1014_v12, %v3958_v21  ;;  %v1021_v15 = vmul.f32 %v2718_v19, %v1010_v14 }
 0x37d   :  { %v2720_v62 = vpop.eup %2719 }
 0x37e   :  { %v4064_v57 = vadd.f32 %v1021_v15, %v1020_v20  ;;  %v1018_v23 = vmul.f32 0.5, %v2720_v62 }
 0x380   :  { %2721 = vtanh.f32 %v4064_v57  ;;  %v1019_v11 = vadd.f32 0.5, %v1018_v23 }
 0x386   :  { %v2722_v26 = vpop.eup %2721 }
 0x387   :  { %v4067_v58 = vmul.f32 %v2722_v26, %v1019_v11  ;;  %v1441_v11 = vld [vmem:[#allocation9 + $0x1e8] sm:$0xff]  ;;  %v1442_v26 = vld [vmem:[#allocation9 + $0x1f0] sm:$0xff] }
 0x389   :  { %1050 = vmatmul.f32.vlgmr.msra.gmra.mxu0 %v4067_v58  ;;  %1070 = vmatmul.f32.vlgmr.msra.gmra.mxu1 %v4067_v58 }
 0x38a   :  { %1090 = vmatmul.f32.vlgmr.msra.gmra.mxu2 %v4067_v58  ;;  %1110 = vmatmul.f32.vlgmr.msra.gmra.mxu3 %v4067_v58 }
 0x38b   :  { %1264 = vmatpush.msra.mxu0 %v3781_v61  ;;  %1284 = vmatpush.msra.mxu1 %v3784_v60  ;;  %v5502_v61 = vld [vmem:[#allocation42_spill] sm:$0xff]  ;;  %v5503_v60 = vld [vmem:[#allocation43_spill] sm:$0xff] }
 0x38c   :  { %1304 = vmatpush.msra.mxu2 %v3787_v55  ;;  %1324 = vmatpush.msra.mxu3 %v3790_v1  ;;  %v5504_v55 = vld [vmem:[#allocation18_spill] sm:$0xff]  ;;  %v5505_v1 = vld [vmem:[#allocation19_spill] sm:$0xff] }
 0x38d   :  { %1265 = vmatpush.msra.mxu0 %v3793_v2  ;;  %1285 = vmatpush.msra.mxu1 %v3796_v3  ;;  %v5506_v2 = vld [vmem:[#allocation20_spill] sm:$0xff]  ;;  %v5507_v3 = vld [vmem:[#allocation21_spill] sm:$0xff] }
 0x38e   :  { %1305 = vmatpush.msra.mxu2 %v3799_v4  ;;  %1325 = vmatpush.msra.mxu3 %v3802_v5  ;;  %v5508_v4 = vld [vmem:[#allocation22_spill] sm:$0xff]  ;;  %v5509_v5 = vld [vmem:[#allocation23_spill] sm:$0xff] }
 0x38f   :  { %1266 = vmatpush.msra.mxu0 %v3805_v6  ;;  %1286 = vmatpush.msra.mxu1 %v3808_v7  ;;  %v5510_v6 = vld [vmem:[#allocation24_spill] sm:$0xff]  ;;  %v5511_v7 = vld [vmem:[#allocation25_spill] sm:$0xff] }
 0x390   :  { %1306 = vmatpush.msra.mxu2 %v3811_v8  ;;  %1326 = vmatpush.msra.mxu3 %v3814_v9  ;;  %v5512_v8 = vld [vmem:[#allocation27_spill] sm:$0xff]  ;;  %v5513_v9 = vld [vmem:[#allocation28_spill] sm:$0xff] }
 0x391   :  { %1267 = vmatpush.msra.mxu0 %v3817_v10  ;;  %1287 = vmatpush.msra.mxu1 %v3820_v24  ;;  %v5514_v10 = vld [vmem:[#allocation29_spill] sm:$0xff]  ;;  %v5515_v24 = vld [vmem:[#allocation30_spill] sm:$0xff] }
 0x392   :  { %1307 = vmatpush.msra.mxu2 %v3823_v25  ;;  %1327 = vmatpush.msra.mxu3 %v3826_v27  ;;  %v5516_v25 = vld [vmem:[#allocation31_spill] sm:$0xff]  ;;  %v5517_v27 = vld [vmem:[#allocation32_spill] sm:$0xff] }
 0x393   :  { %1268 = vmatpush.msra.mxu0 %v3829_v28  ;;  %1288 = vmatpush.msra.mxu1 %v3832_v29  ;;  %v5518_v28 = vld [vmem:[#allocation33_spill] sm:$0xff]  ;;  %v5519_v29 = vld [vmem:[#allocation34_spill] sm:$0xff] }
 0x394   :  { %1308 = vmatpush.msra.mxu2 %v3835_v30  ;;  %1328 = vmatpush.msra.mxu3 %v3838_v31  ;;  %v5520_v30 = vld [vmem:[#allocation35_spill] sm:$0xff]  ;;  %v5521_v31 = vld [vmem:[#allocation36_spill] sm:$0xff] }
 0x395   :  { %1269 = vmatpush.msra.mxu0 %v3841_v33  ;;  %1289 = vmatpush.msra.mxu1 %v3844_v34  ;;  %v5522_v33 = vld [vmem:[#allocation37_spill] sm:$0xff]  ;;  %v5523_v34 = vld [vmem:[#allocation38_spill] sm:$0xff] }
 0x396   :  { %1309 = vmatpush.msra.mxu2 %v3847_v35  ;;  %1329 = vmatpush.msra.mxu3 %v3850_v36 }
 0x397   :  { %1270 = vmatpush.msra.mxu0 %v3853_v37  ;;  %1290 = vmatpush.msra.mxu1 %v3856_v38  ;;  %v5524_v37 = vld [vmem:[#allocation56_spill] sm:$0xff] }
 0x398   :  { %1310 = vmatpush.msra.mxu2 %v3859_v40  ;;  %1330 = vmatpush.msra.mxu3 %v3862_v41  ;;  %v5525_v40 = vld [vmem:[#allocation57_spill] sm:$0xff] }
 0x399   :  { %1271 = vmatpush.msra.mxu0 %v3865_v42  ;;  %1291 = vmatpush.msra.mxu1 %v3868_v43  ;;  %v5526_v43 = vld [vmem:[#allocation69_spill] sm:$0xff] }
 0x39a   :  { %1311 = vmatpush.msra.mxu2 %v3871_v44  ;;  %1331 = vmatpush.msra.mxu3 %v3874_v45 }
 0x39b   :  { %1272 = vmatpush.msra.mxu0 %v3877_v51  ;;  %1292 = vmatpush.msra.mxu1 %v3880_v52 }
 0x39c   :  { %1312 = vmatpush.msra.mxu2 %v3883_v63  ;;  %1332 = vmatpush.msra.mxu3 %v3886_v59  ;;  %v5527_v59 = vld [vmem:[#allocation58_spill] sm:$0xff] }
 0x39d   :  { %1273 = vmatpush.msra.mxu0 %v3889_v56  ;;  %1293 = vmatpush.msra.mxu1 %v3892_v0  ;;  %v5528_v0 = vld [vmem:[#allocation59_spill] sm:$0xff] }
 0x39e   :  { %1313 = vmatpush.msra.mxu2 %v3895_v39  ;;  %1333 = vmatpush.msra.mxu3 %v3898_v13 }
 0x39f   :  { %1274 = vmatpush.msra.mxu0 %v3901_v53  ;;  %1294 = vmatpush.msra.mxu1 %v5475_v32 }
 0x3a0   :  { %1314 = vmatpush.msra.mxu2 %v5502_v61  ;;  %1334 = vmatpush.msra.mxu3 %v5503_v60  ;;  %v1443_v61 = vld [vmem:[#allocation9 + $0x1f8] sm:$0xff]  ;;  %v1436_v60 = vld [vmem:[#allocation9 + $0x1c0] sm:$0xff] }
 0x3a1   :  { %1275 = vmatpush.msra.mxu0 %v5504_v55  ;;  %1295 = vmatpush.msra.mxu1 %v5505_v1  ;;  %v1437_v55 = vld [vmem:[#allocation9 + $0x1c8] sm:$0xff]  ;;  %v1438_v1 = vld [vmem:[#allocation9 + $0x1d0] sm:$0xff] }
 0x3a2   :  { %1315 = vmatpush.msra.mxu2 %v5506_v2  ;;  %1335 = vmatpush.msra.mxu3 %v5507_v3  ;;  %v1439_v2 = vld [vmem:[#allocation9 + $0x1d8] sm:$0xff]  ;;  %v1432_v3 = vld [vmem:[#allocation9 + $0x1a0] sm:$0xff] }
 0x3a3   :  { %1276 = vmatpush.msra.mxu0 %v5508_v4  ;;  %1296 = vmatpush.msra.mxu1 %v5509_v5  ;;  %v1433_v4 = vld [vmem:[#allocation9 + $0x1a8] sm:$0xff]  ;;  %v1434_v5 = vld [vmem:[#allocation9 + $0x1b0] sm:$0xff] }
 0x3a4   :  { %1316 = vmatpush.msra.mxu2 %v5510_v6  ;;  %1336 = vmatpush.msra.mxu3 %v5511_v7  ;;  %v1435_v6 = vld [vmem:[#allocation9 + $0x1b8] sm:$0xff]  ;;  %v1428_v7 = vld [vmem:[#allocation9 + $0x180] sm:$0xff] }
 0x3a5   :  { %1277 = vmatpush.msra.mxu0 %v5512_v8  ;;  %1297 = vmatpush.msra.mxu1 %v5513_v9  ;;  %v1429_v8 = vld [vmem:[#allocation9 + $0x188] sm:$0xff]  ;;  %v1430_v9 = vld [vmem:[#allocation9 + $0x190] sm:$0xff] }
 0x3a6   :  { %1317 = vmatpush.msra.mxu2 %v5514_v10  ;;  %1337 = vmatpush.msra.mxu3 %v5515_v24  ;;  %v1431_v10 = vld [vmem:[#allocation9 + $0x198] sm:$0xff]  ;;  %v1424_v24 = vld [vmem:[#allocation9 + $0x160] sm:$0xff] }
 0x3a7   :  { %1278 = vmatpush.msra.mxu0 %v5516_v25  ;;  %1298 = vmatpush.msra.mxu1 %v5517_v27  ;;  %v1425_v25 = vld [vmem:[#allocation9 + $0x168] sm:$0xff]  ;;  %v1426_v27 = vld [vmem:[#allocation9 + $0x170] sm:$0xff] }
 0x3a8   :  { %1318 = vmatpush.msra.mxu2 %v5518_v28  ;;  %1338 = vmatpush.msra.mxu3 %v5519_v29  ;;  %v1427_v28 = vld [vmem:[#allocation9 + $0x178] sm:$0xff]  ;;  %v1420_v29 = vld [vmem:[#allocation9 + $0x140] sm:$0xff] }
 0x3a9   :  { %1279 = vmatpush.msra.mxu0 %v5520_v30  ;;  %1299 = vmatpush.msra.mxu1 %v5521_v31  ;;  %v1421_v30 = vld [vmem:[#allocation9 + $0x148] sm:$0xff]  ;;  %v1422_v31 = vld [vmem:[#allocation9 + $0x150] sm:$0xff] }
 0x3aa   :  { %1319 = vmatpush.msra.mxu2 %v5522_v33  ;;  %1339 = vmatpush.msra.mxu3 %v5523_v34  ;;  %v1423_v33 = vld [vmem:[#allocation9 + $0x158] sm:$0xff]  ;;  %v1416_v34 = vld [vmem:[#allocation9 + $0x120] sm:$0xff] }
 0x406   :  { %v1051_v35 = vpop.f32.mrf.mxu0  ;;  %v1071_v36 = vpop.f32.mrf.mxu1 }
 0x407   :  { %v1114_v38 = vadd.f32 %v1051_v35, %v5524_v37  ;;  %v1115_v41 = vadd.f32 %v1071_v36, %v5525_v40  ;;  %v1417_v35 = vld [vmem:[#allocation9 + $0x128] sm:$0xff]  ;;  %v1418_v36 = vld [vmem:[#allocation9 + $0x130] sm:$0xff]  ;;  %v1419_v37 = vld [vmem:[#allocation9 + $0x138] sm:$0xff] }
 0x408   :  { %v1413_v40 = vld [vmem:[#allocation9 + $0x108] sm:$0xff] }
 0x409   :  { %v1118_v42 = vadd.f32 %v1114_v38, %v5426_v54  ;;  %v1119_v44 = vadd.f32 %v1115_v41, %v5526_v43  ;;  %v1412_v38 = vld [vmem:[#allocation9 + $0x100] sm:$0xff]  ;;  %v1414_v41 = vld [vmem:[#allocation9 + $0x110] sm:$0xff] }
 0x40b   :  { %v1122_v45 = vmul.f32 0.5, %v1118_v42  ;;  %v1126_v51 = vmul.f32 0.5, %v1119_v44  ;;  %v1415_v42 = vld [vmem:[#allocation9 + $0x118] sm:$0xff]  ;;  %v1408_v44 = vld [vmem:[#allocation9 + $0xe0] sm:$0xff] }
 0x40d   :  { %2723 = vtanh.f32 %v1122_v45  ;;  %v1091_v52 = vpop.f32.mrf.mxu2  ;;  %v1111_v63 = vpop.f32.mrf.mxu3  ;;  %v1409_v45 = vld [vmem:[#allocation9 + $0xe8] sm:$0xff] }
 0x40e   :  { %2725 = vtanh.f32 %v1126_v51  ;;  %v1116_v56 = vadd.f32 %v1091_v52, %v5527_v59  ;;  %v1117_v39 = vadd.f32 %v1111_v63, %v5528_v0  ;;  %v1410_v51 = vld [vmem:[#allocation9 + $0xf0] sm:$0xff]  ;;  %v1411_v52 = vld [vmem:[#allocation9 + $0xf8] sm:$0xff]  ;;  %v1404_v63 = vld [vmem:[#allocation9 + $0xc0] sm:$0xff] }
 0x40f   :  { %v1405_v59 = vld [vmem:[#allocation9 + $0xc8] sm:$0xff]  ;;  %v1407_v0 = vld [vmem:[#allocation9 + $0xd8] sm:$0xff] }
 0x410   :  { %v1120_v13 = vadd.f32 %v1116_v56, %v3602_v50  ;;  %v1121_v53 = vadd.f32 %v1117_v39, %v3604_v49  ;;  %v1406_v56 = vld [vmem:[#allocation9 + $0xd0] sm:$0xff]  ;;  %v1400_v39 = vld [vmem:[#allocation9 + $0xa0] sm:$0xff] }
 0x412   :  { %2727 = vtanh.f32 %v1120_v13  ;;  %v1131_v21 = vmul.f32 0.5, %v1121_v53  ;;  %v1401_v13 = vld [vmem:[#allocation9 + $0xa8] sm:$0xff]  ;;  %v1402_v53 = vld [vmem:[#allocation9 + $0xb0] sm:$0xff] }
 0x413   :  { %v2724_v32 = vpop.eup %2723 }
 0x414   :  { %v2726_v15 = vpop.eup %2725  ;;  %v1124_v47 = vmul.f32 0.5, %v2724_v32  ;;  %2729 = vtanh.f32 %v1131_v21  ;;  %v1403_v21 = vld [vmem:[#allocation9 + $0xb8] sm:$0xff]  ;;  %v1396_v32 = vld [vmem:[#allocation9 + $0x80] sm:$0xff] }
 0x415   :  { %v1128_v46 = vmul.f32 0.5, %v2726_v15  ;;  %v1397_v15 = vld [vmem:[#allocation9 + $0x88] sm:$0xff] }
 0x416   :  { %v1125_v17 = vadd.f32 0.5, %v1124_v47  ;;  %v1398_v47 = vld [vmem:[#allocation9 + $0x90] sm:$0xff] }
 0x417   :  { %v1129_v18 = vadd.f32 0.5, %v1128_v46  ;;  %v1399_v46 = vld [vmem:[#allocation9 + $0x98] sm:$0xff] }
 0x418   :  { %v2728_v22 = vpop.eup %2727 }
 0x419   :  { %v1135_v48 = vmul.f32 %v1129_v18, %v4064_v57  ;;  %v1136_v16 = vmul.f32 %v2728_v22, %v1125_v17  ;;  %v1440_v57 = vld [vmem:[#allocation9 + $0x1e0] sm:$0xff]  ;;  %v5529_v22 = vld [vmem:[#allocation60_spill] sm:$0xff] }
 0x41a   :  { %v2730_v14 = vpop.eup %2729 }
 0x41b   :  { %v4146_v12 = vadd.f32 %v1136_v16, %v1135_v48  ;;  %v1133_v19 = vmul.f32 0.5, %v2730_v14  ;;  %v5530_v16 = vld [vmem:[#allocation61_spill] sm:$0xff] }
 0x41d   :  { %2731 = vtanh.f32 %v4146_v12  ;;  %v1134_v20 = vadd.f32 0.5, %v1133_v19  ;;  %v1392_v19 = vld [vmem:[#allocation9 + $0x60] sm:$0xff] }
 0x423   :  { %v2732_v62 = vpop.eup %2731 }
 0x424   :  { %v4149_v23 = vmul.f32 %v2732_v62, %v1134_v20  ;;  %v1393_v20 = vld [vmem:[#allocation9 + $0x68] sm:$0xff]  ;;  %v1394_v62 = vld [vmem:[#allocation9 + $0x70] sm:$0xff] }
 0x426   :  { %1165 = vmatmul.f32.vlgmr.msrb.gmra.mxu0 %v4149_v23  ;;  %1185 = vmatmul.f32.vlgmr.msrb.gmra.mxu1 %v4149_v23 }
 0x427   :  { %1205 = vmatmul.f32.vlgmr.msrb.gmra.mxu2 %v4149_v23  ;;  %1225 = vmatmul.f32.vlgmr.msrb.gmra.mxu3 %v4149_v23 }
 0x428   :  { %1444 = vmatpush.msrb.mxu0 %v1440_v57  ;;  %1485 = vmatpush.msrb.mxu1 %v1441_v11  ;;  %v1395_v57 = vld [vmem:[#allocation9 + $0x78] sm:$0xff]  ;;  %v1388_v11 = vld [vmem:[#allocation9 + $0x40] sm:$0xff] }
 0x429   :  { %1526 = vmatpush.msrb.mxu2 %v1442_v26  ;;  %1567 = vmatpush.msrb.mxu3 %v1443_v61  ;;  %v1389_v26 = vld [vmem:[#allocation9 + $0x48] sm:$0xff] }
 0x42a   :  { %1445 = vmatpush.msrb.mxu0 %v1436_v60  ;;  %1486 = vmatpush.msrb.mxu1 %v1437_v55  ;;  %v1390_v55 = vld [vmem:[#allocation9 + $0x50] sm:$0xff] }
 0x42b   :  { %1527 = vmatpush.msrb.mxu2 %v1438_v1  ;;  %1568 = vmatpush.msrb.mxu3 %v1439_v2  ;;  %v1391_v1 = vld [vmem:[#allocation9 + $0x58] sm:$0xff]  ;;  %v1384_v2 = vld [vmem:[#allocation9 + $0x20] sm:$0xff] }
 0x42c   :  { %1446 = vmatpush.msrb.mxu0 %v1432_v3  ;;  %1487 = vmatpush.msrb.mxu1 %v1433_v4  ;;  %v1385_v3 = vld [vmem:[#allocation9 + $0x28] sm:$0xff]  ;;  %v1386_v4 = vld [vmem:[#allocation9 + $0x30] sm:$0xff] }
 0x42d   :  { %1528 = vmatpush.msrb.mxu2 %v1434_v5  ;;  %1569 = vmatpush.msrb.mxu3 %v1435_v6  ;;  %v1387_v5 = vld [vmem:[#allocation9 + $0x38] sm:$0xff] }
 0x42e   :  { %1447 = vmatpush.msrb.mxu0 %v1428_v7  ;;  %1488 = vmatpush.msrb.mxu1 %v1429_v8  ;;  %v1380_v8 = vld [vmem:[#allocation9] sm:$0xff] }
 0x42f   :  { %1529 = vmatpush.msrb.mxu2 %v1430_v9  ;;  %1570 = vmatpush.msrb.mxu3 %v1431_v10  ;;  %v1381_v9 = vld [vmem:[#allocation9 + $0x8] sm:$0xff]  ;;  %v1382_v10 = vld [vmem:[#allocation9 + $0x10] sm:$0xff] }
 0x430   :  { %1448 = vmatpush.msrb.mxu0 %v1424_v24  ;;  %1489 = vmatpush.msrb.mxu1 %v1425_v25  ;;  %v1383_v24 = vld [vmem:[#allocation9 + $0x18] sm:$0xff] }
 0x431   :  { %1530 = vmatpush.msrb.mxu2 %v1426_v27  ;;  %1571 = vmatpush.msrb.mxu3 %v1427_v28  ;;  %v5531_v28 = vld [vmem:[#allocation62_spill] sm:$0xff] }
 0x432   :  { %1449 = vmatpush.msrb.mxu0 %v1420_v29  ;;  %1490 = vmatpush.msrb.mxu1 %v1421_v30  ;;  %v5532_v30 = vld [vmem:[#allocation63_spill] sm:$0xff] }
 0x433   :  { %1531 = vmatpush.msrb.mxu2 %v1422_v31  ;;  %1572 = vmatpush.msrb.mxu3 %v1423_v33 }
 0x434   :  { %1450 = vmatpush.msrb.mxu0 %v1416_v34  ;;  %1491 = vmatpush.msrb.mxu1 %v1417_v35 }
 0x435   :  { %1532 = vmatpush.msrb.mxu2 %v1418_v36  ;;  %1573 = vmatpush.msrb.mxu3 %v1419_v37 }
 0x436   :  { %1451 = vmatpush.msrb.mxu0 %v1412_v38  ;;  %1492 = vmatpush.msrb.mxu1 %v1413_v40 }
 0x437   :  { %1533 = vmatpush.msrb.mxu2 %v1414_v41  ;;  %1574 = vmatpush.msrb.mxu3 %v1415_v42 }
 0x438   :  { %1452 = vmatpush.msrb.mxu0 %v1408_v44  ;;  %1493 = vmatpush.msrb.mxu1 %v1409_v45 }
 0x439   :  { %1534 = vmatpush.msrb.mxu2 %v1410_v51  ;;  %1575 = vmatpush.msrb.mxu3 %v1411_v52 }
 0x43a   :  { %1453 = vmatpush.msrb.mxu0 %v1404_v63  ;;  %1494 = vmatpush.msrb.mxu1 %v1405_v59 }
 0x43b   :  { %1535 = vmatpush.msrb.mxu2 %v1406_v56  ;;  %1576 = vmatpush.msrb.mxu3 %v1407_v0 }
 0x43c   :  { %1454 = vmatpush.msrb.mxu0 %v1400_v39  ;;  %1495 = vmatpush.msrb.mxu1 %v1401_v13  ;;  %v5534_v13 = vld [vmem:[#allocation40_spill] sm:$0xff] }
 0x43d   :  { %1536 = vmatpush.msrb.mxu2 %v1402_v53  ;;  %1577 = vmatpush.msrb.mxu3 %v1403_v21  ;;  %v5535_v53 = vld [vmem:[#allocation41_spill] sm:$0xff] }
 0x43e   :  { %1455 = vmatpush.msrb.mxu0 %v1396_v32  ;;  %1496 = vmatpush.msrb.mxu1 %v1397_v15  ;;  %v4185_v21 = vld [vmem:[#allocation10 + $0x1e0] sm:$0xff]  ;;  %v4187_v32 = vld [vmem:[#allocation10 + $0x1e8] sm:$0xff]  ;;  %v4189_v15 = vld [vmem:[#allocation10 + $0x1f0] sm:$0xff] }
 0x43f   :  { %1537 = vmatpush.msrb.mxu2 %v1398_v47  ;;  %1578 = vmatpush.msrb.mxu3 %v1399_v46  ;;  %v4193_v47 = vld [vmem:[#allocation10 + $0x1c0] sm:$0xff]  ;;  %v4195_v46 = vld [vmem:[#allocation10 + $0x1c8] sm:$0xff] }
 0x440   :  { %1456 = vmatpush.msrb.mxu0 %v1392_v19  ;;  %1497 = vmatpush.msrb.mxu1 %v1393_v20  ;;  %v4218_v19 = vld [vmem:[#allocation10 + $0x180] sm:$0xff]  ;;  %v4220_v20 = vld [vmem:[#allocation10 + $0x188] sm:$0xff] }
 0x441   :  { %1538 = vmatpush.msrb.mxu2 %v1394_v62  ;;  %1579 = vmatpush.msrb.mxu3 %v1395_v57  ;;  %v5536_v62 = vld [vmem:[#allocation26_spill] sm:$0xff]  ;;  %v4224_v57 = vld [vmem:[#allocation10 + $0x190] sm:$0xff] }
 0x442   :  { %1457 = vmatpush.msrb.mxu0 %v1388_v11  ;;  %1498 = vmatpush.msrb.mxu1 %v1389_v26  ;;  %v4226_v11 = vld [vmem:[#allocation10 + $0x1b8] sm:$0xff]  ;;  %v4230_v26 = vld [vmem:[#allocation10 + $0x160] sm:$0xff] }
 0x443   :  { %1539 = vmatpush.msrb.mxu2 %v1390_v55  ;;  %1580 = vmatpush.msrb.mxu3 %v1391_v1  ;;  %v4238_v55 = vld [vmem:[#allocation10 + $0x198] sm:$0xff]  ;;  %v4242_v1 = vld [vmem:[#allocation10 + $0x140] sm:$0xff] }
 0x444   :  { %1458 = vmatpush.msrb.mxu0 %v1384_v2  ;;  %1499 = vmatpush.msrb.mxu1 %v1385_v3  ;;  %v4244_v2 = vld [vmem:[#allocation10 + $0x148] sm:$0xff]  ;;  %v4248_v3 = vld [vmem:[#allocation10 + $0x150] sm:$0xff] }
 0x445   :  { %1540 = vmatpush.msrb.mxu2 %v1386_v4  ;;  %1581 = vmatpush.msrb.mxu3 %v1387_v5  ;;  %v4250_v4 = vld [vmem:[#allocation10 + $0x178] sm:$0xff]  ;;  %v4258_v5 = vld [vmem:[#allocation10 + $0x120] sm:$0xff] }
 0x446   :  { %1459 = vmatpush.msrb.mxu0 %v1380_v8  ;;  %1500 = vmatpush.msrb.mxu1 %v1381_v9  ;;  %v4282_v8 = vld [vmem:[#allocation10 + $0x100] sm:$0xff]  ;;  %v4284_v9 = vld [vmem:[#allocation10 + $0x108] sm:$0xff] }
 0x447   :  { %1541 = vmatpush.msrb.mxu2 %v1382_v10  ;;  %1582 = vmatpush.msrb.mxu3 %v1383_v24  ;;  %v4286_v10 = vld [vmem:[#allocation10 + $0x110] sm:$0xff]  ;;  %v4294_v24 = vld [vmem:[#allocation10 + $0x118] sm:$0xff] }
 0x4a3   :  { %v1166_v17 = vpop.f32.mrf.mxu0  ;;  %v1186_v18 = vpop.f32.mrf.mxu1 }
 0x4a4   :  { %v1229_v48 = vadd.f32 %v1166_v17, %v5529_v22  ;;  %v1230_v14 = vadd.f32 %v1186_v18, %v5530_v16  ;;  %v4197_v17 = vld [vmem:[#allocation10 + $0x1d0] sm:$0xff]  ;;  %v4200_v18 = vld [vmem:[#allocation10 + $0x1f8] sm:$0xff]  ;;  %v4202_v22 = vld [vmem:[#allocation10 + $0x1a0] sm:$0xff] }
 0x4a5   :  { %v4208_v16 = vld [vmem:[#allocation10 + $0x1b0] sm:$0xff] }
 0x4a6   :  { %v1233_v61 = vadd.f32 %v1229_v48, %v5426_v54  ;;  %v1234_v60 = vadd.f32 %v1230_v14, %v5526_v43  ;;  %v4204_v48 = vld [vmem:[#allocation10 + $0x1a8] sm:$0xff]  ;;  %v4210_v14 = vld [vmem:[#allocation10 + $0x1d8] sm:$0xff] }
 0x4a8   :  { %v1237_v6 = vmul.f32 0.5, %v1233_v61  ;;  %v1241_v7 = vmul.f32 0.5, %v1234_v60  ;;  %v4232_v61 = vld [vmem:[#allocation10 + $0x168] sm:$0xff]  ;;  %v4236_v60 = vld [vmem:[#allocation10 + $0x170] sm:$0xff] }
 0x4aa   :  { %2733 = vtanh.f32 %v1237_v6  ;;  %v1206_v25 = vpop.f32.mrf.mxu2  ;;  %v1226_v27 = vpop.f32.mrf.mxu3  ;;  %v4260_v6 = vld [vmem:[#allocation10 + $0x128] sm:$0xff] }
 0x4ab   :  { %2735 = vtanh.f32 %v1241_v7  ;;  %v1231_v29 = vadd.f32 %v1206_v25, %v5531_v28  ;;  %v1232_v31 = vadd.f32 %v1226_v27, %v5532_v30  ;;  %v4264_v7 = vld [vmem:[#allocation10 + $0x130] sm:$0xff]  ;;  %v4296_v25 = vld [vmem:[#allocation10 + $0xe0] sm:$0xff]  ;;  %v4298_v27 = vld [vmem:[#allocation10 + $0xe8] sm:$0xff] }
 0x4ac   :  { %v4300_v28 = vld [vmem:[#allocation10 + $0xf0] sm:$0xff]  ;;  %v4307_v30 = vld [vmem:[#allocation10 + $0xc8] sm:$0xff] }
 0x4ad   :  { %v1235_v33 = vadd.f32 %v1231_v29, %v3602_v50  ;;  %v1236_v34 = vadd.f32 %v1232_v31, %v3604_v49  ;;  %v4305_v29 = vld [vmem:[#allocation10 + $0xc0] sm:$0xff]  ;;  %v4309_v31 = vld [vmem:[#allocation10 + $0xd0] sm:$0xff] }
 0x4af   :  { %2737 = vtanh.f32 %v1235_v33  ;;  %v1246_v35 = vmul.f32 0.5, %v1236_v34  ;;  %v4312_v33 = vld [vmem:[#allocation10 + $0xf8] sm:$0xff]  ;;  %v4314_v34 = vld [vmem:[#allocation10 + $0xa0] sm:$0xff] }
 0x4b0   :  { %v2734_v36 = vpop.eup %2733 }
 0x4b1   :  { %v2736_v37 = vpop.eup %2735  ;;  %v1239_v38 = vmul.f32 0.5, %v2734_v36  ;;  %2739 = vtanh.f32 %v1246_v35  ;;  %v4316_v35 = vld [vmem:[#allocation10 + $0xa8] sm:$0xff]  ;;  %v4320_v36 = vld [vmem:[#allocation10 + $0xb0] sm:$0xff] }
 0x4b2   :  { %v1243_v40 = vmul.f32 0.5, %v2736_v37  ;;  %5537 = vst [vmem:[#allocation39_spill] sm:$0xff] %v4320_v36  ;;  %v4322_v37 = vld [vmem:[#allocation10 + $0xd8] sm:$0xff] }
 0x4b3   :  { %v1240_v41 = vadd.f32 0.5, %v1239_v38  ;;  %v4326_v38 = vld [vmem:[#allocation10 + $0x80] sm:$0xff] }
 0x4b4   :  { %v1244_v42 = vadd.f32 0.5, %v1243_v40  ;;  %5538 = vst [vmem:[#allocation44_spill] sm:$0xff] %v4326_v38  ;;  %v4328_v40 = vld [vmem:[#allocation10 + $0x88] sm:$0xff] }
 0x4b5   :  { %v2738_v44 = vpop.eup %2737  ;;  %5539 = vst [vmem:[#allocation45_spill] sm:$0xff] %v4328_v40 }
 0x4b6   :  { %v1250_v45 = vmul.f32 %v1244_v42, %v4146_v12  ;;  %v1251_v51 = vmul.f32 %v2738_v44, %v1240_v41  ;;  %v5533_v12 = vld [vmem:[#allocation70_spill] sm:$0xff]  ;;  %v4332_v41 = vld [vmem:[#allocation10 + $0x90] sm:$0xff]  ;;  %v4334_v42 = vld [vmem:[#allocation10 + $0xb8] sm:$0xff] }
 0x4b7   :  { %v2740_v52 = vpop.eup %2739  ;;  %5540 = vst [vmem:[#allocation46_spill] sm:$0xff] %v4332_v41  ;;  %v4338_v44 = vld [vmem:[#allocation10 + $0x60] sm:$0xff] }
 0x4b8   :  { %v4164_v63 = vadd.f32 %v1251_v51, %v1250_v45  ;;  %v1248_v59 = vmul.f32 0.5, %v2740_v52  ;;  %5541 = vst [vmem:[#allocation47_spill] sm:$0xff] %v4334_v42  ;;  %v4340_v45 = vld [vmem:[#allocation10 + $0x68] sm:$0xff]  ;;  %v4344_v51 = vld [vmem:[#allocation10 + $0x70] sm:$0xff]  ;;  %v4346_v52 = vld [vmem:[#allocation10 + $0x98] sm:$0xff] }
 0x4b9   :  { %5542 = vst [vmem:[#allocation48_spill] sm:$0xff] %v4338_v44 }
 0x4ba   :  { %2741 = vtanh.f32 %v4164_v63  ;;  %v1249_v56 = vadd.f32 0.5, %v1248_v59  ;;  %5543 = vst [vmem:[#allocation49_spill] sm:$0xff] %v4340_v45  ;;  %v4350_v59 = vld [vmem:[#allocation10 + $0x40] sm:$0xff] }
 0x4bb   :  { %5544 = vst [vmem:[#allocation50_spill] sm:$0xff] %v4344_v51 }
 0x4bc   :  { %5545 = vst [vmem:[#allocation51_spill] sm:$0xff] %v4346_v52 }
 0x4bd   :  { %5546 = vst [vmem:[#allocation68_spill] sm:$0xff] %v4350_v59 }
 0x4c0   :  { %v2742_v0 = vpop.eup %2741 }
 0x4c1   :  { %v4167_v39 = vmul.f32 %v2742_v0, %v1249_v56  ;;  %v4352_v56 = vld [vmem:[#allocation10 + $0x48] sm:$0xff] }
 0x4c2   :  { %5547 = vst [vmem:[#allocation52_spill] sm:$0xff] %v4352_v56 }
 0x4c3   :  { %1280 = vmatmul.f32.vlgmr.msra.gmra.mxu0 %v4167_v39  ;;  %1300 = vmatmul.f32.vlgmr.msra.gmra.mxu1 %v4167_v39 }
 0x4c4   :  { %1320 = vmatmul.f32.vlgmr.msra.gmra.mxu2 %v4167_v39  ;;  %1340 = vmatmul.f32.vlgmr.msra.gmra.mxu3 %v4167_v39 }
 0x4c5   :  { %1709 = vmatpush.msra.mxu0 %v4185_v21  ;;  %1729 = vmatpush.msra.mxu1 %v4187_v32 }
 0x4c6   :  { %1749 = vmatpush.msra.mxu2 %v4189_v15  ;;  %1769 = vmatpush.msra.mxu3 %v4200_v18 }
 0x4c7   :  { %1710 = vmatpush.msra.mxu0 %v4193_v47  ;;  %1730 = vmatpush.msra.mxu1 %v4195_v46 }
 0x4c8   :  { %1750 = vmatpush.msra.mxu2 %v4197_v17  ;;  %1770 = vmatpush.msra.mxu3 %v4210_v14 }
 0x4c9   :  { %1711 = vmatpush.msra.mxu0 %v4202_v22  ;;  %1731 = vmatpush.msra.mxu1 %v4204_v48 }
 0x4ca   :  { %1751 = vmatpush.msra.mxu2 %v4208_v16  ;;  %1771 = vmatpush.msra.mxu3 %v4226_v11 }
 0x4cb   :  { %1460 = vmatmul.f32.vlgmr.msrb.gmra.mxu0 %v5533_v12  ;;  %1501 = vmatmul.f32.vlgmr.msrb.gmra.mxu1 %v5533_v12 }
 0x4cc   :  { %1542 = vmatmul.f32.vlgmr.msrb.gmra.mxu2 %v5533_v12  ;;  %1583 = vmatmul.f32.vlgmr.msrb.gmra.mxu3 %v5533_v12  ;;  %v4356_v12 = vld [vmem:[#allocation10 + $0x50] sm:$0xff] }
 0x4cd   :  { %1712 = vmatpush.msra.mxu0 %v4218_v19  ;;  %1732 = vmatpush.msra.mxu1 %v4220_v20  ;;  %5548 = vst [vmem:[#allocation53_spill] sm:$0xff] %v4356_v12 }
 0x4ce   :  { %1752 = vmatpush.msra.mxu2 %v4224_v57  ;;  %1772 = vmatpush.msra.mxu3 %v4238_v55 }
 0x4cf   :  { %1713 = vmatpush.msra.mxu0 %v4230_v26  ;;  %1733 = vmatpush.msra.mxu1 %v4232_v61 }
 0x4d0   :  { %1753 = vmatpush.msra.mxu2 %v4236_v60  ;;  %1773 = vmatpush.msra.mxu3 %v4250_v4 }
 0x4d1   :  { %1714 = vmatpush.msra.mxu0 %v4242_v1  ;;  %1734 = vmatpush.msra.mxu1 %v4244_v2 }
 0x4d2   :  { %1754 = vmatpush.msra.mxu2 %v4248_v3 }
 0x4d3   :  { %1463 = vmatmul.f32.gmra.mxu0 %v5534_v13  ;;  %1504 = vmatmul.f32.gmra.mxu1 %v5534_v13 }
 0x4d4   :  { %1545 = vmatmul.f32.gmra.mxu2 %v5534_v13  ;;  %1586 = vmatmul.f32.gmra.mxu3 %v5534_v13  ;;  %v4358_v13 = vld [vmem:[#allocation10 + $0x78] sm:$0xff] }
 0x4d5   :  { %1715 = vmatpush.msra.mxu0 %v4258_v5  ;;  %1735 = vmatpush.msra.mxu1 %v4260_v6  ;;  %5549 = vst [vmem:[#allocation54_spill] sm:$0xff] %v4358_v13 }
 0x4d6   :  { %1755 = vmatpush.msra.mxu2 %v4264_v7 }
 0x4d7   :  { %1716 = vmatpush.msra.mxu0 %v4282_v8  ;;  %1736 = vmatpush.msra.mxu1 %v4284_v9 }
 0x4d8   :  { %1756 = vmatpush.msra.mxu2 %v4286_v10 }
 0x4d9   :  { %1717 = vmatpush.msra.mxu0 %v4296_v25  ;;  %1737 = vmatpush.msra.mxu1 %v4298_v27 }
 0x4da   :  { %1757 = vmatpush.msra.mxu2 %v4300_v28 }
 0x4db   :  { %1466 = vmatmul.f32.gmra.mxu0 %v5535_v53  ;;  %1507 = vmatmul.f32.gmra.mxu1 %v5535_v53 }
 0x4dc   :  { %1548 = vmatmul.f32.gmra.mxu2 %v5535_v53  ;;  %1589 = vmatmul.f32.gmra.mxu3 %v5535_v53  ;;  %v5550_v53 = vld [vmem:[#allocation64_spill] sm:$0xff] }
 0x4dd   :  { %1718 = vmatpush.msra.mxu0 %v4305_v29  ;;  %1738 = vmatpush.msra.mxu1 %v4307_v30 }
 0x4de   :  { %1758 = vmatpush.msra.mxu2 %v4309_v31 }
 0x4df   :  { %1719 = vmatpush.msra.mxu0 %v4314_v34  ;;  %1739 = vmatpush.msra.mxu1 %v4316_v35 }
 0x4e0   :  { %1759 = vmatpush.msra.mxu2 %v4320_v36 }
 0x4e1   :  { %1720 = vmatpush.msra.mxu0 %v4326_v38  ;;  %1740 = vmatpush.msra.mxu1 %v4328_v40  ;;  %v5551_v40 = vld [vmem:[#allocation65_spill] sm:$0xff] }
 0x4e2   :  { %1760 = vmatpush.msra.mxu2 %v4332_v41  ;;  %v4364_v38 = vld [vmem:[#allocation10 + $0x20] sm:$0xff] }
 0x4e3   :  { %1469 = vmatmul.f32.gmra.mxu0 %v5536_v62  ;;  %1510 = vmatmul.f32.gmra.mxu1 %v5536_v62  ;;  %5552 = vst [vmem:[#allocation55_spill] sm:$0xff] %v4364_v38 }
 0x4e4   :  { %1551 = vmatmul.f32.gmra.mxu2 %v5536_v62  ;;  %1592 = vmatmul.f32.gmra.mxu3 %v5536_v62 }
 0x4e5   :  { %1721 = vmatpush.msra.mxu0 %v4338_v44  ;;  %1741 = vmatpush.msra.mxu1 %v4340_v45  ;;  %v4370_v45 = vld [vmem:[#allocation10 + $0x30] sm:$0xff]  ;;  %v4372_v44 = vld [vmem:[#allocation10 + $0x58] sm:$0xff] }
 0x4e6   :  { %1761 = vmatpush.msra.mxu2 %v4344_v51  ;;  %5554 = vst [vmem:[#allocation43_spill] sm:$0xff] %v4370_v45 }
 0x4e7   :  { %1722 = vmatpush.msra.mxu0 %v4350_v59  ;;  %1742 = vmatpush.msra.mxu1 %v4352_v56  ;;  %5555 = vst [vmem:[#allocation18_spill] sm:$0xff] %v4372_v44  ;;  %v4384_v56 = vld [vmem:[#allocation10 + $0x10] sm:$0xff]  ;;  %v4386_v59 = vld [vmem:[#allocation10 + $0x38] sm:$0xff] }
 0x4e8   :  { %1762 = vmatpush.msra.mxu2 %v4356_v12  ;;  %5558 = vst [vmem:[#allocation21_spill] sm:$0xff] %v4384_v56 }
 0x4e9   :  { %1723 = vmatpush.msra.mxu0 %v4364_v38  ;;  %5559 = vst [vmem:[#allocation22_spill] sm:$0xff] %v4386_v59 }
 0x4ea   :  { %1763 = vmatpush.msra.mxu2 %v4370_v45 }
 0x4eb   :  { %1472 = vmatmul.f32.gmra.mxu0 %v4067_v58  ;;  %1513 = vmatmul.f32.gmra.mxu1 %v4067_v58 }
 0x4ec   :  { %1554 = vmatmul.f32.gmra.mxu2 %v4067_v58  ;;  %1595 = vmatmul.f32.gmra.mxu3 %v4067_v58  ;;  %v4279_v58 = vld [vmem:[#allocation10 + $0x158] sm:$0xff] }
 0x4ed   :  { %1774 = vmatpush.msra.mxu3 %v4279_v58  ;;  %1764 = vmatpush.msra.mxu2 %v4384_v56 }
 0x4ef   :  { %1868 = vmatpush.msrb.mxu2 %v4189_v15 }
 0x4f1   :  { %1869 = vmatpush.msrb.mxu2 %v4197_v17 }
 0x4f3   :  { %1475 = vmatmul.f32.gmra.mxu0 %v4149_v23  ;;  %1516 = vmatmul.f32.gmra.mxu1 %v4149_v23 }
 0x4f4   :  { %1557 = vmatmul.f32.gmra.mxu2 %v4149_v23  ;;  %1598 = vmatmul.f32.gmra.mxu3 %v4149_v23  ;;  %v4290_v23 = vld [vmem:[#allocation10 + $0x138] sm:$0xff] }
 0x4f5   :  { %1775 = vmatpush.msra.mxu3 %v4290_v23  ;;  %1870 = vmatpush.msrb.mxu2 %v4208_v16 }
 0x4f7   :  { %1776 = vmatpush.msra.mxu3 %v4294_v24  ;;  %1871 = vmatpush.msrb.mxu2 %v4224_v57 }
 0x4f9   :  { %1777 = vmatpush.msra.mxu3 %v4312_v33  ;;  %1872 = vmatpush.msrb.mxu2 %v4236_v60 }
 0x4fb   :  { %1478 = vmatmul.f32.gmra.mxu0 %v4167_v39  ;;  %1519 = vmatmul.f32.gmra.mxu1 %v4167_v39 }
 0x4fc   :  { %1560 = vmatmul.f32.gmra.mxu2 %v4167_v39  ;;  %1601 = vmatmul.f32.gmra.mxu3 %v4167_v39 }
 0x4fd   :  { %1778 = vmatpush.msra.mxu3 %v4322_v37  ;;  %1873 = vmatpush.msrb.mxu2 %v4248_v3 }
 0x4ff   :  { %1779 = vmatpush.msra.mxu3 %v4334_v42  ;;  %v4366_v42 = vld [vmem:[#allocation10 + $0x28] sm:$0xff]  ;;  %1874 = vmatpush.msrb.mxu2 %v4264_v7 }
 0x500   :  { %5553 = vst [vmem:[#allocation42_spill] sm:$0xff] %v4366_v42  ;;  %1743 = vmatpush.msra.mxu1 %v4366_v42  ;;  %v5562_v42 = vld [vmem:[#allocation67_spill] sm:$0xff] }
 0x501   :  { %1780 = vmatpush.msra.mxu3 %v4346_v52  ;;  %1875 = vmatpush.msrb.mxu2 %v4286_v10 }
 0x503   :  { %1781 = vmatpush.msra.mxu3 %v4358_v13  ;;  %1876 = vmatpush.msrb.mxu2 %v4300_v28 }
 0x505   :  { %1782 = vmatpush.msra.mxu3 %v4372_v44  ;;  %1877 = vmatpush.msrb.mxu2 %v4309_v31 }
 0x507   :  { %1783 = vmatpush.msra.mxu3 %v4386_v59  ;;  %1878 = vmatpush.msrb.mxu2 %v4320_v36 }
 0x540   :  { %v1281_v0 = vpop.f32.mrf.mxu0  ;;  %v1301_v39 = vpop.f32.mrf.mxu1 }
 0x541   :  { %v1344_v62 = vadd.f32 %v1281_v0, %v5550_v53  ;;  %v1345_v41 = vadd.f32 %v1301_v39, %v5551_v40  ;;  %v4378_v39 = vld [vmem:[#allocation10] sm:$0xff]  ;;  %v4380_v53 = vld [vmem:[#allocation10 + $0x8] sm:$0xff] }
 0x542   :  { %5556 = vst [vmem:[#allocation19_spill] sm:$0xff] %v4378_v39  ;;  %1724 = vmatpush.msra.mxu0 %v4378_v39  ;;  %1744 = vmatpush.msra.mxu1 %v4380_v53 }
 0x543   :  { %v1348_v0 = vadd.f32 %v1344_v62, %v5426_v54  ;;  %v1349_v40 = vadd.f32 %v1345_v41, %v5526_v43  ;;  %5557 = vst [vmem:[#allocation20_spill] sm:$0xff] %v4380_v53  ;;  %v4394_v62 = vld [vmem:[#allocation10 + $0x18] sm:$0xff] }
 0x544   :  { %5560 = vst [vmem:[#allocation23_spill] sm:$0xff] %v4394_v62  ;;  %1828 = vmatpush.msrb.mxu0 %v4185_v21  ;;  %1848 = vmatpush.msrb.mxu1 %v4187_v32 }
 0x545   :  { %v1352_v51 = vmul.f32 0.5, %v1348_v0  ;;  %v1356_v54 = vmul.f32 0.5, %v1349_v40  ;;  %v5561_v0 = vld [vmem:[#allocation66_spill] sm:$0xff]  ;;  %1784 = vmatpush.msra.mxu3 %v4394_v62 }
 0x546   :  { %1829 = vmatpush.msrb.mxu0 %v4193_v47  ;;  %1849 = vmatpush.msrb.mxu1 %v4195_v46 }
 0x547   :  { %2743 = vtanh.f32 %v1352_v51  ;;  %v1321_v43 = vpop.f32.mrf.mxu2  ;;  %v1341_v41 = vpop.f32.mrf.mxu3  ;;  %1888 = vmatpush.msrb.mxu3 %v4200_v18 }
 0x548   :  { %2745 = vtanh.f32 %v1356_v54  ;;  %v1346_v40 = vadd.f32 %v1321_v43, %v5561_v0  ;;  %v1347_v45 = vadd.f32 %v1341_v41, %v5562_v42  ;;  %1830 = vmatpush.msrb.mxu0 %v4202_v22  ;;  %1850 = vmatpush.msrb.mxu1 %v4204_v48 }
 0x549   :  { %1889 = vmatpush.msrb.mxu3 %v4210_v14 }
 0x54a   :  { %v1350_v51 = vadd.f32 %v1346_v40, %v3602_v50  ;;  %v1351_v56 = vadd.f32 %v1347_v45, %v3604_v49  ;;  %1831 = vmatpush.msrb.mxu0 %v4218_v19  ;;  %1851 = vmatpush.msrb.mxu1 %v4220_v20 }
 0x54b   :  { %1890 = vmatpush.msrb.mxu3 %v4226_v11 }
 0x54c   :  { %2747 = vtanh.f32 %v1350_v51  ;;  %v1361_v42 = vmul.f32 0.5, %v1351_v56  ;;  %1832 = vmatpush.msrb.mxu0 %v4230_v26  ;;  %1852 = vmatpush.msrb.mxu1 %v4232_v61 }
 0x54d   :  { %v2744_v54 = vpop.eup %2743  ;;  %1891 = vmatpush.msrb.mxu3 %v4238_v55 }
 0x54e   :  { %v2746_v49 = vpop.eup %2745  ;;  %v1354_v50 = vmul.f32 0.5, %v2744_v54  ;;  %2749 = vtanh.f32 %v1361_v42  ;;  %1833 = vmatpush.msrb.mxu0 %v4242_v1  ;;  %1853 = vmatpush.msrb.mxu1 %v4244_v2 }
 0x54f   :  { %v1358_v45 = vmul.f32 0.5, %v2746_v49  ;;  %1892 = vmatpush.msrb.mxu3 %v4250_v4 }
 0x550   :  { %v1355_v56 = vadd.f32 0.5, %v1354_v50  ;;  %1834 = vmatpush.msrb.mxu0 %v4258_v5  ;;  %1854 = vmatpush.msrb.mxu1 %v4260_v6 }
 0x551   :  { %v1359_v43 = vadd.f32 0.5, %v1358_v45  ;;  %1893 = vmatpush.msrb.mxu3 %v4279_v58  ;;  %v5563_v45 = vld [vmem:[#allocation47_spill] sm:$0xff] }
 0x552   :  { %v2748_v41 = vpop.eup %2747  ;;  %1835 = vmatpush.msrb.mxu0 %v4282_v8  ;;  %1855 = vmatpush.msrb.mxu1 %v4284_v9 }
 0x553   :  { %v1365_v0 = vmul.f32 %v1359_v43, %v4164_v63  ;;  %v1366_v40 = vmul.f32 %v2748_v41, %v1355_v56  ;;  %1894 = vmatpush.msrb.mxu3 %v4290_v23  ;;  %v5564_v56 = vld [vmem:[#allocation44_spill] sm:$0xff]  ;;  %v5565_v43 = vld [vmem:[#allocation45_spill] sm:$0xff]  ;;  %v5566_v41 = vld [vmem:[#allocation46_spill] sm:$0xff] }
 0x554   :  { %v2750_v51 = vpop.eup %2749  ;;  %1836 = vmatpush.msrb.mxu0 %v4296_v25  ;;  %1856 = vmatpush.msrb.mxu1 %v4298_v27 }
 0x555   :  { %v1367_v42 = vadd.f32 %v1366_v40, %v1365_v0  ;;  %v1363_v63 = vmul.f32 0.5, %v2750_v51  ;;  %1895 = vmatpush.msrb.mxu3 %v4294_v24  ;;  %1879 = vmatpush.msrb.mxu2 %v5566_v41  ;;  %v5567_v0 = vld [vmem:[#allocation48_spill] sm:$0xff]  ;;  %v5568_v40 = vld [vmem:[#allocation49_spill] sm:$0xff]  ;;  %v5569_v51 = vld [vmem:[#allocation50_spill] sm:$0xff] }
 0x556   :  { %1837 = vmatpush.msrb.mxu0 %v4305_v29  ;;  %1857 = vmatpush.msrb.mxu1 %v4307_v30 }
 0x557   :  { %2751 = vtanh.f32 %v1367_v42  ;;  %1896 = vmatpush.msrb.mxu3 %v4312_v33  ;;  %v1364_v54 = vadd.f32 0.5, %v1363_v63  ;;  %1880 = vmatpush.msrb.mxu2 %v5569_v51  ;;  %v5570_v42 = vld [vmem:[#allocation68_spill] sm:$0xff] }
 0x558   :  { %1838 = vmatpush.msrb.mxu0 %v4314_v34  ;;  %1858 = vmatpush.msrb.mxu1 %v4316_v35  ;;  %v5571_v63 = vld [vmem:[#allocation52_spill] sm:$0xff] }
 0x559   :  { %1897 = vmatpush.msrb.mxu3 %v4322_v37  ;;  %1881 = vmatpush.msrb.mxu2 %v4356_v12 }
 0x55a   :  { %1839 = vmatpush.msrb.mxu0 %v5564_v56  ;;  %1859 = vmatpush.msrb.mxu1 %v5565_v43 }
 0x55b   :  { %1898 = vmatpush.msrb.mxu3 %v5563_v45 }
 0x55c   :  { %1840 = vmatpush.msrb.mxu0 %v5567_v0  ;;  %1860 = vmatpush.msrb.mxu1 %v5568_v40 }
 0x55d   :  { %v2752_v49 = vpop.eup %2751  ;;  %1899 = vmatpush.msrb.mxu3 %v4346_v52 }
 0x55e   :  { %v1369_v50 = vmul.f32 %v2752_v49, %v1364_v54  ;;  %1841 = vmatpush.msrb.mxu0 %v5570_v42  ;;  %1861 = vmatpush.msrb.mxu1 %v5571_v63  ;;  %v5572_v54 = vld [vmem:[#allocation42_spill] sm:$0xff]  ;;  %v5573_v49 = vld [vmem:[#allocation43_spill] sm:$0xff] }
 0x55f   :  { %1900 = vmatpush.msrb.mxu3 %v4358_v13  ;;  %1882 = vmatpush.msrb.mxu2 %v5573_v49 }
 0x560   :  { %1481 = vmatmul.f32.gmra.mxu0 %v1369_v50  ;;  %1522 = vmatmul.f32.gmra.mxu1 %v1369_v50 }
 0x561   :  { %1563 = vmatmul.f32.gmra.mxu2 %v1369_v50  ;;  %1604 = vmatmul.f32.gmra.mxu3 %v1369_v50  ;;  %v5574_v50 = vmov 0.0  }
 0x562   :  { %1901 = vmatpush.msrb.mxu3 %v4372_v44  ;;  %1842 = vmatpush.msrb.mxu0 %v4364_v38  ;;  %v5575_v44 = vld [vmem:[#allocation21_spill] sm:$0xff] }
 0x563   :  { %1862 = vmatpush.msrb.mxu1 %v5572_v54  ;;  %1883 = vmatpush.msrb.mxu2 %v5575_v44 }
 0x564   :  { %1902 = vmatpush.msrb.mxu3 %v4386_v59  ;;  %1843 = vmatpush.msrb.mxu0 %v4378_v39 }
 0x565   :  { %1863 = vmatpush.msrb.mxu1 %v4380_v53 }
 0x566   :  { %1903 = vmatpush.msrb.mxu3 %v4394_v62 }
 0x568   :  { %1725 = vmatmul.f32.vlgmr.msra.gmra.mxu0 %v5574_v50  ;;  %1745 = vmatmul.f32.vlgmr.msra.gmra.mxu1 %v5574_v50 }
 0x569   :  { %1765 = vmatmul.f32.vlgmr.msra.gmra.mxu2 %v5574_v50  ;;  %1785 = vmatmul.f32.vlgmr.msra.gmra.mxu3 %v5574_v50  ;;  %v5576_v50 = vld [vmem:[#allocation18_spill] sm:$0xff] }
 0x56a   :  { %1938 = vmatpush.msra.mxu0 %v4185_v21  ;;  %1958 = vmatpush.msra.mxu1 %v4187_v32 }
 0x56b   :  { %1978 = vmatpush.msra.mxu2 %v4189_v15  ;;  %1998 = vmatpush.msra.mxu3 %v4200_v18 }
 0x56c   :  { %1939 = vmatpush.msra.mxu0 %v4193_v47  ;;  %1959 = vmatpush.msra.mxu1 %v4195_v46 }
 0x56d   :  { %1979 = vmatpush.msra.mxu2 %v4197_v17  ;;  %1999 = vmatpush.msra.mxu3 %v4210_v14 }
 0x56e   :  { %1940 = vmatpush.msra.mxu0 %v4202_v22  ;;  %1960 = vmatpush.msra.mxu1 %v4204_v48 }
 0x56f   :  { %1980 = vmatpush.msra.mxu2 %v4208_v16  ;;  %2000 = vmatpush.msra.mxu3 %v4226_v11 }
 0x570   :  { %1941 = vmatpush.msra.mxu0 %v4218_v19  ;;  %1961 = vmatpush.msra.mxu1 %v4220_v20 }
 0x571   :  { %1981 = vmatpush.msra.mxu2 %v4224_v57  ;;  %2001 = vmatpush.msra.mxu3 %v4238_v55 }
 0x572   :  { %1942 = vmatpush.msra.mxu0 %v4230_v26  ;;  %1962 = vmatpush.msra.mxu1 %v4232_v61 }
 0x573   :  { %1982 = vmatpush.msra.mxu2 %v4236_v60  ;;  %2002 = vmatpush.msra.mxu3 %v4250_v4 }
 0x574   :  { %1943 = vmatpush.msra.mxu0 %v4242_v1  ;;  %1963 = vmatpush.msra.mxu1 %v4244_v2 }
 0x575   :  { %1983 = vmatpush.msra.mxu2 %v4248_v3  ;;  %2003 = vmatpush.msra.mxu3 %v4279_v58 }
 0x576   :  { %1944 = vmatpush.msra.mxu0 %v4258_v5  ;;  %1964 = vmatpush.msra.mxu1 %v4260_v6 }
 0x577   :  { %1984 = vmatpush.msra.mxu2 %v4264_v7  ;;  %2004 = vmatpush.msra.mxu3 %v4290_v23 }
 0x578   :  { %1945 = vmatpush.msra.mxu0 %v4282_v8  ;;  %1965 = vmatpush.msra.mxu1 %v4284_v9 }
 0x579   :  { %1985 = vmatpush.msra.mxu2 %v4286_v10  ;;  %2005 = vmatpush.msra.mxu3 %v4294_v24 }
 0x57a   :  { %1946 = vmatpush.msra.mxu0 %v4296_v25  ;;  %1966 = vmatpush.msra.mxu1 %v4298_v27 }
 0x57b   :  { %1986 = vmatpush.msra.mxu2 %v4300_v28  ;;  %2006 = vmatpush.msra.mxu3 %v4312_v33 }
 0x57c   :  { %1947 = vmatpush.msra.mxu0 %v4305_v29  ;;  %1967 = vmatpush.msra.mxu1 %v4307_v30 }
 0x57d   :  { %1987 = vmatpush.msra.mxu2 %v4309_v31  ;;  %2007 = vmatpush.msra.mxu3 %v4322_v37 }
 0x57e   :  { %1948 = vmatpush.msra.mxu0 %v4314_v34  ;;  %1968 = vmatpush.msra.mxu1 %v4316_v35 }
 0x57f   :  { %1988 = vmatpush.msra.mxu2 %v4320_v36  ;;  %2008 = vmatpush.msra.mxu3 %v5563_v45 }
 0x580   :  { %1949 = vmatpush.msra.mxu0 %v5564_v56  ;;  %1969 = vmatpush.msra.mxu1 %v5565_v43 }
 0x581   :  { %1989 = vmatpush.msra.mxu2 %v5566_v41  ;;  %2009 = vmatpush.msra.mxu3 %v4346_v52 }
 0x582   :  { %1950 = vmatpush.msra.mxu0 %v5567_v0  ;;  %1970 = vmatpush.msra.mxu1 %v5568_v40 }
 0x583   :  { %1990 = vmatpush.msra.mxu2 %v5569_v51  ;;  %2010 = vmatpush.msra.mxu3 %v4358_v13 }
 0x584   :  { %1951 = vmatpush.msra.mxu0 %v5570_v42  ;;  %1971 = vmatpush.msra.mxu1 %v5571_v63  ;;  %v1461_v63 = vpop.f32.mrf.mxu0  ;;  %v1543_v42 = vpop.f32.mrf.mxu2 }
 0x585   :  { %1991 = vmatpush.msra.mxu2 %v4356_v12  ;;  %2011 = vmatpush.msra.mxu3 %v5576_v50  ;;  %v1502_v12 = vpop.f32.mrf.mxu1  ;;  %v1584_v50 = vpop.f32.mrf.mxu3 }
 0x586   :  { %1952 = vmatpush.msra.mxu0 %v4364_v38  ;;  %1972 = vmatpush.msra.mxu1 %v5572_v54 }
 0x587   :  { %1992 = vmatpush.msra.mxu2 %v5573_v49  ;;  %2012 = vmatpush.msra.mxu3 %v4386_v59 }
 0x588   :  { %1953 = vmatpush.msra.mxu0 %v4378_v39  ;;  %1973 = vmatpush.msra.mxu1 %v4380_v53 }
 0x589   :  { %1993 = vmatpush.msra.mxu2 %v5575_v44  ;;  %2013 = vmatpush.msra.mxu3 %v4394_v62 }
 0x58c   :  { %v4534_v13 = vpop.f32.mrf.mxu0  ;;  %v4538_v54 = vpop.f32.mrf.mxu2 }
 0x58d   :  { %5577 = vst [vmem:[#allocation24_spill] sm:$0xff] %v4534_v13  ;;  %v4536_v38 = vpop.f32.mrf.mxu1  ;;  %v4540_v49 = vpop.f32.mrf.mxu3 }
 0x58e   :  { %5578 = vst [vmem:[#allocation25_spill] sm:$0xff] %v4536_v38 }
 0x58f   :  { %5579 = vst [vmem:[#allocation27_spill] sm:$0xff] %v4538_v54 }
 0x590   :  { %5580 = vst [vmem:[#allocation28_spill] sm:$0xff] %v4540_v49 }
 0x594   :  { %v4542_v59 = vpop.f32.mrf.mxu0  ;;  %v4546_v53 = vpop.f32.mrf.mxu2 }
 0x595   :  { %5581 = vst [vmem:[#allocation29_spill] sm:$0xff] %v4542_v59  ;;  %v4544_v39 = vpop.f32.mrf.mxu1  ;;  %v4548_v44 = vpop.f32.mrf.mxu3 }
 0x596   :  { %5582 = vst [vmem:[#allocation30_spill] sm:$0xff] %v4544_v39 }
 0x597   :  { %5583 = vst [vmem:[#allocation31_spill] sm:$0xff] %v4546_v53 }
 0x598   :  { %5584 = vst [vmem:[#allocation32_spill] sm:$0xff] %v4548_v44 }
 0x59c   :  { %v4550_v62 = vpop.f32.mrf.mxu0  ;;  %v4554_v40 = vpop.f32.mrf.mxu2 }
 0x59d   :  { %5585 = vst [vmem:[#allocation33_spill] sm:$0xff] %v4550_v62  ;;  %v4552_v51 = vpop.f32.mrf.mxu1  ;;  %v4556_v13 = vpop.f32.mrf.mxu3 }
 0x59e   :  { %5586 = vst [vmem:[#allocation34_spill] sm:$0xff] %v4552_v51 }
 0x59f   :  { %5587 = vst [vmem:[#allocation35_spill] sm:$0xff] %v4554_v40 }
 0x5a0   :  { %5588 = vst [vmem:[#allocation36_spill] sm:$0xff] %v4556_v13 }
 0x5a4   :  { %v4558_v38 = vpop.f32.mrf.mxu0  ;;  %v4562_v49 = vpop.f32.mrf.mxu2 }
 0x5a5   :  { %5589 = vst [vmem:[#allocation37_spill] sm:$0xff] %v4558_v38  ;;  %v4560_v54 = vpop.f32.mrf.mxu1  ;;  %v4564_v59 = vpop.f32.mrf.mxu3 }
 0x5a6   :  { %5590 = vst [vmem:[#allocation38_spill] sm:$0xff] %v4560_v54 }
 0x5a7   :  { %5591 = vst [vmem:[#allocation56_spill] sm:$0xff] %v4562_v49 }
 0x5a8   :  { %5592 = vst [vmem:[#allocation57_spill] sm:$0xff] %v4564_v59 }
 0x5ac   :  { %v4566_v39 = vpop.f32.mrf.mxu0  ;;  %v4570_v44 = vpop.f32.mrf.mxu2 }
 0x5ad   :  { %5593 = vst [vmem:[#allocation69_spill] sm:$0xff] %v4566_v39  ;;  %v4568_v53 = vpop.f32.mrf.mxu1  ;;  %v4572_v62 = vpop.f32.mrf.mxu3 }
 0x5ae   :  { %5594 = vst [vmem:[#allocation58_spill] sm:$0xff] %v4568_v53  ;;  %v1704_v53 = vld [vmem:[%s5145_s6] sm:$0xf] }
 0x5af   :  { %5595 = vst [vmem:[#allocation59_spill] sm:$0xff] %v4570_v44  ;;  %v4599_v41 = vperm.slane %v1704_v53, 2  ;;  %v4601_v43 = vperm.slane %v1704_v53, 3 }
 0x5b0   :  { %5596 = vst [vmem:[#allocation60_spill] sm:$0xff] %v4572_v62  ;;  %v4593_v62 = vperm.slane %v1704_v53, 0 }
 0x5b2   :  { %5605 = vst [vmem:[#allocation65_spill] sm:$0xff] %v4593_v62 }
 0x5b4   :  { %v4574_v51 = vpop.f32.mrf.mxu0  ;;  %v4578_v13 = vpop.f32.mrf.mxu2 }
 0x5b5   :  { %5597 = vst [vmem:[#allocation61_spill] sm:$0xff] %v4574_v51  ;;  %v4576_v40 = vpop.f32.mrf.mxu1  ;;  %v4580_v38 = vpop.f32.mrf.mxu3  ;;  %v4595_v51 = vperm.slane %v1704_v53, 1 }
 0x5b6   :  { %5598 = vst [vmem:[#allocation62_spill] sm:$0xff] %v4576_v40 }
 0x5b7   :  { %5599 = vst [vmem:[#allocation63_spill] sm:$0xff] %v4578_v13 }
 0x5b8   :  { %5600 = vst [vmem:[#allocation70_spill] sm:$0xff] %v4580_v38 }
 0x5b9   :  { %5606 = vst [vmem:[#allocation66_spill] sm:$0xff] %v4595_v51 }
 0x5dd   :  { %v4582_v54 = vpop.f32.mrf.mxu0  ;;  %v4584_v49 = vpop.f32.mrf.mxu1 }
 0x5de   :  { %5601 = vst [vmem:[#allocation40_spill] sm:$0xff] %v4582_v54 }
 0x5df   :  { %5602 = vst [vmem:[#allocation41_spill] sm:$0xff] %v4584_v49 }
 0x5e4   :  { %v4589_v39 = vpop.f32.mrf.mxu2  ;;  %v4591_v44 = vpop.f32.mrf.mxu3 }
 0x5e5   :  { %5603 = vst [vmem:[#allocation26_spill] sm:$0xff] %v4589_v39  ;;  %v1726_v40 = vpop.f32.mrf.mxu0  ;;  %v1746_v13 = vpop.f32.mrf.mxu1 }
 0x5e6   :  { %5604 = vst [vmem:[#allocation64_spill] sm:$0xff] %v4591_v44  ;;  %v1789_v59 = vadd.f32 %v1726_v40, %v1461_v63  ;;  %v1790_v38 = vadd.f32 %v1746_v13, %v1502_v12 }
 0x5e8   :  { %v1802_v54 = vadd.f32 %v4593_v62, %v1789_v59  ;;  %v1803_v49 = vadd.f32 %v4595_v51, %v1790_v38 }
 0x5ea   :  { %v1806_v0 = vmul.f32 0.5, %v1802_v54  ;;  %v1810_v52 = vmul.f32 0.5, %v1803_v49 }
 0x5ec   :  { %2753 = vtanh.f32 %v1806_v0  ;;  %v1766_v44 = vpop.f32.mrf.mxu2  ;;  %v1786_v39 = vpop.f32.mrf.mxu3 }
 0x5ed   :  { %2755 = vtanh.f32 %v1810_v52  ;;  %v1791_v56 = vadd.f32 %v1766_v44, %v1543_v42  ;;  %v1792_v45 = vadd.f32 %v1786_v39, %v1584_v50  ;;  %v5610_v42 = vld [vmem:[#allocation45_spill] sm:$0xff]  ;;  %v5611_v50 = vld [vmem:[#allocation46_spill] sm:$0xff] }
 0x5ef   :  { %v1804_v36 = vadd.f32 %v4599_v41, %v1791_v56  ;;  %v1805_v12 = vadd.f32 %v4601_v43, %v1792_v45  ;;  %v5608_v56 = vld [vmem:[#allocation47_spill] sm:$0xff] }
 0x5f1   :  { %2757 = vtanh.f32 %v1804_v36  ;;  %v1815_v59 = vmul.f32 0.5, %v1805_v12  ;;  %v5612_v12 = vld [vmem:[#allocation51_spill] sm:$0xff] }
 0x5f2   :  { %v2754_v13 = vpop.eup %2753 }
 0x5f3   :  { %v2756_v38 = vpop.eup %2755  ;;  %v1808_v40 = vmul.f32 0.5, %v2754_v13  ;;  %2759 = vtanh.f32 %v1815_v59  ;;  %v5613_v59 = vld [vmem:[#allocation48_spill] sm:$0xff]  ;;  %v5614_v13 = vld [vmem:[#allocation49_spill] sm:$0xff] }
 0x5f4   :  { %v1812_v63 = vmul.f32 0.5, %v2756_v38  ;;  %v5615_v38 = vld [vmem:[#allocation50_spill] sm:$0xff] }
 0x5f5   :  { %v1809_v54 = vadd.f32 0.5, %v1808_v40  ;;  %v5616_v40 = vld [vmem:[#allocation54_spill] sm:$0xff] }
 0x5f6   :  { %v1813_v53 = vadd.f32 0.5, %v1812_v63  ;;  %v5617_v63 = vld [vmem:[#allocation68_spill] sm:$0xff] }
 0x5f7   :  { %v2758_v49 = vpop.eup %2757 }
 0x5f8   :  { %v1819_v0 = vmul.f32 0.0, %v1813_v53  ;;  %v1820_v51 = vmul.f32 %v2758_v49, %v1809_v54  ;;  %v5618_v54 = vld [vmem:[#allocation52_spill] sm:$0xff]  ;;  %v5619_v53 = vld [vmem:[#allocation53_spill] sm:$0xff]  ;;  %v5620_v49 = vld [vmem:[#allocation18_spill] sm:$0xff] }
 0x5f9   :  { %v2760_v62 = vpop.eup %2759 }
 0x5fa   :  { %v4605_v52 = vadd.f32 %v1820_v51, %v1819_v0  ;;  %v1817_v44 = vmul.f32 0.5, %v2760_v62  ;;  %v5607_v62 = vld [vmem:[#allocation39_spill] sm:$0xff]  ;;  %v5609_v51 = vld [vmem:[#allocation44_spill] sm:$0xff] }
 0x5fb   :  { %v5621_v0 = vld [vmem:[#allocation55_spill] sm:$0xff] }
 0x5fc   :  { %2761 = vtanh.f32 %v4605_v52  ;;  %v1818_v39 = vadd.f32 0.5, %v1817_v44  ;;  %v5622_v44 = vld [vmem:[#allocation42_spill] sm:$0xff] }
 0x602   :  { %v2762_v45 = vpop.eup %2761 }
 0x603   :  { %v1823_v36 = vmul.f32 %v2762_v45, %v1818_v39  ;;  %v5623_v39 = vld [vmem:[#allocation43_spill] sm:$0xff]  ;;  %v5624_v45 = vld [vmem:[#allocation22_spill] sm:$0xff] }
 0x605   :  { %1844 = vmatmul.f32.vlgmr.msrb.gmra.mxu0 %v1823_v36  ;;  %1864 = vmatmul.f32.vlgmr.msrb.gmra.mxu1 %v1823_v36 }
 0x606   :  { %1884 = vmatmul.f32.vlgmr.msrb.gmra.mxu2 %v1823_v36  ;;  %1904 = vmatmul.f32.vlgmr.msrb.gmra.mxu3 %v1823_v36  ;;  %v5625_v36 = vld [vmem:[#allocation19_spill] sm:$0xff] }
 0x607   :  { %2048 = vmatpush.msrb.mxu0 %v4185_v21  ;;  %2068 = vmatpush.msrb.mxu1 %v4187_v32 }
 0x608   :  { %2088 = vmatpush.msrb.mxu2 %v4189_v15  ;;  %2108 = vmatpush.msrb.mxu3 %v4200_v18 }
 0x609   :  { %2049 = vmatpush.msrb.mxu0 %v4193_v47  ;;  %2069 = vmatpush.msrb.mxu1 %v4195_v46 }
 0x60a   :  { %2089 = vmatpush.msrb.mxu2 %v4197_v17  ;;  %2109 = vmatpush.msrb.mxu3 %v4210_v14 }
 0x60b   :  { %2050 = vmatpush.msrb.mxu0 %v4202_v22  ;;  %2070 = vmatpush.msrb.mxu1 %v4204_v48 }
 0x60c   :  { %2090 = vmatpush.msrb.mxu2 %v4208_v16  ;;  %2110 = vmatpush.msrb.mxu3 %v4226_v11 }
 0x60d   :  { %2051 = vmatpush.msrb.mxu0 %v4218_v19  ;;  %2071 = vmatpush.msrb.mxu1 %v4220_v20 }
 0x60e   :  { %2091 = vmatpush.msrb.mxu2 %v4224_v57  ;;  %2111 = vmatpush.msrb.mxu3 %v4238_v55 }
 0x60f   :  { %2052 = vmatpush.msrb.mxu0 %v4230_v26  ;;  %2072 = vmatpush.msrb.mxu1 %v4232_v61 }
 0x610   :  { %2092 = vmatpush.msrb.mxu2 %v4236_v60  ;;  %2112 = vmatpush.msrb.mxu3 %v4250_v4 }
 0x611   :  { %2053 = vmatpush.msrb.mxu0 %v4242_v1  ;;  %2073 = vmatpush.msrb.mxu1 %v4244_v2 }
 0x612   :  { %2093 = vmatpush.msrb.mxu2 %v4248_v3  ;;  %2113 = vmatpush.msrb.mxu3 %v4279_v58 }
 0x613   :  { %2054 = vmatpush.msrb.mxu0 %v4258_v5  ;;  %2074 = vmatpush.msrb.mxu1 %v4260_v6 }
 0x614   :  { %2094 = vmatpush.msrb.mxu2 %v4264_v7  ;;  %2114 = vmatpush.msrb.mxu3 %v4290_v23 }
 0x615   :  { %2055 = vmatpush.msrb.mxu0 %v4282_v8  ;;  %2075 = vmatpush.msrb.mxu1 %v4284_v9 }
 0x616   :  { %2095 = vmatpush.msrb.mxu2 %v4286_v10  ;;  %2115 = vmatpush.msrb.mxu3 %v4294_v24 }
 0x617   :  { %2056 = vmatpush.msrb.mxu0 %v4296_v25  ;;  %2076 = vmatpush.msrb.mxu1 %v4298_v27 }
 0x618   :  { %2096 = vmatpush.msrb.mxu2 %v4300_v28  ;;  %2116 = vmatpush.msrb.mxu3 %v4312_v33 }
 0x619   :  { %2057 = vmatpush.msrb.mxu0 %v4305_v29  ;;  %2077 = vmatpush.msrb.mxu1 %v4307_v30 }
 0x61a   :  { %2097 = vmatpush.msrb.mxu2 %v4309_v31  ;;  %2117 = vmatpush.msrb.mxu3 %v4322_v37 }
 0x61b   :  { %2058 = vmatpush.msrb.mxu0 %v4314_v34  ;;  %2078 = vmatpush.msrb.mxu1 %v4316_v35 }
 0x61c   :  { %2098 = vmatpush.msrb.mxu2 %v5607_v62  ;;  %2118 = vmatpush.msrb.mxu3 %v5608_v56  ;;  %v5634_v56 = vld [vmem:[#allocation28_spill] sm:$0xff] }
 0x61d   :  { %2059 = vmatpush.msrb.mxu0 %v5609_v51  ;;  %2079 = vmatpush.msrb.mxu1 %v5610_v42 }
 0x61e   :  { %2099 = vmatpush.msrb.mxu2 %v5611_v50  ;;  %2119 = vmatpush.msrb.mxu3 %v5612_v12  ;;  %v5631_v12 = vld [vmem:[#allocation65_spill] sm:$0xff]  ;;  %v5632_v50 = vld [vmem:[#allocation66_spill] sm:$0xff] }
 0x61f   :  { %2060 = vmatpush.msrb.mxu0 %v5613_v59  ;;  %2080 = vmatpush.msrb.mxu1 %v5614_v13  ;;  %v5629_v13 = vld [vmem:[#allocation24_spill] sm:$0xff]  ;;  %v5630_v59 = vld [vmem:[#allocation25_spill] sm:$0xff] }
 0x620   :  { %2100 = vmatpush.msrb.mxu2 %v5615_v38  ;;  %2120 = vmatpush.msrb.mxu3 %v5616_v40  ;;  %v5626_v38 = vld [vmem:[#allocation20_spill] sm:$0xff]  ;;  %v5627_v40 = vld [vmem:[#allocation21_spill] sm:$0xff] }
 0x621   :  { %2061 = vmatpush.msrb.mxu0 %v5617_v63  ;;  %2081 = vmatpush.msrb.mxu1 %v5618_v54  ;;  %v5628_v63 = vld [vmem:[#allocation23_spill] sm:$0xff] }
 0x622   :  { %2101 = vmatpush.msrb.mxu2 %v5619_v53  ;;  %2121 = vmatpush.msrb.mxu3 %v5620_v49 }
 0x623   :  { %2062 = vmatpush.msrb.mxu0 %v5621_v0  ;;  %2082 = vmatpush.msrb.mxu1 %v5622_v44 }
 0x624   :  { %2102 = vmatpush.msrb.mxu2 %v5623_v39  ;;  %2122 = vmatpush.msrb.mxu3 %v5624_v45 }
 0x625   :  { %2063 = vmatpush.msrb.mxu0 %v5625_v36  ;;  %2083 = vmatpush.msrb.mxu1 %v5626_v38  ;;  %v5633_v38 = vld [vmem:[#allocation27_spill] sm:$0xff] }
 0x626   :  { %2103 = vmatpush.msrb.mxu2 %v5627_v40  ;;  %2123 = vmatpush.msrb.mxu3 %v5628_v63 }
 0x682   :  { %v1845_v54 = vpop.f32.mrf.mxu0  ;;  %v1865_v53 = vpop.f32.mrf.mxu1 }
 0x683   :  { %v1908_v49 = vadd.f32 %v1845_v54, %v5629_v13  ;;  %v1909_v0 = vadd.f32 %v1865_v53, %v5630_v59 }
 0x685   :  { %v1912_v44 = vadd.f32 %v1908_v49, %v5631_v12  ;;  %v1913_v39 = vadd.f32 %v1909_v0, %v5632_v50 }
 0x687   :  { %v1916_v42 = vmul.f32 0.5, %v1912_v44  ;;  %v1920_v45 = vmul.f32 0.5, %v1913_v39 }
 0x689   :  { %2763 = vtanh.f32 %v1916_v42  ;;  %v1885_v36 = vpop.f32.mrf.mxu2  ;;  %v1905_v51 = vpop.f32.mrf.mxu3 }
 0x68a   :  { %2765 = vtanh.f32 %v1920_v45  ;;  %v1910_v40 = vadd.f32 %v1885_v36, %v5633_v38  ;;  %v1911_v63 = vadd.f32 %v1905_v51, %v5634_v56 }
 0x68c   :  { %v1914_v62 = vadd.f32 %v1910_v40, %v4599_v41  ;;  %v1915_v13 = vadd.f32 %v1911_v63, %v4601_v43 }
 0x68e   :  { %2767 = vtanh.f32 %v1914_v62  ;;  %v1925_v59 = vmul.f32 0.5, %v1915_v13 }
 0x68f   :  { %v2764_v54 = vpop.eup %2763 }
 0x690   :  { %v2766_v53 = vpop.eup %2765  ;;  %v1918_v49 = vmul.f32 0.5, %v2764_v54  ;;  %2769 = vtanh.f32 %v1925_v59 }
 0x691   :  { %v1922_v0 = vmul.f32 0.5, %v2766_v53 }
 0x692   :  { %v1919_v44 = vadd.f32 0.5, %v1918_v49 }
 0x693   :  { %v1923_v42 = vadd.f32 0.5, %v1922_v0 }
 0x694   :  { %v2768_v39 = vpop.eup %2767 }
 0x695   :  { %v1929_v45 = vmul.f32 %v1923_v42, %v4605_v52  ;;  %v1930_v50 = vmul.f32 %v2768_v39, %v1919_v44 }
 0x696   :  { %v2770_v38 = vpop.eup %2769 }
 0x697   :  { %v4681_v36 = vadd.f32 %v1930_v50, %v1929_v45  ;;  %v1927_v56 = vmul.f32 0.5, %v2770_v38 }
 0x699   :  { %2771 = vtanh.f32 %v4681_v36  ;;  %v1928_v51 = vadd.f32 0.5, %v1927_v56 }
 0x69f   :  { %v2772_v62 = vpop.eup %2771 }
 0x6a0   :  { %v1933_v40 = vmul.f32 %v2772_v62, %v1928_v51  ;;  %v4760_v51 = vld [vmem:[#allocation10 + $0x1e0] sm:$0xff]  ;;  %v4763_v62 = vld [vmem:[#allocation10 + $0x1e8] sm:$0xff] }
 0x6a2   :  { %1954 = vmatmul.f32.vlgmr.msra.gmra.mxu0 %v1933_v40  ;;  %1974 = vmatmul.f32.vlgmr.msra.gmra.mxu1 %v1933_v40 }
 0x6a3   :  { %1994 = vmatmul.f32.vlgmr.msra.gmra.mxu2 %v1933_v40  ;;  %2014 = vmatmul.f32.vlgmr.msra.gmra.mxu3 %v1933_v40  ;;  %v4769_v40 = vld [vmem:[#allocation10 + $0x1f8] sm:$0xff] }
 0x6a4   :  { %2158 = vmatpush.msra.mxu0 %v4185_v21  ;;  %2178 = vmatpush.msra.mxu1 %v4187_v32  ;;  %v5635_v21 = vld [vmem:[#allocation39_spill] sm:$0xff] }
 0x6a5   :  { %2198 = vmatpush.msra.mxu2 %v4189_v15  ;;  %2218 = vmatpush.msra.mxu3 %v4200_v18  ;;  %v5636_v32 = vld [vmem:[#allocation47_spill] sm:$0xff]  ;;  %v5637_v15 = vld [vmem:[#allocation44_spill] sm:$0xff] }
 0x6a6   :  { %2159 = vmatpush.msra.mxu0 %v4193_v47  ;;  %2179 = vmatpush.msra.mxu1 %v4195_v46  ;;  %v5638_v47 = vld [vmem:[#allocation45_spill] sm:$0xff]  ;;  %v5639_v46 = vld [vmem:[#allocation46_spill] sm:$0xff]  ;;  %v5641_v18 = vld [vmem:[#allocation48_spill] sm:$0xff] }
 0x6a7   :  { %2199 = vmatpush.msra.mxu2 %v4197_v17  ;;  %2219 = vmatpush.msra.mxu3 %v4210_v14  ;;  %v5640_v17 = vld [vmem:[#allocation51_spill] sm:$0xff]  ;;  %v5645_v14 = vld [vmem:[#allocation68_spill] sm:$0xff] }
 0x6a8   :  { %2160 = vmatpush.msra.mxu0 %v4202_v22  ;;  %2180 = vmatpush.msra.mxu1 %v4204_v48  ;;  %v5642_v22 = vld [vmem:[#allocation49_spill] sm:$0xff]  ;;  %v5643_v48 = vld [vmem:[#allocation50_spill] sm:$0xff] }
 0x6a9   :  { %2200 = vmatpush.msra.mxu2 %v4208_v16  ;;  %2220 = vmatpush.msra.mxu3 %v4226_v11  ;;  %v5644_v16 = vld [vmem:[#allocation54_spill] sm:$0xff]  ;;  %v5649_v11 = vld [vmem:[#allocation55_spill] sm:$0xff] }
 0x6aa   :  { %2161 = vmatpush.msra.mxu0 %v4218_v19  ;;  %2181 = vmatpush.msra.mxu1 %v4220_v20  ;;  %v5646_v19 = vld [vmem:[#allocation52_spill] sm:$0xff]  ;;  %v5647_v20 = vld [vmem:[#allocation53_spill] sm:$0xff] }
 0x6ab   :  { %2201 = vmatpush.msra.mxu2 %v4224_v57  ;;  %2221 = vmatpush.msra.mxu3 %v4238_v55  ;;  %v5648_v57 = vld [vmem:[#allocation18_spill] sm:$0xff]  ;;  %v5653_v55 = vld [vmem:[#allocation19_spill] sm:$0xff] }
 0x6ac   :  { %2162 = vmatpush.msra.mxu0 %v4230_v26  ;;  %2182 = vmatpush.msra.mxu1 %v4232_v61  ;;  %v5650_v26 = vld [vmem:[#allocation42_spill] sm:$0xff]  ;;  %v5651_v61 = vld [vmem:[#allocation43_spill] sm:$0xff] }
 0x6ad   :  { %2202 = vmatpush.msra.mxu2 %v4236_v60  ;;  %2222 = vmatpush.msra.mxu3 %v4250_v4  ;;  %v5652_v60 = vld [vmem:[#allocation22_spill] sm:$0xff] }
 0x6ae   :  { %2163 = vmatpush.msra.mxu0 %v4242_v1  ;;  %2183 = vmatpush.msra.mxu1 %v4244_v2  ;;  %v5654_v1 = vld [vmem:[#allocation20_spill] sm:$0xff]  ;;  %v5655_v2 = vld [vmem:[#allocation21_spill] sm:$0xff] }
 0x6af   :  { %2203 = vmatpush.msra.mxu2 %v4248_v3  ;;  %2223 = vmatpush.msra.mxu3 %v4279_v58  ;;  %v5656_v3 = vld [vmem:[#allocation23_spill] sm:$0xff]  ;;  %v5658_v58 = vld [vmem:[#allocation30_spill] sm:$0xff] }
 0x6b0   :  { %2164 = vmatpush.msra.mxu0 %v4258_v5  ;;  %2184 = vmatpush.msra.mxu1 %v4260_v6  ;;  %v5657_v6 = vld [vmem:[#allocation29_spill] sm:$0xff] }
 0x6b1   :  { %2204 = vmatpush.msra.mxu2 %v4264_v7  ;;  %2224 = vmatpush.msra.mxu3 %v4290_v23 }
 0x6b2   :  { %2165 = vmatpush.msra.mxu0 %v4282_v8  ;;  %2185 = vmatpush.msra.mxu1 %v4284_v9 }
 0x6b3   :  { %2205 = vmatpush.msra.mxu2 %v4286_v10  ;;  %2225 = vmatpush.msra.mxu3 %v4294_v24  ;;  %v5659_v10 = vld [vmem:[#allocation66_spill] sm:$0xff] }
 0x6b4   :  { %2166 = vmatpush.msra.mxu0 %v4296_v25  ;;  %2186 = vmatpush.msra.mxu1 %v4298_v27 }
 0x6b5   :  { %2206 = vmatpush.msra.mxu2 %v4300_v28  ;;  %2226 = vmatpush.msra.mxu3 %v4312_v33 }
 0x6b6   :  { %2167 = vmatpush.msra.mxu0 %v4305_v29  ;;  %2187 = vmatpush.msra.mxu1 %v4307_v30  ;;  %v5660_v29 = vld [vmem:[#allocation31_spill] sm:$0xff] }
 0x6b7   :  { %2207 = vmatpush.msra.mxu2 %v4309_v31  ;;  %2227 = vmatpush.msra.mxu3 %v4322_v37  ;;  %v5661_v31 = vld [vmem:[#allocation32_spill] sm:$0xff] }
 0x6b8   :  { %2168 = vmatpush.msra.mxu0 %v4314_v34  ;;  %2188 = vmatpush.msra.mxu1 %v4316_v35 }
 0x6b9   :  { %2208 = vmatpush.msra.mxu2 %v5635_v21  ;;  %2228 = vmatpush.msra.mxu3 %v5636_v32  ;;  %v4772_v21 = vld [vmem:[#allocation10 + $0x1c0] sm:$0xff]  ;;  %v4775_v32 = vld [vmem:[#allocation10 + $0x1c8] sm:$0xff] }
 0x6ba   :  { %2169 = vmatpush.msra.mxu0 %v5637_v15  ;;  %2189 = vmatpush.msra.mxu1 %v5638_v47  ;;  %v4778_v15 = vld [vmem:[#allocation10 + $0x1d0] sm:$0xff]  ;;  %v4781_v47 = vld [vmem:[#allocation10 + $0x1d8] sm:$0xff] }
 0x6bb   :  { %2209 = vmatpush.msra.mxu2 %v5639_v46  ;;  %2229 = vmatpush.msra.mxu3 %v5640_v17  ;;  %v4784_v46 = vld [vmem:[#allocation10 + $0x1a0] sm:$0xff]  ;;  %v4787_v17 = vld [vmem:[#allocation10 + $0x1a8] sm:$0xff] }
 0x6bc   :  { %2170 = vmatpush.msra.mxu0 %v5641_v18  ;;  %2190 = vmatpush.msra.mxu1 %v5642_v22  ;;  %v4790_v18 = vld [vmem:[#allocation10 + $0x1b0] sm:$0xff]  ;;  %v4793_v22 = vld [vmem:[#allocation10 + $0x1b8] sm:$0xff] }
 0x6bd   :  { %2210 = vmatpush.msra.mxu2 %v5643_v48  ;;  %2230 = vmatpush.msra.mxu3 %v5644_v16  ;;  %v4796_v48 = vld [vmem:[#allocation10 + $0x180] sm:$0xff]  ;;  %v4799_v16 = vld [vmem:[#allocation10 + $0x188] sm:$0xff] }
 0x6be   :  { %2171 = vmatpush.msra.mxu0 %v5645_v14  ;;  %2191 = vmatpush.msra.mxu1 %v5646_v19  ;;  %v4802_v14 = vld [vmem:[#allocation10 + $0x190] sm:$0xff]  ;;  %v4805_v19 = vld [vmem:[#allocation10 + $0x198] sm:$0xff] }
 0x6bf   :  { %2211 = vmatpush.msra.mxu2 %v5647_v20  ;;  %2231 = vmatpush.msra.mxu3 %v5648_v57  ;;  %v4808_v20 = vld [vmem:[#allocation10 + $0x160] sm:$0xff]  ;;  %v4811_v57 = vld [vmem:[#allocation10 + $0x168] sm:$0xff] }
 0x6c0   :  { %2172 = vmatpush.msra.mxu0 %v5649_v11  ;;  %2192 = vmatpush.msra.mxu1 %v5650_v26  ;;  %v4814_v11 = vld [vmem:[#allocation10 + $0x170] sm:$0xff]  ;;  %v4817_v26 = vld [vmem:[#allocation10 + $0x178] sm:$0xff] }
 0x6c1   :  { %2212 = vmatpush.msra.mxu2 %v5651_v61  ;;  %2232 = vmatpush.msra.mxu3 %v5652_v60  ;;  %v4820_v61 = vld [vmem:[#allocation10 + $0x140] sm:$0xff]  ;;  %v4823_v60 = vld [vmem:[#allocation10 + $0x148] sm:$0xff] }
 0x6c2   :  { %2173 = vmatpush.msra.mxu0 %v5653_v55  ;;  %2193 = vmatpush.msra.mxu1 %v5654_v1  ;;  %v4826_v55 = vld [vmem:[#allocation10 + $0x150] sm:$0xff]  ;;  %v4829_v1 = vld [vmem:[#allocation10 + $0x158] sm:$0xff] }
 0x6c3   :  { %2213 = vmatpush.msra.mxu2 %v5655_v2  ;;  %2233 = vmatpush.msra.mxu3 %v5656_v3  ;;  %v4832_v2 = vld [vmem:[#allocation10 + $0x120] sm:$0xff] }
 0x71f   :  { %v1955_v4 = vpop.f32.mrf.mxu0  ;;  %v1975_v5 = vpop.f32.mrf.mxu1 }
 0x720   :  { %v2018_v7 = vadd.f32 %v1955_v4, %v5657_v6  ;;  %v2019_v8 = vadd.f32 %v1975_v5, %v5658_v58  ;;  %v4835_v4 = vld [vmem:[#allocation10 + $0x128] sm:$0xff]  ;;  %v4838_v5 = vld [vmem:[#allocation10 + $0x130] sm:$0xff]  ;;  %v4841_v6 = vld [vmem:[#allocation10 + $0x138] sm:$0xff] }
 0x721   :  { %v4847_v58 = vld [vmem:[#allocation10 + $0x108] sm:$0xff] }
 0x722   :  { %v2022_v9 = vadd.f32 %v2018_v7, %v5631_v12  ;;  %v2023_v23 = vadd.f32 %v2019_v8, %v5659_v10  ;;  %v4844_v7 = vld [vmem:[#allocation10 + $0x100] sm:$0xff]  ;;  %v4850_v8 = vld [vmem:[#allocation10 + $0x110] sm:$0xff] }
 0x724   :  { %v2026_v24 = vmul.f32 0.5, %v2022_v9  ;;  %v2030_v25 = vmul.f32 0.5, %v2023_v23  ;;  %v4853_v9 = vld [vmem:[#allocation10 + $0x118] sm:$0xff]  ;;  %v4856_v23 = vld [vmem:[#allocation10 + $0xe0] sm:$0xff] }
 0x726   :  { %2773 = vtanh.f32 %v2026_v24  ;;  %v1995_v27 = vpop.f32.mrf.mxu2  ;;  %v2015_v28 = vpop.f32.mrf.mxu3  ;;  %v4859_v24 = vld [vmem:[#allocation10 + $0xe8] sm:$0xff] }
 0x727   :  { %2775 = vtanh.f32 %v2030_v25  ;;  %v2020_v30 = vadd.f32 %v1995_v27, %v5660_v29  ;;  %v2021_v33 = vadd.f32 %v2015_v28, %v5661_v31  ;;  %v4862_v25 = vld [vmem:[#allocation10 + $0xf0] sm:$0xff]  ;;  %v4865_v27 = vld [vmem:[#allocation10 + $0xf8] sm:$0xff]  ;;  %v4868_v28 = vld [vmem:[#allocation10 + $0xc0] sm:$0xff] }
 0x728   :  { %v4871_v29 = vld [vmem:[#allocation10 + $0xc8] sm:$0xff]  ;;  %v4877_v31 = vld [vmem:[#allocation10 + $0xd8] sm:$0xff] }
 0x729   :  { %v2024_v34 = vadd.f32 %v2020_v30, %v4599_v41  ;;  %v2025_v35 = vadd.f32 %v2021_v33, %v4601_v43  ;;  %v4874_v30 = vld [vmem:[#allocation10 + $0xd0] sm:$0xff]  ;;  %v4880_v33 = vld [vmem:[#allocation10 + $0xa0] sm:$0xff] }
 0x72b   :  { %2777 = vtanh.f32 %v2024_v34  ;;  %v2035_v37 = vmul.f32 0.5, %v2025_v35  ;;  %v4883_v34 = vld [vmem:[#allocation10 + $0xa8] sm:$0xff]  ;;  %v4886_v35 = vld [vmem:[#allocation10 + $0xb0] sm:$0xff] }
 0x72c   :  { %v2774_v52 = vpop.eup %2773  ;;  %5662 = vst [vmem:[#allocation67_spill] sm:$0xff] %v4886_v35 }
 0x72d   :  { %v2776_v50 = vpop.eup %2775  ;;  %v2028_v63 = vmul.f32 0.5, %v2774_v52  ;;  %2779 = vtanh.f32 %v2035_v37  ;;  %v4889_v37 = vld [vmem:[#allocation10 + $0xb8] sm:$0xff]  ;;  %v4892_v52 = vld [vmem:[#allocation10 + $0x80] sm:$0xff] }
 0x72e   :  { %v2032_v13 = vmul.f32 0.5, %v2776_v50  ;;  %5663 = vst [vmem:[#allocation24_spill] sm:$0xff] %v4889_v37  ;;  %v4895_v50 = vld [vmem:[#allocation10 + $0x88] sm:$0xff] }
 0x72f   :  { %v2029_v59 = vadd.f32 0.5, %v2028_v63  ;;  %5664 = vst [vmem:[#allocation25_spill] sm:$0xff] %v4892_v52  ;;  %v4898_v63 = vld [vmem:[#allocation10 + $0x90] sm:$0xff] }
 0x730   :  { %v2033_v54 = vadd.f32 0.5, %v2032_v13  ;;  %5665 = vst [vmem:[#allocation65_spill] sm:$0xff] %v4895_v50  ;;  %v4901_v13 = vld [vmem:[#allocation10 + $0x98] sm:$0xff] }
 0x731   :  { %v2778_v53 = vpop.eup %2777  ;;  %5666 = vst [vmem:[#allocation27_spill] sm:$0xff] %v4898_v63 }
 0x732   :  { %v2039_v49 = vmul.f32 %v2033_v54, %v4681_v36  ;;  %v2040_v0 = vmul.f32 %v2778_v53, %v2029_v59  ;;  %v4766_v36 = vld [vmem:[#allocation10 + $0x1f0] sm:$0xff]  ;;  %5667 = vst [vmem:[#allocation28_spill] sm:$0xff] %v4901_v13  ;;  %v4904_v59 = vld [vmem:[#allocation10 + $0x60] sm:$0xff]  ;;  %v4907_v54 = vld [vmem:[#allocation10 + $0x68] sm:$0xff] }
 0x733   :  { %v2780_v44 = vpop.eup %2779  ;;  %5668 = vst [vmem:[#allocation39_spill] sm:$0xff] %v4904_v59  ;;  %v4910_v53 = vld [vmem:[#allocation10 + $0x70] sm:$0xff] }
 0x734   :  { %v4757_v42 = vadd.f32 %v2040_v0, %v2039_v49  ;;  %v2037_v39 = vmul.f32 0.5, %v2780_v44  ;;  %5669 = vst [vmem:[#allocation47_spill] sm:$0xff] %v4907_v54  ;;  %v4913_v49 = vld [vmem:[#allocation10 + $0x78] sm:$0xff]  ;;  %v4916_v0 = vld [vmem:[#allocation10 + $0x40] sm:$0xff]  ;;  %v4919_v44 = vld [vmem:[#allocation10 + $0x48] sm:$0xff] }
 0x735   :  { %5670 = vst [vmem:[#allocation44_spill] sm:$0xff] %v4910_v53 }
 0x736   :  { %2781 = vtanh.f32 %v4757_v42  ;;  %v2038_v45 = vadd.f32 0.5, %v2037_v39  ;;  %5671 = vst [vmem:[#allocation45_spill] sm:$0xff] %v4913_v49  ;;  %v4922_v39 = vld [vmem:[#allocation10 + $0x50] sm:$0xff] }
 0x737   :  { %5672 = vst [vmem:[#allocation46_spill] sm:$0xff] %v4916_v0 }
 0x738   :  { %5673 = vst [vmem:[#allocation51_spill] sm:$0xff] %v4919_v44 }
 0x739   :  { %5674 = vst [vmem:[#allocation48_spill] sm:$0xff] %v4922_v39 }
 0x73c   :  { %v2782_v38 = vpop.eup %2781 }
 0x73d   :  { %v2043_v56 = vmul.f32 %v2782_v38, %v2038_v45  ;;  %v4925_v45 = vld [vmem:[#allocation10 + $0x58] sm:$0xff]  ;;  %v4928_v38 = vld [vmem:[#allocation10 + $0x20] sm:$0xff] }
 0x73e   :  { %5675 = vst [vmem:[#allocation49_spill] sm:$0xff] %v4925_v45 }
 0x73f   :  { %2064 = vmatmul.f32.vlgmr.msrb.gmra.mxu0 %v2043_v56  ;;  %2084 = vmatmul.f32.vlgmr.msrb.gmra.mxu1 %v2043_v56  ;;  %5676 = vst [vmem:[#allocation50_spill] sm:$0xff] %v4928_v38 }
 0x740   :  { %2104 = vmatmul.f32.vlgmr.msrb.gmra.mxu2 %v2043_v56  ;;  %2124 = vmatmul.f32.vlgmr.msrb.gmra.mxu3 %v2043_v56  ;;  %v4931_v56 = vld [vmem:[#allocation10 + $0x28] sm:$0xff] }
 0x741   :  { %2268 = vmatpush.msrb.mxu0 %v4760_v51  ;;  %2288 = vmatpush.msrb.mxu1 %v4763_v62  ;;  %5677 = vst [vmem:[#allocation54_spill] sm:$0xff] %v4931_v56 }
 0x742   :  { %2308 = vmatpush.msrb.mxu2 %v4766_v36  ;;  %2328 = vmatpush.msrb.mxu3 %v4769_v40 }
 0x743   :  { %2269 = vmatpush.msrb.mxu0 %v4772_v21  ;;  %2289 = vmatpush.msrb.mxu1 %v4775_v32 }
 0x744   :  { %2309 = vmatpush.msrb.mxu2 %v4778_v15  ;;  %2329 = vmatpush.msrb.mxu3 %v4781_v47 }
 0x745   :  { %2270 = vmatpush.msrb.mxu0 %v4784_v46  ;;  %2290 = vmatpush.msrb.mxu1 %v4787_v17 }
 0x746   :  { %2310 = vmatpush.msrb.mxu2 %v4790_v18  ;;  %2330 = vmatpush.msrb.mxu3 %v4793_v22 }
 0x747   :  { %2271 = vmatpush.msrb.mxu0 %v4796_v48  ;;  %2291 = vmatpush.msrb.mxu1 %v4799_v16 }
 0x748   :  { %2311 = vmatpush.msrb.mxu2 %v4802_v14  ;;  %2331 = vmatpush.msrb.mxu3 %v4805_v19 }
 0x749   :  { %2272 = vmatpush.msrb.mxu0 %v4808_v20  ;;  %2292 = vmatpush.msrb.mxu1 %v4811_v57 }
 0x74a   :  { %2312 = vmatpush.msrb.mxu2 %v4814_v11  ;;  %2332 = vmatpush.msrb.mxu3 %v4817_v26 }
 0x74b   :  { %2273 = vmatpush.msrb.mxu0 %v4820_v61  ;;  %2293 = vmatpush.msrb.mxu1 %v4823_v60 }
 0x74c   :  { %2313 = vmatpush.msrb.mxu2 %v4826_v55  ;;  %2333 = vmatpush.msrb.mxu3 %v4829_v1 }
 0x74d   :  { %2274 = vmatpush.msrb.mxu0 %v4832_v2  ;;  %2294 = vmatpush.msrb.mxu1 %v4835_v4 }
 0x74e   :  { %2314 = vmatpush.msrb.mxu2 %v4838_v5  ;;  %2334 = vmatpush.msrb.mxu3 %v4841_v6 }
 0x74f   :  { %2275 = vmatpush.msrb.mxu0 %v4844_v7  ;;  %2295 = vmatpush.msrb.mxu1 %v4847_v58 }
 0x750   :  { %2315 = vmatpush.msrb.mxu2 %v4850_v8  ;;  %2335 = vmatpush.msrb.mxu3 %v4853_v9 }
 0x751   :  { %2276 = vmatpush.msrb.mxu0 %v4856_v23  ;;  %2296 = vmatpush.msrb.mxu1 %v4859_v24 }
 0x752   :  { %2316 = vmatpush.msrb.mxu2 %v4862_v25  ;;  %2336 = vmatpush.msrb.mxu3 %v4865_v27 }
 0x753   :  { %2277 = vmatpush.msrb.mxu0 %v4868_v28  ;;  %2297 = vmatpush.msrb.mxu1 %v4871_v29 }
 0x754   :  { %2317 = vmatpush.msrb.mxu2 %v4874_v30  ;;  %2337 = vmatpush.msrb.mxu3 %v4877_v31 }
 0x755   :  { %2278 = vmatpush.msrb.mxu0 %v4880_v33  ;;  %2298 = vmatpush.msrb.mxu1 %v4883_v34 }
 0x756   :  { %2318 = vmatpush.msrb.mxu2 %v4886_v35  ;;  %2338 = vmatpush.msrb.mxu3 %v4889_v37  ;;  %v5686_v37 = vld [vmem:[#allocation36_spill] sm:$0xff] }
 0x757   :  { %2279 = vmatpush.msrb.mxu0 %v4892_v52  ;;  %2299 = vmatpush.msrb.mxu1 %v4895_v50  ;;  %v5685_v52 = vld [vmem:[#allocation35_spill] sm:$0xff] }
 0x758   :  { %2319 = vmatpush.msrb.mxu2 %v4898_v63  ;;  %2339 = vmatpush.msrb.mxu3 %v4901_v13 }
 0x759   :  { %2280 = vmatpush.msrb.mxu0 %v4904_v59  ;;  %2300 = vmatpush.msrb.mxu1 %v4907_v54  ;;  %v5684_v54 = vld [vmem:[#allocation34_spill] sm:$0xff] }
 0x75a   :  { %2320 = vmatpush.msrb.mxu2 %v4910_v53  ;;  %2340 = vmatpush.msrb.mxu3 %v4913_v49  ;;  %v5683_v49 = vld [vmem:[#allocation33_spill] sm:$0xff] }
 0x75b   :  { %2281 = vmatpush.msrb.mxu0 %v4916_v0  ;;  %2301 = vmatpush.msrb.mxu1 %v4919_v44  ;;  %v4934_v0 = vld [vmem:[#allocation10 + $0x30] sm:$0xff]  ;;  %v4937_v44 = vld [vmem:[#allocation10 + $0x38] sm:$0xff] }
 0x75c   :  { %2321 = vmatpush.msrb.mxu2 %v4922_v39  ;;  %2341 = vmatpush.msrb.mxu3 %v4925_v45  ;;  %5678 = vst [vmem:[#allocation68_spill] sm:$0xff] %v4934_v0  ;;  %v4940_v39 = vld [vmem:[#allocation10] sm:$0xff]  ;;  %v4943_v45 = vld [vmem:[#allocation10 + $0x8] sm:$0xff] }
 0x75d   :  { %2282 = vmatpush.msrb.mxu0 %v4928_v38  ;;  %2302 = vmatpush.msrb.mxu1 %v4931_v56  ;;  %5679 = vst [vmem:[#allocation52_spill] sm:$0xff] %v4937_v44  ;;  %v4946_v38 = vld [vmem:[#allocation10 + $0x10] sm:$0xff] }
 0x75e   :  { %2322 = vmatpush.msrb.mxu2 %v4934_v0  ;;  %2342 = vmatpush.msrb.mxu3 %v4937_v44  ;;  %5680 = vst [vmem:[#allocation53_spill] sm:$0xff] %v4940_v39 }
 0x75f   :  { %2283 = vmatpush.msrb.mxu0 %v4940_v39  ;;  %5681 = vst [vmem:[#allocation18_spill] sm:$0xff] %v4943_v45  ;;  %2303 = vmatpush.msrb.mxu1 %v4943_v45 }
 0x760   :  { %5682 = vst [vmem:[#allocation55_spill] sm:$0xff] %v4946_v38  ;;  %2323 = vmatpush.msrb.mxu2 %v4946_v38  ;;  %2343 = vmatpush.msrb.mxu3 %v5656_v3 }
 0x7bc   :  { %v2065_v56 = vpop.f32.mrf.mxu0  ;;  %v2085_v0 = vpop.f32.mrf.mxu1 }
 0x7bd   :  { %v2128_v53 = vadd.f32 %v2065_v56, %v5683_v49  ;;  %v2129_v44 = vadd.f32 %v2085_v0, %v5684_v54 }
 0x7bf   :  { %v2132_v59 = vadd.f32 %v2128_v53, %v5631_v12  ;;  %v2133_v39 = vadd.f32 %v2129_v44, %v5659_v10 }
 0x7c1   :  { %v2136_v13 = vmul.f32 0.5, %v2132_v59  ;;  %v2140_v63 = vmul.f32 0.5, %v2133_v39 }
 0x7c3   :  { %2783 = vtanh.f32 %v2136_v13  ;;  %v2105_v45 = vpop.f32.mrf.mxu2  ;;  %v2125_v50 = vpop.f32.mrf.mxu3 }
 0x7c4   :  { %2785 = vtanh.f32 %v2140_v63  ;;  %v2130_v38 = vadd.f32 %v2105_v45, %v5685_v52  ;;  %v2131_v3 = vadd.f32 %v2125_v50, %v5686_v37 }
 0x7c6   :  { %v2134_v35 = vadd.f32 %v2130_v38, %v4599_v41  ;;  %v2135_v49 = vadd.f32 %v2131_v3, %v4601_v43  ;;  %v5689_v3 = vld [vmem:[#allocation25_spill] sm:$0xff] }
 0x7c8   :  { %2787 = vtanh.f32 %v2134_v35  ;;  %v2145_v54 = vmul.f32 0.5, %v2135_v49  ;;  %v5690_v49 = vld [vmem:[#allocation65_spill] sm:$0xff] }
 0x7c9   :  { %v2784_v0 = vpop.eup %2783 }
 0x7ca   :  { %v2786_v53 = vpop.eup %2785  ;;  %v2138_v56 = vmul.f32 0.5, %v2784_v0  ;;  %2789 = vtanh.f32 %v2145_v54  ;;  %v5691_v54 = vld [vmem:[#allocation27_spill] sm:$0xff]  ;;  %v5692_v0 = vld [vmem:[#allocation28_spill] sm:$0xff] }
 0x7cb   :  { %v2142_v44 = vmul.f32 0.5, %v2786_v53  ;;  %v5693_v53 = vld [vmem:[#allocation39_spill] sm:$0xff] }
 0x7cc   :  { %v2139_v59 = vadd.f32 0.5, %v2138_v56  ;;  %v5694_v56 = vld [vmem:[#allocation47_spill] sm:$0xff] }
 0x7cd   :  { %v2143_v13 = vadd.f32 0.5, %v2142_v44  ;;  %v5695_v44 = vld [vmem:[#allocation44_spill] sm:$0xff] }
 0x7ce   :  { %v2788_v39 = vpop.eup %2787 }
 0x7cf   :  { %v2149_v63 = vmul.f32 %v2143_v13, %v4757_v42  ;;  %v2150_v10 = vmul.f32 %v2788_v39, %v2139_v59  ;;  %v5688_v42 = vld [vmem:[#allocation24_spill] sm:$0xff]  ;;  %v5696_v59 = vld [vmem:[#allocation45_spill] sm:$0xff]  ;;  %v5697_v13 = vld [vmem:[#allocation46_spill] sm:$0xff] }
 0x7d0   :  { %v2790_v52 = vpop.eup %2789  ;;  %v5698_v39 = vld [vmem:[#allocation51_spill] sm:$0xff] }
 0x7d1   :  { %v4959_v45 = vadd.f32 %v2150_v10, %v2149_v63  ;;  %v2147_v37 = vmul.f32 0.5, %v2790_v52  ;;  %v5687_v10 = vld [vmem:[#allocation67_spill] sm:$0xff]  ;;  %v5699_v63 = vld [vmem:[#allocation48_spill] sm:$0xff]  ;;  %v5700_v52 = vld [vmem:[#allocation49_spill] sm:$0xff] }
 0x7d3   :  { %2791 = vtanh.f32 %v4959_v45  ;;  %v2148_v50 = vadd.f32 0.5, %v2147_v37  ;;  %v5701_v37 = vld [vmem:[#allocation50_spill] sm:$0xff] }
 0x7d9   :  { %v2792_v35 = vpop.eup %2791 }
 0x7da   :  { %v2153_v38 = vmul.f32 %v2792_v35, %v2148_v50  ;;  %v5702_v50 = vld [vmem:[#allocation54_spill] sm:$0xff]  ;;  %v5703_v35 = vld [vmem:[#allocation68_spill] sm:$0xff] }
 0x7dc   :  { %2174 = vmatmul.f32.vlgmr.msra.gmra.mxu0 %v2153_v38  ;;  %2194 = vmatmul.f32.vlgmr.msra.gmra.mxu1 %v2153_v38 }
 0x7dd   :  { %2214 = vmatmul.f32.vlgmr.msra.gmra.mxu2 %v2153_v38  ;;  %2234 = vmatmul.f32.vlgmr.msra.gmra.mxu3 %v2153_v38  ;;  %v5704_v38 = vld [vmem:[#allocation52_spill] sm:$0xff] }
 0x7de   :  { %2378 = vmatpush.msra.mxu0 %v4760_v51  ;;  %2398 = vmatpush.msra.mxu1 %v4763_v62 }
 0x7df   :  { %2418 = vmatpush.msra.mxu2 %v4766_v36  ;;  %2438 = vmatpush.msra.mxu3 %v4769_v40 }
 0x7e0   :  { %2379 = vmatpush.msra.mxu0 %v4772_v21  ;;  %2399 = vmatpush.msra.mxu1 %v4775_v32 }
 0x7e1   :  { %2419 = vmatpush.msra.mxu2 %v4778_v15  ;;  %2439 = vmatpush.msra.mxu3 %v4781_v47 }
 0x7e2   :  { %2380 = vmatpush.msra.mxu0 %v4784_v46  ;;  %2400 = vmatpush.msra.mxu1 %v4787_v17 }
 0x7e3   :  { %2420 = vmatpush.msra.mxu2 %v4790_v18  ;;  %2440 = vmatpush.msra.mxu3 %v4793_v22 }
 0x7e4   :  { %2381 = vmatpush.msra.mxu0 %v4796_v48  ;;  %2401 = vmatpush.msra.mxu1 %v4799_v16 }
 0x7e5   :  { %2421 = vmatpush.msra.mxu2 %v4802_v14  ;;  %2441 = vmatpush.msra.mxu3 %v4805_v19 }
 0x7e6   :  { %2382 = vmatpush.msra.mxu0 %v4808_v20  ;;  %2402 = vmatpush.msra.mxu1 %v4811_v57 }
 0x7e7   :  { %2422 = vmatpush.msra.mxu2 %v4814_v11  ;;  %2442 = vmatpush.msra.mxu3 %v4817_v26 }
 0x7e8   :  { %2383 = vmatpush.msra.mxu0 %v4820_v61  ;;  %2403 = vmatpush.msra.mxu1 %v4823_v60 }
 0x7e9   :  { %2423 = vmatpush.msra.mxu2 %v4826_v55  ;;  %2443 = vmatpush.msra.mxu3 %v4829_v1 }
 0x7ea   :  { %2384 = vmatpush.msra.mxu0 %v4832_v2  ;;  %2404 = vmatpush.msra.mxu1 %v4835_v4 }
 0x7eb   :  { %2424 = vmatpush.msra.mxu2 %v4838_v5  ;;  %2444 = vmatpush.msra.mxu3 %v4841_v6 }
 0x7ec   :  { %2385 = vmatpush.msra.mxu0 %v4844_v7  ;;  %2405 = vmatpush.msra.mxu1 %v4847_v58 }
 0x7ed   :  { %2425 = vmatpush.msra.mxu2 %v4850_v8  ;;  %2445 = vmatpush.msra.mxu3 %v4853_v9 }
 0x7ee   :  { %2386 = vmatpush.msra.mxu0 %v4856_v23  ;;  %2406 = vmatpush.msra.mxu1 %v4859_v24 }
 0x7ef   :  { %2426 = vmatpush.msra.mxu2 %v4862_v25  ;;  %2446 = vmatpush.msra.mxu3 %v4865_v27 }
 0x7f0   :  { %2387 = vmatpush.msra.mxu0 %v4868_v28  ;;  %2407 = vmatpush.msra.mxu1 %v4871_v29 }
 0x7f1   :  { %2427 = vmatpush.msra.mxu2 %v4874_v30  ;;  %2447 = vmatpush.msra.mxu3 %v4877_v31 }
 0x7f2   :  { %2388 = vmatpush.msra.mxu0 %v4880_v33  ;;  %2408 = vmatpush.msra.mxu1 %v4883_v34 }
 0x7f3   :  { %2428 = vmatpush.msra.mxu2 %v5687_v10  ;;  %2448 = vmatpush.msra.mxu3 %v5688_v42  ;;  %v5713_v42 = vld [vmem:[#allocation57_spill] sm:$0xff] }
 0x7f4   :  { %2389 = vmatpush.msra.mxu0 %v5689_v3  ;;  %2409 = vmatpush.msra.mxu1 %v5690_v49 }
 0x7f5   :  { %2429 = vmatpush.msra.mxu2 %v5691_v54  ;;  %2449 = vmatpush.msra.mxu3 %v5692_v0  ;;  %v5711_v0 = vld [vmem:[#allocation66_spill] sm:$0xff] }
 0x7f6   :  { %2390 = vmatpush.msra.mxu0 %v5693_v53  ;;  %2410 = vmatpush.msra.mxu1 %v5694_v56  ;;  %v5705_v56 = vld [vmem:[#allocation53_spill] sm:$0xff]  ;;  %v5710_v53 = vld [vmem:[#allocation38_spill] sm:$0xff] }
 0x7f7   :  { %2430 = vmatpush.msra.mxu2 %v5695_v44  ;;  %2450 = vmatpush.msra.mxu3 %v5696_v59  ;;  %v5706_v44 = vld [vmem:[#allocation18_spill] sm:$0xff]  ;;  %v5707_v59 = vld [vmem:[#allocation55_spill] sm:$0xff] }
 0x7f8   :  { %2391 = vmatpush.msra.mxu0 %v5697_v13  ;;  %2411 = vmatpush.msra.mxu1 %v5698_v39  ;;  %v5025_v13 = vld [vmem:[#allocation10 + $0x18] sm:$0xff]  ;;  %v5709_v39 = vld [vmem:[#allocation37_spill] sm:$0xff] }
 0x7f9   :  { %2431 = vmatpush.msra.mxu2 %v5699_v63  ;;  %2451 = vmatpush.msra.mxu3 %v5700_v52  ;;  %5708 = vst [vmem:[#allocation42_spill] sm:$0xff] %v5025_v13 }
 0x7fa   :  { %2392 = vmatpush.msra.mxu0 %v5701_v37  ;;  %2412 = vmatpush.msra.mxu1 %v5702_v50 }
 0x7fb   :  { %2432 = vmatpush.msra.mxu2 %v5703_v35  ;;  %2452 = vmatpush.msra.mxu3 %v5704_v38 }
 0x7fc   :  { %2393 = vmatpush.msra.mxu0 %v5705_v56  ;;  %2413 = vmatpush.msra.mxu1 %v5706_v44 }
 0x7fd   :  { %2433 = vmatpush.msra.mxu2 %v5707_v59  ;;  %2453 = vmatpush.msra.mxu3 %v5025_v13  ;;  %v5712_v59 = vld [vmem:[#allocation56_spill] sm:$0xff] }
 0x859   :  { %v2175_v63 = vpop.f32.mrf.mxu0  ;;  %v2195_v52 = vpop.f32.mrf.mxu1 }
 0x85a   :  { %v2238_v37 = vadd.f32 %v2175_v63, %v5709_v39  ;;  %v2239_v50 = vadd.f32 %v2195_v52, %v5710_v53 }
 0x85c   :  { %v2242_v35 = vadd.f32 %v2238_v37, %v5631_v12  ;;  %v2243_v38 = vadd.f32 %v2239_v50, %v5711_v0 }
 0x85e   :  { %v2246_v54 = vmul.f32 0.5, %v2242_v35  ;;  %v2250_v56 = vmul.f32 0.5, %v2243_v38 }
 0x860   :  { %2793 = vtanh.f32 %v2246_v54  ;;  %v2215_v44 = vpop.f32.mrf.mxu2  ;;  %v2235_v49 = vpop.f32.mrf.mxu3 }
 0x861   :  { %2795 = vtanh.f32 %v2250_v56  ;;  %v2240_v3 = vadd.f32 %v2215_v44, %v5712_v59  ;;  %v2241_v13 = vadd.f32 %v2235_v49, %v5713_v42 }
 0x863   :  { %v2244_v10 = vadd.f32 %v2240_v3, %v4599_v41  ;;  %v2245_v39 = vadd.f32 %v2241_v13, %v4601_v43 }
 0x865   :  { %2797 = vtanh.f32 %v2244_v10  ;;  %v2255_v53 = vmul.f32 0.5, %v2245_v39 }
 0x866   :  { %v2794_v63 = vpop.eup %2793 }
 0x867   :  { %v2796_v52 = vpop.eup %2795  ;;  %v2248_v37 = vmul.f32 0.5, %v2794_v63  ;;  %2799 = vtanh.f32 %v2255_v53 }
 0x868   :  { %v2252_v50 = vmul.f32 0.5, %v2796_v52 }
 0x869   :  { %v2249_v35 = vadd.f32 0.5, %v2248_v37 }
 0x86a   :  { %v2253_v54 = vadd.f32 0.5, %v2252_v50 }
 0x86b   :  { %v2798_v38 = vpop.eup %2797 }
 0x86c   :  { %v2259_v56 = vmul.f32 %v2253_v54, %v4959_v45  ;;  %v2260_v0 = vmul.f32 %v2798_v38, %v2249_v35 }
 0x86d   :  { %v2800_v44 = vpop.eup %2799 }
 0x86e   :  { %v5037_v59 = vadd.f32 %v2260_v0, %v2259_v56  ;;  %v2257_v42 = vmul.f32 0.5, %v2800_v44 }
 0x870   :  { %2801 = vtanh.f32 %v5037_v59  ;;  %v2258_v3 = vadd.f32 0.5, %v2257_v42 }
 0x876   :  { %v2802_v10 = vpop.eup %2801 }
 0x877   :  { %v2263_v49 = vmul.f32 %v2802_v10, %v2258_v3 }
 0x879   :  { %2284 = vmatmul.f32.vlgmr.msrb.gmra.mxu0 %v2263_v49  ;;  %2304 = vmatmul.f32.vlgmr.msrb.gmra.mxu1 %v2263_v49 }
 0x87a   :  { %2324 = vmatmul.f32.vlgmr.msrb.gmra.mxu2 %v2263_v49  ;;  %2344 = vmatmul.f32.vlgmr.msrb.gmra.mxu3 %v2263_v49  ;;  %v5741_v49 = vld [vmem:[#allocation61_spill] sm:$0xff] }
 0x87b   :  { %2488 = vmatpush.msrb.mxu0 %v4760_v51  ;;  %2508 = vmatpush.msrb.mxu1 %v4763_v62  ;;  %v5714_v51 = vld [vmem:[#allocation67_spill] sm:$0xff]  ;;  %v5715_v62 = vld [vmem:[#allocation24_spill] sm:$0xff] }
 0x87c   :  { %2528 = vmatpush.msrb.mxu2 %v4766_v36  ;;  %2548 = vmatpush.msrb.mxu3 %v4769_v40  ;;  %v5716_v36 = vld [vmem:[#allocation25_spill] sm:$0xff] }
 0x87d   :  { %2489 = vmatpush.msrb.mxu0 %v4772_v21  ;;  %2509 = vmatpush.msrb.mxu1 %v4775_v32  ;;  %v5717_v40 = vld [vmem:[#allocation65_spill] sm:$0xff]  ;;  %v5718_v21 = vld [vmem:[#allocation27_spill] sm:$0xff]  ;;  %v5719_v32 = vld [vmem:[#allocation28_spill] sm:$0xff] }
 0x87e   :  { %2529 = vmatpush.msrb.mxu2 %v4778_v15  ;;  %2549 = vmatpush.msrb.mxu3 %v4781_v47  ;;  %v5720_v15 = vld [vmem:[#allocation39_spill] sm:$0xff] }
 0x87f   :  { %2490 = vmatpush.msrb.mxu0 %v4784_v46  ;;  %2510 = vmatpush.msrb.mxu1 %v4787_v17  ;;  %v5721_v47 = vld [vmem:[#allocation47_spill] sm:$0xff]  ;;  %v5722_v46 = vld [vmem:[#allocation44_spill] sm:$0xff]  ;;  %v5723_v17 = vld [vmem:[#allocation45_spill] sm:$0xff] }
 0x880   :  { %2530 = vmatpush.msrb.mxu2 %v4790_v18  ;;  %2550 = vmatpush.msrb.mxu3 %v4793_v22  ;;  %v5724_v18 = vld [vmem:[#allocation46_spill] sm:$0xff]  ;;  %v5725_v22 = vld [vmem:[#allocation51_spill] sm:$0xff] }
 0x881   :  { %2491 = vmatpush.msrb.mxu0 %v4796_v48  ;;  %2511 = vmatpush.msrb.mxu1 %v4799_v16  ;;  %v5726_v48 = vld [vmem:[#allocation48_spill] sm:$0xff]  ;;  %v5727_v16 = vld [vmem:[#allocation49_spill] sm:$0xff] }
 0x882   :  { %2531 = vmatpush.msrb.mxu2 %v4802_v14  ;;  %2551 = vmatpush.msrb.mxu3 %v4805_v19  ;;  %v5728_v14 = vld [vmem:[#allocation50_spill] sm:$0xff] }
 0x883   :  { %2492 = vmatpush.msrb.mxu0 %v4808_v20  ;;  %2512 = vmatpush.msrb.mxu1 %v4811_v57  ;;  %v5729_v19 = vld [vmem:[#allocation54_spill] sm:$0xff]  ;;  %v5730_v20 = vld [vmem:[#allocation68_spill] sm:$0xff] }
 0x884   :  { %2532 = vmatpush.msrb.mxu2 %v4814_v11  ;;  %2552 = vmatpush.msrb.mxu3 %v4817_v26  ;;  %v5731_v57 = vld [vmem:[#allocation52_spill] sm:$0xff]  ;;  %v5732_v11 = vld [vmem:[#allocation53_spill] sm:$0xff]  ;;  %v5733_v26 = vld [vmem:[#allocation18_spill] sm:$0xff] }
 0x885   :  { %2493 = vmatpush.msrb.mxu0 %v4820_v61  ;;  %2513 = vmatpush.msrb.mxu1 %v4823_v60  ;;  %v5734_v61 = vld [vmem:[#allocation55_spill] sm:$0xff]  ;;  %v5735_v60 = vld [vmem:[#allocation42_spill] sm:$0xff] }
 0x886   :  { %2533 = vmatpush.msrb.mxu2 %v4826_v55  ;;  %2553 = vmatpush.msrb.mxu3 %v4829_v1 }
 0x887   :  { %2494 = vmatpush.msrb.mxu0 %v4832_v2  ;;  %2514 = vmatpush.msrb.mxu1 %v4835_v4  ;;  %v5736_v2 = vld [vmem:[#allocation69_spill] sm:$0xff] }
 0x888   :  { %2534 = vmatpush.msrb.mxu2 %v4838_v5  ;;  %2554 = vmatpush.msrb.mxu3 %v4841_v6  ;;  %v5737_v5 = vld [vmem:[#allocation58_spill] sm:$0xff] }
 0x889   :  { %2495 = vmatpush.msrb.mxu0 %v4844_v7  ;;  %2515 = vmatpush.msrb.mxu1 %v4847_v58  ;;  %v5738_v58 = vld [vmem:[#allocation66_spill] sm:$0xff] }
 0x88a   :  { %2535 = vmatpush.msrb.mxu2 %v4850_v8  ;;  %2555 = vmatpush.msrb.mxu3 %v4853_v9 }
 0x88b   :  { %2496 = vmatpush.msrb.mxu0 %v4856_v23  ;;  %2516 = vmatpush.msrb.mxu1 %v4859_v24 }
 0x88c   :  { %2536 = vmatpush.msrb.mxu2 %v4862_v25  ;;  %2556 = vmatpush.msrb.mxu3 %v4865_v27  ;;  %v5739_v27 = vld [vmem:[#allocation59_spill] sm:$0xff] }
 0x88d   :  { %2497 = vmatpush.msrb.mxu0 %v4868_v28  ;;  %2517 = vmatpush.msrb.mxu1 %v4871_v29  ;;  %v5740_v29 = vld [vmem:[#allocation60_spill] sm:$0xff] }
 0x88e   :  { %2537 = vmatpush.msrb.mxu2 %v4874_v30  ;;  %2557 = vmatpush.msrb.mxu3 %v4877_v31 }
 0x88f   :  { %2498 = vmatpush.msrb.mxu0 %v4880_v33  ;;  %2518 = vmatpush.msrb.mxu1 %v4883_v34 }
 0x890   :  { %2538 = vmatpush.msrb.mxu2 %v5714_v51  ;;  %2558 = vmatpush.msrb.mxu3 %v5715_v62  ;;  %v5742_v62 = vld [vmem:[#allocation62_spill] sm:$0xff] }
 0x891   :  { %2499 = vmatpush.msrb.mxu0 %v5716_v36  ;;  %2519 = vmatpush.msrb.mxu1 %v5717_v40 }
 0x892   :  { %2539 = vmatpush.msrb.mxu2 %v5718_v21  ;;  %2559 = vmatpush.msrb.mxu3 %v5719_v32 }
 0x893   :  { %2500 = vmatpush.msrb.mxu0 %v5720_v15  ;;  %2520 = vmatpush.msrb.mxu1 %v5721_v47 }
 0x894   :  { %2540 = vmatpush.msrb.mxu2 %v5722_v46  ;;  %2560 = vmatpush.msrb.mxu3 %v5723_v17  ;;  %v5743_v46 = vld [vmem:[#allocation63_spill] sm:$0xff] }
 0x895   :  { %2501 = vmatpush.msrb.mxu0 %v5724_v18  ;;  %2521 = vmatpush.msrb.mxu1 %v5725_v22  ;;  %v5744_v18 = vld [vmem:[#allocation70_spill] sm:$0xff] }
 0x896   :  { %2541 = vmatpush.msrb.mxu2 %v5726_v48  ;;  %2561 = vmatpush.msrb.mxu3 %v5727_v16 }
 0x897   :  { %2502 = vmatpush.msrb.mxu0 %v5728_v14  ;;  %2522 = vmatpush.msrb.mxu1 %v5729_v19 }
 0x898   :  { %2542 = vmatpush.msrb.mxu2 %v5730_v20  ;;  %2562 = vmatpush.msrb.mxu3 %v5731_v57 }
 0x899   :  { %2503 = vmatpush.msrb.mxu0 %v5732_v11  ;;  %2523 = vmatpush.msrb.mxu1 %v5733_v26 }
 0x89a   :  { %2543 = vmatpush.msrb.mxu2 %v5734_v61  ;;  %2563 = vmatpush.msrb.mxu3 %v5735_v60 }
 0x8f6   :  { %v2285_v55 = vpop.f32.mrf.mxu0  ;;  %v2305_v1 = vpop.f32.mrf.mxu1 }
 0x8f7   :  { %v2348_v4 = vadd.f32 %v2285_v55, %v5736_v2  ;;  %v2349_v6 = vadd.f32 %v2305_v1, %v5737_v5 }
 0x8f9   :  { %v2352_v7 = vadd.f32 %v2348_v4, %v5631_v12  ;;  %v2353_v8 = vadd.f32 %v2349_v6, %v5738_v58 }
 0x8fb   :  { %v2356_v9 = vmul.f32 0.5, %v2352_v7  ;;  %v2360_v23 = vmul.f32 0.5, %v2353_v8 }
 0x8fd   :  { %2803 = vtanh.f32 %v2356_v9  ;;  %v2325_v24 = vpop.f32.mrf.mxu2  ;;  %v2345_v25 = vpop.f32.mrf.mxu3  ;;  %v2609_v9 = vld [vmem:[#allocation12 + $0x78] sm:$0xff] }
 0x8fe   :  { %2805 = vtanh.f32 %v2360_v23  ;;  %v2350_v28 = vadd.f32 %v2325_v24, %v5739_v27  ;;  %v2351_v30 = vadd.f32 %v2345_v25, %v5740_v29  ;;  %v2608_v23 = vld [vmem:[#allocation12 + $0x70] sm:$0xff]  ;;  %v2607_v24 = vld [vmem:[#allocation12 + $0x68] sm:$0xff]  ;;  %v2606_v25 = vld [vmem:[#allocation12 + $0x60] sm:$0xff] }
 0x8ff   :  { %v2605_v27 = vld [vmem:[#allocation12 + $0x58] sm:$0xff]  ;;  %v2603_v29 = vld [vmem:[#allocation12 + $0x48] sm:$0xff] }
 0x900   :  { %v2354_v31 = vadd.f32 %v2350_v28, %v4599_v41  ;;  %v2355_v33 = vadd.f32 %v2351_v30, %v4601_v43  ;;  %v2604_v28 = vld [vmem:[#allocation12 + $0x50] sm:$0xff]  ;;  %v2602_v30 = vld [vmem:[#allocation12 + $0x40] sm:$0xff] }
 0x902   :  { %2807 = vtanh.f32 %v2354_v31  ;;  %v2365_v34 = vmul.f32 0.5, %v2355_v33  ;;  %v2601_v31 = vld [vmem:[#allocation12 + $0x38] sm:$0xff]  ;;  %v2600_v33 = vld [vmem:[#allocation12 + $0x30] sm:$0xff] }
 0x903   :  { %v2804_v45 = vpop.eup %2803 }
 0x904   :  { %v2806_v0 = vpop.eup %2805  ;;  %v2358_v13 = vmul.f32 0.5, %v2804_v45  ;;  %2809 = vtanh.f32 %v2365_v34  ;;  %v2599_v34 = vld [vmem:[#allocation12 + $0x28] sm:$0xff]  ;;  %v2598_v45 = vld [vmem:[#allocation12 + $0x20] sm:$0xff] }
 0x905   :  { %v2362_v39 = vmul.f32 0.5, %v2806_v0  ;;  %v2597_v0 = vld [vmem:[#allocation12 + $0x18] sm:$0xff] }
 0x906   :  { %v2359_v53 = vadd.f32 0.5, %v2358_v13  ;;  %v2596_v13 = vld [vmem:[#allocation12 + $0x10] sm:$0xff] }
 0x907   :  { %v2363_v63 = vadd.f32 0.5, %v2362_v39  ;;  %v2595_v39 = vld [vmem:[#allocation12 + $0x8] sm:$0xff] }
 0x908   :  { %v2808_v52 = vpop.eup %2807 }
 0x909   :  { %v2369_v37 = vmul.f32 %v2363_v63, %v5037_v59  ;;  %v2370_v50 = vmul.f32 %v2808_v52, %v2359_v53  ;;  %v2594_v53 = vld [vmem:[#allocation12] sm:$0xff] }
 0x90a   :  { %v2810_v35 = vpop.eup %2809 }
 0x90b   :  { %v2371_v54 = vadd.f32 %v2370_v50, %v2369_v37  ;;  %v2367_v38 = vmul.f32 0.5, %v2810_v35  ;;  %v5745_v37 = vld [vmem:[#allocation40_spill] sm:$0xff]  ;;  %v5746_v35 = vld [vmem:[#allocation41_spill] sm:$0xff] }
 0x90d   :  { %2811 = vtanh.f32 %v2371_v54  ;;  %v2368_v56 = vadd.f32 0.5, %v2367_v38 }
 0x913   :  { %v2812_v44 = vpop.eup %2811 }
 0x914   :  { %v2373_v42 = vmul.f32 %v2812_v44, %v2368_v56 }
 0x916   :  { %2394 = vmatmul.f32.vlgmr.msra.gmra.mxu0 %v2373_v42  ;;  %2414 = vmatmul.f32.vlgmr.msra.gmra.mxu1 %v2373_v42 }
 0x917   :  { %2434 = vmatmul.f32.vlgmr.msra.gmra.mxu2 %v2373_v42  ;;  %2454 = vmatmul.f32.vlgmr.msra.gmra.mxu3 %v2373_v42 }
 0x918   :  { %2614 = vmatpush.msra.mxu0 %v2609_v9 }
 0x91a   :  { %2615 = vmatpush.msra.mxu0 %v2608_v23 }
 0x91c   :  { %2616 = vmatpush.msra.mxu0 %v2607_v24 }
 0x91e   :  { %2617 = vmatpush.msra.mxu0 %v2606_v25 }
 0x920   :  { %2618 = vmatpush.msra.mxu0 %v2605_v27 }
 0x922   :  { %2619 = vmatpush.msra.mxu0 %v2604_v28 }
 0x924   :  { %2620 = vmatpush.msra.mxu0 %v2603_v29 }
 0x926   :  { %2621 = vmatpush.msra.mxu0 %v2602_v30 }
 0x928   :  { %2622 = vmatpush.msra.mxu0 %v2601_v31 }
 0x92a   :  { %2623 = vmatpush.msra.mxu0 %v2600_v33 }
 0x92c   :  { %2624 = vmatpush.msra.mxu0 %v2599_v34 }
 0x92e   :  { %2625 = vmatpush.msra.mxu0 %v2598_v45 }
 0x930   :  { %2626 = vmatpush.msra.mxu0 %v2597_v0 }
 0x932   :  { %2627 = vmatpush.msra.mxu0 %v2596_v13 }
 0x934   :  { %2628 = vmatpush.msra.mxu0 %v2595_v39 }
 0x936   :  { %2629 = vmatpush.msra.mxu0 %v2594_v53 }
 0x993   :  { %v2395_v3 = vpop.f32.mrf.mxu0  ;;  %v2415_v10 = vpop.f32.mrf.mxu1 }
 0x994   :  { %v2458_v51 = vadd.f32 %v2395_v3, %v5741_v49  ;;  %v2459_v36 = vadd.f32 %v2415_v10, %v5742_v62  ;;  %v5747_v49 = vld [vmem:[#allocation26_spill] sm:$0xff]  ;;  %v5748_v62 = vld [vmem:[#allocation64_spill] sm:$0xff] }
 0x996   :  { %v2462_v59 = vadd.f32 %v2458_v51, %v5631_v12  ;;  %v2463_v40 = vadd.f32 %v2459_v36, %v5738_v58 }
 0x998   :  { %v2466_v21 = vmul.f32 0.5, %v2462_v59  ;;  %v2470_v32 = vmul.f32 0.5, %v2463_v40 }
 0x99a   :  { %2813 = vtanh.f32 %v2466_v21  ;;  %v2435_v15 = vpop.f32.mrf.mxu2  ;;  %v2455_v47 = vpop.f32.mrf.mxu3 }
 0x99b   :  { %2815 = vtanh.f32 %v2470_v32  ;;  %v2460_v17 = vadd.f32 %v2435_v15, %v5743_v46  ;;  %v2461_v22 = vadd.f32 %v2455_v47, %v5744_v18 }
 0x99d   :  { %v2464_v48 = vadd.f32 %v2460_v17, %v4599_v41  ;;  %v2465_v16 = vadd.f32 %v2461_v22, %v4601_v43 }
 0x99f   :  { %2817 = vtanh.f32 %v2464_v48  ;;  %v2475_v14 = vmul.f32 0.5, %v2465_v16 }
 0x9a0   :  { %v2814_v19 = vpop.eup %2813 }
 0x9a1   :  { %v2816_v20 = vpop.eup %2815  ;;  %v2468_v57 = vmul.f32 0.5, %v2814_v19  ;;  %2819 = vtanh.f32 %v2475_v14 }
 0x9a2   :  { %v2472_v11 = vmul.f32 0.5, %v2816_v20  ;;  %v2672_v20 = vld [vmem:[%s5147_s8] ss:$0 sm:$0xff] }
 0x9a3   :  { %v2469_v26 = vadd.f32 0.5, %v2468_v57 }
 0x9a4   :  { %v2473_v61 = vadd.f32 0.5, %v2472_v11 }
 0x9a5   :  { %v2818_v60 = vpop.eup %2817 }
 0x9a6   :  { %v2479_v55 = vmul.f32 %v2473_v61, %v2371_v54  ;;  %v2480_v1 = vmul.f32 %v2818_v60, %v2469_v26 }
 0x9a7   :  { %v2820_v2 = vpop.eup %2819 }
 0x9a8   :  { %v5121_v4 = vadd.f32 %v2480_v1, %v2479_v55  ;;  %v2477_v5 = vmul.f32 0.5, %v2820_v2 }
 0x9aa   :  { %2821 = vtanh.f32 %v5121_v4  ;;  %v2478_v6 = vadd.f32 0.5, %v2477_v5 }
 0x9b0   :  { %v2822_v7 = vpop.eup %2821 }
 0x9b1   :  { %v2483_v8 = vmul.f32 %v2822_v7, %v2478_v6 }
 0x9b3   :  { %2504 = vmatmul.f32.vlgmr.msrb.gmra.mxu0 %v2483_v8  ;;  %2524 = vmatmul.f32.vlgmr.msrb.gmra.mxu1 %v2483_v8 }
 0x9b4   :  { %2544 = vmatmul.f32.vlgmr.msrb.gmra.mxu2 %v2483_v8  ;;  %2564 = vmatmul.f32.vlgmr.msrb.gmra.mxu3 %v2483_v8 }
 0xa30   :  { %v2505_v63 = vpop.f32.mrf.mxu0  ;;  %v2525_v52 = vpop.f32.mrf.mxu1 }
 0xa31   :  { %v2568_v50 = vadd.f32 %v2505_v63, %v5745_v37  ;;  %v2569_v54 = vadd.f32 %v2525_v52, %v5746_v35 }
 0xa33   :  { %v2572_v38 = vadd.f32 %v2568_v50, %v5631_v12  ;;  %v2573_v56 = vadd.f32 %v2569_v54, %v5738_v58 }
 0xa35   :  { %v2576_v44 = vmul.f32 0.5, %v2572_v38  ;;  %v2580_v42 = vmul.f32 0.5, %v2573_v56 }
 0xa37   :  { %2823 = vtanh.f32 %v2576_v44  ;;  %v2545_v3 = vpop.f32.mrf.mxu2  ;;  %v2565_v10 = vpop.f32.mrf.mxu3 }
 0xa38   :  { %2825 = vtanh.f32 %v2580_v42  ;;  %v2570_v51 = vadd.f32 %v2545_v3, %v5747_v49  ;;  %v2571_v36 = vadd.f32 %v2565_v10, %v5748_v62 }
 0xa3a   :  { %v2574_v59 = vadd.f32 %v2570_v51, %v4599_v41  ;;  %v2575_v40 = vadd.f32 %v2571_v36, %v4601_v43 }
 0xa3c   :  { %2827 = vtanh.f32 %v2574_v59  ;;  %v2585_v21 = vmul.f32 0.5, %v2575_v40 }
 0xa3d   :  { %v2824_v32 = vpop.eup %2823 }
 0xa3e   :  { %v2826_v12 = vpop.eup %2825  ;;  %v2578_v15 = vmul.f32 0.5, %v2824_v32  ;;  %2829 = vtanh.f32 %v2585_v21 }
 0xa3f   :  { %v2582_v58 = vmul.f32 0.5, %v2826_v12 }
 0xa40   :  { %v2579_v47 = vadd.f32 0.5, %v2578_v15 }
 0xa41   :  { %v2583_v46 = vadd.f32 0.5, %v2582_v58 }
 0xa42   :  { %v2828_v17 = vpop.eup %2827 }
 0xa43   :  { %v2589_v18 = vmul.f32 %v2583_v46, %v5121_v4  ;;  %v2590_v22 = vmul.f32 %v2828_v17, %v2579_v47 }
 0xa44   :  { %v2830_v48 = vpop.eup %2829 }
 0xa45   :  { %v2591_v16 = vadd.f32 %v2590_v22, %v2589_v18  ;;  %v2587_v14 = vmul.f32 0.5, %v2830_v48 }
 0xa47   :  { %2831 = vtanh.f32 %v2591_v16  ;;  %v2588_v41 = vadd.f32 0.5, %v2587_v14 }
 0xa4d   :  { %v2832_v19 = vpop.eup %2831 }
 0xa4e   :  { %v2593_v43 = vmul.f32 %v2832_v19, %v2588_v41 }
 0xa50   :  { %2630 = vmatmul.f32.vlgmr.msra.gmra.mxu0 %v2593_v43 }
 0xacd   :  { %v2631_v57 = vpop.f32.mrf.mxu0 }
 0xace   :  { %v2632_v11 = vadd.f32 %v2672_v20, %v2631_v57 }
 0xad0   :  { %2634 = vst [vmem:[#allocation13] sm:$0xff] %v2632_v11 }
 0xad1   :  { %2645 = dma.vmem_to_hbm [thread:$0]  %s2641_s30, 128, %s2643_s11, [#allocation6]  }
 0xad2   :  { %3111 = dma.done.wait [#allocation6], 128  }
 0xad3   :  { %3112 = vsyncadd [#allocation6], 4294967168 }
 0xad4   :  { %2650 = vsyncpa [#allocation5], 1 }
 0xad5   :  { %2651 = vsyncpa [#allocation8], 1 }
 0xad6   :  { %2652 = vsyncpa [#allocation11], 1 }
 0xad7   :  { %2653 = vsyncpa [#allocation6], 1 }

</bundles_post_ra>
